<compile_context>
chip_gen: v5e
topology: v5e:2x2
jax: 0.10.0
libtpu: 0.0.40
codegen_flags: <defaults>
</compile_context>

<pallas_src>
import functools

import jax
import jax.numpy as jnp
from jax import lax
from jax.experimental import pallas as pl
from jax.experimental.pallas import tpu as pltpu


# ----------------------------- in-kernel helpers -----------------------------

def _lstm_cell(gates, c, hidden):
    """Elementwise LSTM cell math in f32 (VPU/EUP). gates:(B,4H), c:(B,H)."""
    i_g = jax.nn.sigmoid(gates[:, 0 * hidden:1 * hidden])
    f_g = jax.nn.sigmoid(gates[:, 1 * hidden:2 * hidden])
    g_g = jnp.tanh(gates[:, 2 * hidden:3 * hidden])
    o_g = jax.nn.sigmoid(gates[:, 3 * hidden:4 * hidden])
    c_new = f_g * c + i_g * g_g
    h_new = o_g * jnp.tanh(c_new)
    return h_new, c_new


def _lstm_block_kernel(x_ref, wih_ref, whh_ref, y_ref,
                       h_ref, c_ref, xw_ref, *, unroll):
    """One grid step = `tb` timesteps of a single-direction LSTM.

    x_ref:   (tb, B, I)   input block (mxu dtype)
    wih_ref: (I, 4H)      VMEM-resident input->gate weights
    whh_ref: (H, 4H)      VMEM-resident hidden->gate weights
    y_ref:   (tb, B, H)   output hidden states for this block (f32)
    h_ref/c_ref: (B, H)   recurrent state carried across grid steps
    xw_ref:  (tb, B, 4H)  scratch holding the hoisted input projection
    """
    t = pl.program_id(0)

    @pl.when(t == 0)
    def _():
        h_ref[...] = jnp.zeros_like(h_ref)
        c_ref[...] = jnp.zeros_like(c_ref)

    n_steps, batch, in_size = x_ref.shape
    hidden = h_ref.shape[-1]

    # Hoisted input projection: one big MXU matmul per block, off the serial path.
    xw = jnp.dot(x_ref[...].reshape(n_steps * batch, in_size), wih_ref[...],
                 preferred_element_type=jnp.float32)
    xw_ref[...] = xw.reshape(n_steps, batch, 4 * hidden)

    whh = whh_ref[...]              # loaded once per grid step
    mxu_dtype = whh.dtype

    def step(j, carry):
        h, c = carry
        gates = xw_ref[j] + jnp.dot(h.astype(mxu_dtype), whh,
                                    preferred_element_type=jnp.float32)
        h, c = _lstm_cell(gates, c, hidden)
        y_ref[j] = h.astype(y_ref.dtype)
        return h, c

    h, c = lax.fori_loop(0, n_steps, step,
                         (h_ref[...], c_ref[...]), unroll=unroll)
    h_ref[...] = h
    c_ref[...] = c


def _bilstm_block_kernel(xf_ref, xr_ref,
                         wih_f_ref, whh_f_ref, wih_r_ref, whh_r_ref,
                         yf_ref, yr_ref,
                         hf_ref, cf_ref, hr_ref, cr_ref,
                         xwf_ref, xwr_ref, *, unroll):
    """Fused bidirectional block: forward chain on block t, reverse chain on the
    mirrored block (nb-1-t), both interleaved in the same unrolled loop.
    Reverse outputs are written through a flipped out index_map, so both output
    arrays are already in forward time order (no jnp.flip anywhere)."""
    t = pl.program_id(0)

    @pl.when(t == 0)
    def _():
        hf_ref[...] = jnp.zeros_like(hf_ref)
        cf_ref[...] = jnp.zeros_like(cf_ref)
        hr_ref[...] = jnp.zeros_like(hr_ref)
        cr_ref[...] = jnp.zeros_like(cr_ref)

    n_steps, batch, in_size = xf_ref.shape
    hidden = hf_ref.shape[-1]

    # Hoisted input projections (one big MXU matmul per direction per block).
    xwf = jnp.dot(xf_ref[...].reshape(n_steps * batch, in_size), wih_f_ref[...],
                  preferred_element_type=jnp.float32)
    xwf_ref[...] = xwf.reshape(n_steps, batch, 4 * hidden)
    xwr = jnp.dot(xr_ref[...].reshape(n_steps * batch, in_size), wih_r_ref[...],
                  preferred_element_type=jnp.float32)
    xwr_ref[...] = xwr.reshape(n_steps, batch, 4 * hidden)

    whh_f = whh_f_ref[...]
    whh_r = whh_r_ref[...]
    mxu_dtype = whh_f.dtype

    def step(j, carry):
        hf, cf, hr, cr = carry
        # Forward chain: in-block time index j.
        gates_f = xwf_ref[j] + jnp.dot(hf.astype(mxu_dtype), whh_f,
                                       preferred_element_type=jnp.float32)
        hf, cf = _lstm_cell(gates_f, cf, hidden)
        yf_ref[j] = hf.astype(yf_ref.dtype)
        # Reverse chain: walks the mirrored block back-to-front.
        jr = n_steps - 1 - j
        gates_r = xwr_ref[jr] + jnp.dot(hr.astype(mxu_dtype), whh_r,
                                        preferred_element_type=jnp.float32)
        hr, cr = _lstm_cell(gates_r, cr, hidden)
        yr_ref[jr] = hr.astype(yr_ref.dtype)
        return hf, cf, hr, cr

    hf, cf, hr, cr = lax.fori_loop(
        0, n_steps, step,
        (hf_ref[...], cf_ref[...], hr_ref[...], cr_ref[...]), unroll=unroll)
    hf_ref[...] = hf
    cf_ref[...] = cf
    hr_ref[...] = hr
    cr_ref[...] = cr


# --------------------------------- wrappers ----------------------------------

def _pick_time_block(T, B, I, H, num_dir, mxu_itemsize, budget_bytes):
    """Largest tb dividing T whose pipelined x/y/xw footprint fits the budget,
    capped so the grid has >= 2 steps (otherwise nothing pipelines)."""
    per_t = num_dir * (2 * B * I * mxu_itemsize    # double-buffered x block(s)
                       + 2 * B * H * 4             # double-buffered y block(s)
                       + B * 4 * H * 4)            # xw projection scratch
    tb = max(1, min(T, budget_bytes // max(per_t, 1)))
    if T >= 2:
        tb = min(tb, T // 2)
    tb = max(1, tb)
    while T % tb:
        tb -= 1
    return tb


def _pick_unroll(tb, B, H, num_dir):
    """Fully unroll unless the per-step gate slabs threaten the vreg file."""
    step_bytes = num_dir * B * 4 * H * 4
    return tb if step_bytes <= 32 * 1024 else min(tb, 2)


def lstm_forward_pallas(x, w_ih, w_hh, *, time_block=None,
                        mxu_dtype=jnp.bfloat16,
                        vmem_limit_bytes=64 * 1024 * 1024):
    """Single-direction, single-layer, bias-free LSTM with h0 = c0 = 0.

    x: (T, B, I); w_ih: (4H, I); w_hh: (4H, H) (PyTorch layouts). Returns (T,B,H) f32.
    """
    T, B, I = x.shape
    H = w_hh.shape[1]
    assert w_ih.shape == (4 * H, I) and w_hh.shape == (4 * H, H)

    itemsize = jnp.dtype(mxu_dtype).itemsize
    tb = time_block or _pick_time_block(T, B, I, H, 1, itemsize, vmem_limit_bytes // 4)
    assert T % tb == 0, "seq_len must be divisible by time_block"
    unroll = _pick_unroll(tb, B, H, 1)

    # One-time transposes/casts so in-kernel matmuls are (.,I)x(I,4H)/(.,H)x(H,4H)
    # with bf16 MXU operands and f32 accumulation.
    w_ih_t = jnp.transpose(w_ih).astype(mxu_dtype)   # (I, 4H)
    w_hh_t = jnp.transpose(w_hh).astype(mxu_dtype)   # (H, 4H)

    kernel = functools.partial(_lstm_block_kernel, unroll=unroll)
    return pl.pallas_call(
        kernel,
        out_shape=jax.ShapeDtypeStruct((T, B, H), jnp.float32),
        grid=(T // tb,),
        in_specs=[
            pl.BlockSpec((tb, B, I), lambda t: (t, 0, 0)),
            pl.BlockSpec((I, 4 * H), lambda t: (0, 0)),   # constant block -> resident
            pl.BlockSpec((H, 4 * H), lambda t: (0, 0)),   # constant block -> resident
        ],
        out_specs=pl.BlockSpec((tb, B, H), lambda t: (t, 0, 0)),
        scratch_shapes=[
            pltpu.VMEM((B, H), jnp.float32),            # h carry
            pltpu.VMEM((B, H), jnp.float32),            # c carry
            pltpu.VMEM((tb, B, 4 * H), jnp.float32),    # hoisted x@W_ih block
        ],
        compiler_params=pltpu.CompilerParams(
            dimension_semantics=("arbitrary",),         # serial recurrence
            vmem_limit_bytes=vmem_limit_bytes,
        ),
    )(x.astype(mxu_dtype), w_ih_t, w_hh_t)


def bilstm_forward_pallas(x, w_ih_f, w_hh_f, w_ih_r, w_hh_r, *, time_block=None,
                          mxu_dtype=jnp.bfloat16,
                          vmem_limit_bytes=64 * 1024 * 1024):
    """Fused bidirectional LSTM; returns y_fwd + y_bwd (BRNN's direction sum)."""
    T, B, I = x.shape
    H = w_hh_f.shape[1]
    assert w_ih_f.shape == (4 * H, I) and w_hh_f.shape == (4 * H, H)
    assert w_ih_r.shape == (4 * H, I) and w_hh_r.shape == (4 * H, H)

    itemsize = jnp.dtype(mxu_dtype).itemsize
    tb = time_block or _pick_time_block(T, B, I, H, 2, itemsize, vmem_limit_bytes // 4)
    assert T % tb == 0, "seq_len must be divisible by time_block"
    unroll = _pick_unroll(tb, B, H, 2)
    nb = T // tb

    w_ih_ft = jnp.transpose(w_ih_f).astype(mxu_dtype)
    w_hh_ft = jnp.transpose(w_hh_f).astype(mxu_dtype)
    w_ih_rt = jnp.transpose(w_ih_r).astype(mxu_dtype)
    w_hh_rt = jnp.transpose(w_hh_r).astype(mxu_dtype)
    xm = x.astype(mxu_dtype)

    kernel = functools.partial(_bilstm_block_kernel, unroll=unroll)
    yf, yr = pl.pallas_call(
        kernel,
        out_shape=(jax.ShapeDtypeStruct((T, B, H), jnp.float32),
                   jax.ShapeDtypeStruct((T, B, H), jnp.float32)),
        grid=(nb,),
        in_specs=[
            pl.BlockSpec((tb, B, I), lambda t: (t, 0, 0)),             # fwd x block
            pl.BlockSpec((tb, B, I), lambda t: (nb - 1 - t, 0, 0)),    # mirrored x block
            pl.BlockSpec((I, 4 * H), lambda t: (0, 0)),
            pl.BlockSpec((H, 4 * H), lambda t: (0, 0)),
            pl.BlockSpec((I, 4 * H), lambda t: (0, 0)),
            pl.BlockSpec((H, 4 * H), lambda t: (0, 0)),
        ],
        out_specs=(
            pl.BlockSpec((tb, B, H), lambda t: (t, 0, 0)),
            pl.BlockSpec((tb, B, H), lambda t: (nb - 1 - t, 0, 0)),    # flipped writeback
        ),
        scratch_shapes=[
            pltpu.VMEM((B, H), jnp.float32),            # h fwd
            pltpu.VMEM((B, H), jnp.float32),            # c fwd
            pltpu.VMEM((B, H), jnp.float32),            # h bwd
            pltpu.VMEM((B, H), jnp.float32),            # c bwd
            pltpu.VMEM((tb, B, 4 * H), jnp.float32),    # xw fwd
            pltpu.VMEM((tb, B, 4 * H), jnp.float32),    # xw bwd
        ],
        compiler_params=pltpu.CompilerParams(
            dimension_semantics=("arbitrary",),
            vmem_limit_bytes=vmem_limit_bytes,
        ),
    )(xm, xm, w_ih_ft, w_hh_ft, w_ih_rt, w_hh_rt)
    return yf + yr


def brnn_forward(x, params, *, bidirectional=False, time_block=None,
                 mxu_dtype=jnp.bfloat16, vmem_limit_bytes=64 * 1024 * 1024):
    """Pallas equivalent of BRNN.forward (rnn_type=nn.LSTM, bias=False)."""
    if bidirectional:
        return bilstm_forward_pallas(
            x, params["w_ih_l0"], params["w_hh_l0"],
            params["w_ih_l0_reverse"], params["w_hh_l0_reverse"],
            time_block=time_block, mxu_dtype=mxu_dtype,
            vmem_limit_bytes=vmem_limit_bytes)
    return lstm_forward_pallas(
        x, params["w_ih_l0"], params["w_hh_l0"],
        time_block=time_block, mxu_dtype=mxu_dtype,
        vmem_limit_bytes=vmem_limit_bytes)


# ----------------------- pure-JAX reference (lax.scan) -----------------------

def _lstm_ref(x, w_ih, w_hh):
    H = w_hh.shape[1]
    B = x.shape[1]
    hp = lax.Precision.HIGHEST

    def step(carry, x_t):
        h, c = carry
        gates = (jnp.dot(x_t, w_ih.T, precision=hp)
                 + jnp.dot(h, w_hh.T, precision=hp))
        i_g = jax.nn.sigmoid(gates[:, 0 * H:1 * H])
        f_g = jax.nn.sigmoid(gates[:, 1 * H:2 * H])
        g_g = jnp.tanh(gates[:, 2 * H:3 * H])
        o_g = jax.nn.sigmoid(gates[:, 3 * H:4 * H])
        c = f_g * c + i_g * g_g
        h = o_g * jnp.tanh(c)
        return (h, c), h

    init = (jnp.zeros((B, H), jnp.float32), jnp.zeros((B, H), jnp.float32))
    _, ys = lax.scan(step, init, x)
    return ys


def _brnn_ref(x, params, bidirectional):
    y = _lstm_ref(x, params["w_ih_l0"], params["w_hh_l0"])
    if bidirectional:
        y_rev = _lstm_ref(jnp.flip(x, axis=0),
                          params["w_ih_l0_reverse"], params["w_hh_l0_reverse"])
        y = y + jnp.flip(y_rev, axis=0)
    return y


if __name__ == "__main__":
    key = jax.random.PRNGKey(0)
    ks = jax.random.split(key, 5)

    # Lane-dense demo shapes: H = 128 so gate slices / output stores are unmasked.
    T, B, I, H = 16, 8, 64, 128        # seq_len, batch, input_size, hidden_size
    bound = 1.0 / (H ** 0.5)           # PyTorch LSTM init range

    x = jax.random.normal(ks[0], (T, B, I), dtype=jnp.float32)
    params = {
        "w_ih_l0":         jax.random.uniform(ks[1], (4 * H, I), jnp.float32, -bound, bound),
        "w_hh_l0":         jax.random.uniform(ks[2], (4 * H, H), jnp.float32, -bound, bound),
        "w_ih_l0_reverse": jax.random.uniform(ks[3], (4 * H, I), jnp.float32, -bound, bound),
        "w_hh_l0_reverse": jax.random.uniform(ks[4], (4 * H, H), jnp.float32, -bound, bound),
    }

    ref_uni = _brnn_ref(x, params, False)
    ref_bi = _brnn_ref(x, params, True)

    # Exact-math variant (f32 MXU operands) — strict check of the kernel logic.
    uni_f32 = jax.jit(functools.partial(brnn_forward, bidirectional=False,
                                        mxu_dtype=jnp.float32))(x, params)
    bi_f32 = jax.jit(functools.partial(brnn_forward, bidirectional=True,
                                       mxu_dtype=jnp.float32))(x, params)
    # Fast variant (bf16 MXU operands, f32 accumulation + gate math).
    uni_bf16 = jax.jit(functools.partial(brnn_forward, bidirectional=False))(x, params)
    bi_bf16 = jax.jit(functools.partial(brnn_forward, bidirectional=True))(x, params)
    jax.block_until_ready((uni_f32, bi_f32, uni_bf16, bi_bf16))

    assert uni_f32.shape == (T, B, H) and bi_f32.shape == (T, B, H)
    assert jnp.allclose(uni_f32, ref_uni, rtol=5e-3, atol=5e-3), \
        float(jnp.max(jnp.abs(uni_f32 - ref_uni)))
    assert jnp.allclose(bi_f32, ref_bi, rtol=5e-3, atol=5e-3), \
        float(jnp.max(jnp.abs(bi_f32 - ref_bi)))
    assert jnp.allclose(uni_bf16, ref_uni, rtol=5e-2, atol=5e-2), \
        float(jnp.max(jnp.abs(uni_bf16 - ref_uni)))
    assert jnp.allclose(bi_bf16, ref_bi, rtol=5e-2, atol=5e-2), \
        float(jnp.max(jnp.abs(bi_bf16 - ref_bi)))

    print("KERNEL_OK")
</pallas_src>

<mosaic_0001>
module attributes {stable_mosaic.version = 11 : i64} {
  func.func @_lstm_block_kernel(%arg0: i32, %arg1: memref<8x8x64xf32, #tpu.memory_space<vmem>>, %arg2: memref<64x512xf32, #tpu.memory_space<vmem>>, %arg3: memref<128x512xf32, #tpu.memory_space<vmem>>, %arg4: memref<8x8x128xf32, #tpu.memory_space<vmem>>, %arg5: memref<8x128xf32, #tpu.memory_space<vmem>>, %arg6: memref<8x128xf32, #tpu.memory_space<vmem>>, %arg7: memref<8x8x512xf32, #tpu.memory_space<vmem>>) attributes {dimension_semantics = [#tpu.dimension_semantics<arbitrary>], iteration_bounds = array<i64: 2>, scalar_prefetch = 0 : i64, scratch_operands = 3 : i64, tpu.core_type = #tpu.core_type<tc>, window_params = [{transform_indices = @transform_0, window_bounds = array<i64: 8, 8, 64>}, {pipeline_mode = #tpu.pipeline_mode<synchronous>, transform_indices = @transform_1, window_bounds = array<i64: 64, 512>}, {pipeline_mode = #tpu.pipeline_mode<synchronous>, transform_indices = @transform_2, window_bounds = array<i64: 128, 512>}, {transform_indices = @transform_3, window_bounds = array<i64: 8, 8, 128>}]} {
    %c0_i32 = arith.constant 0 : i32
    %0 = arith.cmpi eq, %arg0, %c0_i32 : i32
    %1 = arith.extui %0 : i1 to i32
    %c0_i32_0 = arith.constant 0 : i32
    %2 = arith.cmpi ne, %1, %c0_i32_0 : i32
    scf.if %2 {
      %cst_83 = arith.constant 0.000000e+00 : f32
      %286 = vector.broadcast %cst_83 : f32 to vector<8x128xf32>
      %c0_84 = arith.constant 0 : index
      %c0_85 = arith.constant 0 : index
      %287 = vector.load %arg5[%c0_84, %c0_85] : memref<8x128xf32, #tpu.memory_space<vmem>>, vector<8x128xf32>
      tpu.vector_store %arg5[%c0_84, %c0_85], %286 {strides = array<i32>} : memref<8x128xf32, #tpu.memory_space<vmem>>, vector<8x128xf32>,
      %cst_86 = arith.constant 0.000000e+00 : f32
      %288 = vector.broadcast %cst_86 : f32 to vector<8x128xf32>
      %c0_87 = arith.constant 0 : index
      %c0_88 = arith.constant 0 : index
      %289 = vector.load %arg6[%c0_87, %c0_88] : memref<8x128xf32, #tpu.memory_space<vmem>>, vector<8x128xf32>
      tpu.vector_store %arg6[%c0_87, %c0_88], %288 {strides = array<i32>} : memref<8x128xf32, #tpu.memory_space<vmem>>, vector<8x128xf32>,
    } else {
    }
    %c0 = arith.constant 0 : index
    %c0_1 = arith.constant 0 : index
    %c0_2 = arith.constant 0 : index
    %3 = vector.load %arg1[%c0, %c0_1, %c0_2] : memref<8x8x64xf32, #tpu.memory_space<vmem>>, vector<8x8x64xf32>
    %4 = vector.shape_cast %3 : vector<8x8x64xf32> to vector<64x64xf32>
    %c0_3 = arith.constant 0 : index
    %c0_4 = arith.constant 0 : index
    %5 = vector.load %arg2[%c0_3, %c0_4] : memref<64x512xf32, #tpu.memory_space<vmem>>, vector<64x512xf32>
    %cst = arith.constant dense<0.000000e+00> : vector<64x512xf32>
    %6 = tpu.matmul %4, %5, %cst {dimension_numbers = #tpu.dot_dimension_numbers<[1], [0], [0], [1], [0, 0, 1, 1], [], []>} : vector<64x64xf32>, vector<64x512xf32>, vector<64x512xf32> -> vector<64x512xf32>
    %7 = vector.shape_cast %6 : vector<64x512xf32> to vector<8x8x512xf32>
    %c0_5 = arith.constant 0 : index
    %c0_6 = arith.constant 0 : index
    %c0_7 = arith.constant 0 : index
    %8 = vector.load %arg7[%c0_5, %c0_6, %c0_7] : memref<8x8x512xf32, #tpu.memory_space<vmem>>, vector<8x8x512xf32>
    tpu.vector_store %arg7[%c0_5, %c0_6, %c0_7], %7 {strides = array<i32>} : memref<8x8x512xf32, #tpu.memory_space<vmem>>, vector<8x8x512xf32>,
    %c0_8 = arith.constant 0 : index
    %c0_9 = arith.constant 0 : index
    %9 = vector.load %arg3[%c0_8, %c0_9] : memref<128x512xf32, #tpu.memory_space<vmem>>, vector<128x512xf32>
    %c0_10 = arith.constant 0 : index
    %c0_11 = arith.constant 0 : index
    %10 = vector.load %arg5[%c0_10, %c0_11] : memref<8x128xf32, #tpu.memory_space<vmem>>, vector<8x128xf32>
    %c0_12 = arith.constant 0 : index
    %c0_13 = arith.constant 0 : index
    %11 = vector.load %arg6[%c0_12, %c0_13] : memref<8x128xf32, #tpu.memory_space<vmem>>, vector<8x128xf32>
    %c0_i32_14 = arith.constant 0 : i32
    %12 = arith.index_cast %c0_i32_14 : i32 to index
    %c0_15 = arith.constant 0 : index
    %c0_16 = arith.constant 0 : index
    %13 = vector.load %arg7[%12, %c0_15, %c0_16] : memref<8x8x512xf32, #tpu.memory_space<vmem>>, vector<1x8x512xf32>
    %14 = vector.shape_cast %13 : vector<1x8x512xf32> to vector<8x512xf32>
    %cst_17 = arith.constant dense<0.000000e+00> : vector<8x512xf32>
    %15 = tpu.matmul %10, %9, %cst_17 {dimension_numbers = #tpu.dot_dimension_numbers<[1], [0], [0], [1], [0, 0, 1, 1], [], []>} : vector<8x128xf32>, vector<128x512xf32>, vector<8x512xf32> -> vector<8x512xf32>
    %16 = arith.addf %14, %15 : vector<8x512xf32>
    %17 = vector.extract_strided_slice %16 {offsets = [0, 0], sizes = [8, 128], strides = [1, 1]} : vector<8x512xf32> to vector<8x128xf32>
    %18 = arith.negf %17 : vector<8x128xf32>
    %19 = math.exp %18 : vector<8x128xf32>
    %cst_18 = arith.constant 1.000000e+00 : f32
    %20 = vector.broadcast %cst_18 : f32 to vector<8x128xf32>
    %21 = arith.addf %20, %19 : vector<8x128xf32>
    %22 = arith.divf %20, %21 : vector<8x128xf32>
    %23 = vector.extract_strided_slice %16 {offsets = [0, 128], sizes = [8, 128], strides = [1, 1]} : vector<8x512xf32> to vector<8x128xf32>
    %24 = arith.negf %23 : vector<8x128xf32>
    %25 = math.exp %24 : vector<8x128xf32>
    %cst_19 = arith.constant 1.000000e+00 : f32
    %26 = vector.broadcast %cst_19 : f32 to vector<8x128xf32>
    %27 = arith.addf %26, %25 : vector<8x128xf32>
    %28 = arith.divf %26, %27 : vector<8x128xf32>
    %29 = vector.extract_strided_slice %16 {offsets = [0, 256], sizes = [8, 128], strides = [1, 1]} : vector<8x512xf32> to vector<8x128xf32>
    %30 = math.tanh %29 : vector<8x128xf32>
    %31 = vector.extract_strided_slice %16 {offsets = [0, 384], sizes = [8, 128], strides = [1, 1]} : vector<8x512xf32> to vector<8x128xf32>
    %32 = arith.negf %31 : vector<8x128xf32>
    %33 = math.exp %32 : vector<8x128xf32>
    %cst_20 = arith.constant 1.000000e+00 : f32
    %34 = vector.broadcast %cst_20 : f32 to vector<8x128xf32>
    %35 = arith.addf %34, %33 : vector<8x128xf32>
    %36 = arith.divf %34, %35 : vector<8x128xf32>
    %37 = arith.mulf %28, %11 : vector<8x128xf32>
    %38 = arith.mulf %22, %30 : vector<8x128xf32>
    %39 = arith.addf %37, %38 : vector<8x128xf32>
    %40 = math.tanh %39 : vector<8x128xf32>
    %41 = arith.mulf %36, %40 : vector<8x128xf32>
    %42 = arith.index_cast %c0_i32_14 : i32 to index
    %c0_21 = arith.constant 0 : index
    %c0_22 = arith.constant 0 : index
    %43 = vector.load %arg4[%42, %c0_21, %c0_22] : memref<8x8x128xf32, #tpu.memory_space<vmem>>, vector<1x8x128xf32>
    %44 = vector.shape_cast %43 : vector<1x8x128xf32> to vector<8x128xf32>
    %45 = vector.shape_cast %41 : vector<8x128xf32> to vector<1x8x128xf32>
    tpu.vector_store %arg4[%42, %c0_21, %c0_22], %45 {strides = array<i32>} : memref<8x8x128xf32, #tpu.memory_space<vmem>>, vector<1x8x128xf32>,
    %c1_i32 = arith.constant 1 : i32
    %46 = arith.index_cast %c1_i32 : i32 to index
    %c0_23 = arith.constant 0 : index
    %c0_24 = arith.constant 0 : index
    %47 = vector.load %arg7[%46, %c0_23, %c0_24] : memref<8x8x512xf32, #tpu.memory_space<vmem>>, vector<1x8x512xf32>
    %48 = vector.shape_cast %47 : vector<1x8x512xf32> to vector<8x512xf32>
    %cst_25 = arith.constant dense<0.000000e+00> : vector<8x512xf32>
    %49 = tpu.matmul %41, %9, %cst_25 {dimension_numbers = #tpu.dot_dimension_numbers<[1], [0], [0], [1], [0, 0, 1, 1], [], []>} : vector<8x128xf32>, vector<128x512xf32>, vector<8x512xf32> -> vector<8x512xf32>
    %50 = arith.addf %48, %49 : vector<8x512xf32>
    %51 = vector.extract_strided_slice %50 {offsets = [0, 0], sizes = [8, 128], strides = [1, 1]} : vector<8x512xf32> to vector<8x128xf32>
    %52 = arith.negf %51 : vector<8x128xf32>
    %53 = math.exp %52 : vector<8x128xf32>
    %cst_26 = arith.constant 1.000000e+00 : f32
    %54 = vector.broadcast %cst_26 : f32 to vector<8x128xf32>
    %55 = arith.addf %54, %53 : vector<8x128xf32>
    %56 = arith.divf %54, %55 : vector<8x128xf32>
    %57 = vector.extract_strided_slice %50 {offsets = [0, 128], sizes = [8, 128], strides = [1, 1]} : vector<8x512xf32> to vector<8x128xf32>
    %58 = arith.negf %57 : vector<8x128xf32>
    %59 = math.exp %58 : vector<8x128xf32>
    %cst_27 = arith.constant 1.000000e+00 : f32
    %60 = vector.broadcast %cst_27 : f32 to vector<8x128xf32>
    %61 = arith.addf %60, %59 : vector<8x128xf32>
    %62 = arith.divf %60, %61 : vector<8x128xf32>
    %63 = vector.extract_strided_slice %50 {offsets = [0, 256], sizes = [8, 128], strides = [1, 1]} : vector<8x512xf32> to vector<8x128xf32>
    %64 = math.tanh %63 : vector<8x128xf32>
    %65 = vector.extract_strided_slice %50 {offsets = [0, 384], sizes = [8, 128], strides = [1, 1]} : vector<8x512xf32> to vector<8x128xf32>
    %66 = arith.negf %65 : vector<8x128xf32>
    %67 = math.exp %66 : vector<8x128xf32>
    %cst_28 = arith.constant 1.000000e+00 : f32
    %68 = vector.broadcast %cst_28 : f32 to vector<8x128xf32>
    %69 = arith.addf %68, %67 : vector<8x128xf32>
    %70 = arith.divf %68, %69 : vector<8x128xf32>
    %71 = arith.mulf %62, %39 : vector<8x128xf32>
    %72 = arith.mulf %56, %64 : vector<8x128xf32>
    %73 = arith.addf %71, %72 : vector<8x128xf32>
    %74 = math.tanh %73 : vector<8x128xf32>
    %75 = arith.mulf %70, %74 : vector<8x128xf32>
    %76 = arith.index_cast %c1_i32 : i32 to index
    %c0_29 = arith.constant 0 : index
    %c0_30 = arith.constant 0 : index
    %77 = vector.load %arg4[%76, %c0_29, %c0_30] : memref<8x8x128xf32, #tpu.memory_space<vmem>>, vector<1x8x128xf32>
    %78 = vector.shape_cast %77 : vector<1x8x128xf32> to vector<8x128xf32>
    %79 = vector.shape_cast %75 : vector<8x128xf32> to vector<1x8x128xf32>
    tpu.vector_store %arg4[%76, %c0_29, %c0_30], %79 {strides = array<i32>} : memref<8x8x128xf32, #tpu.memory_space<vmem>>, vector<1x8x128xf32>,
    %c2_i32 = arith.constant 2 : i32
    %80 = arith.index_cast %c2_i32 : i32 to index
    %c0_31 = arith.constant 0 : index
    %c0_32 = arith.constant 0 : index
    %81 = vector.load %arg7[%80, %c0_31, %c0_32] : memref<8x8x512xf32, #tpu.memory_space<vmem>>, vector<1x8x512xf32>
    %82 = vector.shape_cast %81 : vector<1x8x512xf32> to vector<8x512xf32>
    %cst_33 = arith.constant dense<0.000000e+00> : vector<8x512xf32>
    %83 = tpu.matmul %75, %9, %cst_33 {dimension_numbers = #tpu.dot_dimension_numbers<[1], [0], [0], [1], [0, 0, 1, 1], [], []>} : vector<8x128xf32>, vector<128x512xf32>, vector<8x512xf32> -> vector<8x512xf32>
    %84 = arith.addf %82, %83 : vector<8x512xf32>
    %85 = vector.extract_strided_slice %84 {offsets = [0, 0], sizes = [8, 128], strides = [1, 1]} : vector<8x512xf32> to vector<8x128xf32>
    %86 = arith.negf %85 : vector<8x128xf32>
    %87 = math.exp %86 : vector<8x128xf32>
    %cst_34 = arith.constant 1.000000e+00 : f32
    %88 = vector.broadcast %cst_34 : f32 to vector<8x128xf32>
    %89 = arith.addf %88, %87 : vector<8x128xf32>
    %90 = arith.divf %88, %89 : vector<8x128xf32>
    %91 = vector.extract_strided_slice %84 {offsets = [0, 128], sizes = [8, 128], strides = [1, 1]} : vector<8x512xf32> to vector<8x128xf32>
    %92 = arith.negf %91 : vector<8x128xf32>
    %93 = math.exp %92 : vector<8x128xf32>
    %cst_35 = arith.constant 1.000000e+00 : f32
    %94 = vector.broadcast %cst_35 : f32 to vector<8x128xf32>
    %95 = arith.addf %94, %93 : vector<8x128xf32>
    %96 = arith.divf %94, %95 : vector<8x128xf32>
    %97 = vector.extract_strided_slice %84 {offsets = [0, 256], sizes = [8, 128], strides = [1, 1]} : vector<8x512xf32> to vector<8x128xf32>
    %98 = math.tanh %97 : vector<8x128xf32>
    %99 = vector.extract_strided_slice %84 {offsets = [0, 384], sizes = [8, 128], strides = [1, 1]} : vector<8x512xf32> to vector<8x128xf32>
    %100 = arith.negf %99 : vector<8x128xf32>
    %101 = math.exp %100 : vector<8x128xf32>
    %cst_36 = arith.constant 1.000000e+00 : f32
    %102 = vector.broadcast %cst_36 : f32 to vector<8x128xf32>
    %103 = arith.addf %102, %101 : vector<8x128xf32>
    %104 = arith.divf %102, %103 : vector<8x128xf32>
    %105 = arith.mulf %96, %73 : vector<8x128xf32>
    %106 = arith.mulf %90, %98 : vector<8x128xf32>
    %107 = arith.addf %105, %106 : vector<8x128xf32>
    %108 = math.tanh %107 : vector<8x128xf32>
    %109 = arith.mulf %104, %108 : vector<8x128xf32>
    %110 = arith.index_cast %c2_i32 : i32 to index
    %c0_37 = arith.constant 0 : index
    %c0_38 = arith.constant 0 : index
    %111 = vector.load %arg4[%110, %c0_37, %c0_38] : memref<8x8x128xf32, #tpu.memory_space<vmem>>, vector<1x8x128xf32>
    %112 = vector.shape_cast %111 : vector<1x8x128xf32> to vector<8x128xf32>
    %113 = vector.shape_cast %109 : vector<8x128xf32> to vector<1x8x128xf32>
    tpu.vector_store %arg4[%110, %c0_37, %c0_38], %113 {strides = array<i32>} : memref<8x8x128xf32, #tpu.memory_space<vmem>>, vector<1x8x128xf32>,
    %c3_i32 = arith.constant 3 : i32
    %114 = arith.index_cast %c3_i32 : i32 to index
    %c0_39 = arith.constant 0 : index
    %c0_40 = arith.constant 0 : index
    %115 = vector.load %arg7[%114, %c0_39, %c0_40] : memref<8x8x512xf32, #tpu.memory_space<vmem>>, vector<1x8x512xf32>
    %116 = vector.shape_cast %115 : vector<1x8x512xf32> to vector<8x512xf32>
    %cst_41 = arith.constant dense<0.000000e+00> : vector<8x512xf32>
    %117 = tpu.matmul %109, %9, %cst_41 {dimension_numbers = #tpu.dot_dimension_numbers<[1], [0], [0], [1], [0, 0, 1, 1], [], []>} : vector<8x128xf32>, vector<128x512xf32>, vector<8x512xf32> -> vector<8x512xf32>
    %118 = arith.addf %116, %117 : vector<8x512xf32>
    %119 = vector.extract_strided_slice %118 {offsets = [0, 0], sizes = [8, 128], strides = [1, 1]} : vector<8x512xf32> to vector<8x128xf32>
    %120 = arith.negf %119 : vector<8x128xf32>
    %121 = math.exp %120 : vector<8x128xf32>
    %cst_42 = arith.constant 1.000000e+00 : f32
    %122 = vector.broadcast %cst_42 : f32 to vector<8x128xf32>
    %123 = arith.addf %122, %121 : vector<8x128xf32>
    %124 = arith.divf %122, %123 : vector<8x128xf32>
    %125 = vector.extract_strided_slice %118 {offsets = [0, 128], sizes = [8, 128], strides = [1, 1]} : vector<8x512xf32> to vector<8x128xf32>
    %126 = arith.negf %125 : vector<8x128xf32>
    %127 = math.exp %126 : vector<8x128xf32>
    %cst_43 = arith.constant 1.000000e+00 : f32
    %128 = vector.broadcast %cst_43 : f32 to vector<8x128xf32>
    %129 = arith.addf %128, %127 : vector<8x128xf32>
    %130 = arith.divf %128, %129 : vector<8x128xf32>
    %131 = vector.extract_strided_slice %118 {offsets = [0, 256], sizes = [8, 128], strides = [1, 1]} : vector<8x512xf32> to vector<8x128xf32>
    %132 = math.tanh %131 : vector<8x128xf32>
    %133 = vector.extract_strided_slice %118 {offsets = [0, 384], sizes = [8, 128], strides = [1, 1]} : vector<8x512xf32> to vector<8x128xf32>
    %134 = arith.negf %133 : vector<8x128xf32>
    %135 = math.exp %134 : vector<8x128xf32>
    %cst_44 = arith.constant 1.000000e+00 : f32
    %136 = vector.broadcast %cst_44 : f32 to vector<8x128xf32>
    %137 = arith.addf %136, %135 : vector<8x128xf32>
    %138 = arith.divf %136, %137 : vector<8x128xf32>
    %139 = arith.mulf %130, %107 : vector<8x128xf32>
    %140 = arith.mulf %124, %132 : vector<8x128xf32>
    %141 = arith.addf %139, %140 : vector<8x128xf32>
    %142 = math.tanh %141 : vector<8x128xf32>
    %143 = arith.mulf %138, %142 : vector<8x128xf32>
    %144 = arith.index_cast %c3_i32 : i32 to index
    %c0_45 = arith.constant 0 : index
    %c0_46 = arith.constant 0 : index
    %145 = vector.load %arg4[%144, %c0_45, %c0_46] : memref<8x8x128xf32, #tpu.memory_space<vmem>>, vector<1x8x128xf32>
    %146 = vector.shape_cast %145 : vector<1x8x128xf32> to vector<8x128xf32>
    %147 = vector.shape_cast %143 : vector<8x128xf32> to vector<1x8x128xf32>
    tpu.vector_store %arg4[%144, %c0_45, %c0_46], %147 {strides = array<i32>} : memref<8x8x128xf32, #tpu.memory_space<vmem>>, vector<1x8x128xf32>,
    %c4_i32 = arith.constant 4 : i32
    %148 = arith.index_cast %c4_i32 : i32 to index
    %c0_47 = arith.constant 0 : index
    %c0_48 = arith.constant 0 : index
    %149 = vector.load %arg7[%148, %c0_47, %c0_48] : memref<8x8x512xf32, #tpu.memory_space<vmem>>, vector<1x8x512xf32>
    %150 = vector.shape_cast %149 : vector<1x8x512xf32> to vector<8x512xf32>
    %cst_49 = arith.constant dense<0.000000e+00> : vector<8x512xf32>
    %151 = tpu.matmul %143, %9, %cst_49 {dimension_numbers = #tpu.dot_dimension_numbers<[1], [0], [0], [1], [0, 0, 1, 1], [], []>} : vector<8x128xf32>, vector<128x512xf32>, vector<8x512xf32> -> vector<8x512xf32>
    %152 = arith.addf %150, %151 : vector<8x512xf32>
    %153 = vector.extract_strided_slice %152 {offsets = [0, 0], sizes = [8, 128], strides = [1, 1]} : vector<8x512xf32> to vector<8x128xf32>
    %154 = arith.negf %153 : vector<8x128xf32>
    %155 = math.exp %154 : vector<8x128xf32>
    %cst_50 = arith.constant 1.000000e+00 : f32
    %156 = vector.broadcast %cst_50 : f32 to vector<8x128xf32>
    %157 = arith.addf %156, %155 : vector<8x128xf32>
    %158 = arith.divf %156, %157 : vector<8x128xf32>
    %159 = vector.extract_strided_slice %152 {offsets = [0, 128], sizes = [8, 128], strides = [1, 1]} : vector<8x512xf32> to vector<8x128xf32>
    %160 = arith.negf %159 : vector<8x128xf32>
    %161 = math.exp %160 : vector<8x128xf32>
    %cst_51 = arith.constant 1.000000e+00 : f32
    %162 = vector.broadcast %cst_51 : f32 to vector<8x128xf32>
    %163 = arith.addf %162, %161 : vector<8x128xf32>
    %164 = arith.divf %162, %163 : vector<8x128xf32>
    %165 = vector.extract_strided_slice %152 {offsets = [0, 256], sizes = [8, 128], strides = [1, 1]} : vector<8x512xf32> to vector<8x128xf32>
    %166 = math.tanh %165 : vector<8x128xf32>
    %167 = vector.extract_strided_slice %152 {offsets = [0, 384], sizes = [8, 128], strides = [1, 1]} : vector<8x512xf32> to vector<8x128xf32>
    %168 = arith.negf %167 : vector<8x128xf32>
    %169 = math.exp %168 : vector<8x128xf32>
    %cst_52 = arith.constant 1.000000e+00 : f32
    %170 = vector.broadcast %cst_52 : f32 to vector<8x128xf32>
    %171 = arith.addf %170, %169 : vector<8x128xf32>
    %172 = arith.divf %170, %171 : vector<8x128xf32>
    %173 = arith.mulf %164, %141 : vector<8x128xf32>
    %174 = arith.mulf %158, %166 : vector<8x128xf32>
    %175 = arith.addf %173, %174 : vector<8x128xf32>
    %176 = math.tanh %175 : vector<8x128xf32>
    %177 = arith.mulf %172, %176 : vector<8x128xf32>
    %178 = arith.index_cast %c4_i32 : i32 to index
    %c0_53 = arith.constant 0 : index
    %c0_54 = arith.constant 0 : index
    %179 = vector.load %arg4[%178, %c0_53, %c0_54] : memref<8x8x128xf32, #tpu.memory_space<vmem>>, vector<1x8x128xf32>
    %180 = vector.shape_cast %179 : vector<1x8x128xf32> to vector<8x128xf32>
    %181 = vector.shape_cast %177 : vector<8x128xf32> to vector<1x8x128xf32>
    tpu.vector_store %arg4[%178, %c0_53, %c0_54], %181 {strides = array<i32>} : memref<8x8x128xf32, #tpu.memory_space<vmem>>, vector<1x8x128xf32>,
    %c5_i32 = arith.constant 5 : i32
    %182 = arith.index_cast %c5_i32 : i32 to index
    %c0_55 = arith.constant 0 : index
    %c0_56 = arith.constant 0 : index
    %183 = vector.load %arg7[%182, %c0_55, %c0_56] : memref<8x8x512xf32, #tpu.memory_space<vmem>>, vector<1x8x512xf32>
    %184 = vector.shape_cast %183 : vector<1x8x512xf32> to vector<8x512xf32>
    %cst_57 = arith.constant dense<0.000000e+00> : vector<8x512xf32>
    %185 = tpu.matmul %177, %9, %cst_57 {dimension_numbers = #tpu.dot_dimension_numbers<[1], [0], [0], [1], [0, 0, 1, 1], [], []>} : vector<8x128xf32>, vector<128x512xf32>, vector<8x512xf32> -> vector<8x512xf32>
    %186 = arith.addf %184, %185 : vector<8x512xf32>
    %187 = vector.extract_strided_slice %186 {offsets = [0, 0], sizes = [8, 128], strides = [1, 1]} : vector<8x512xf32> to vector<8x128xf32>
    %188 = arith.negf %187 : vector<8x128xf32>
    %189 = math.exp %188 : vector<8x128xf32>
    %cst_58 = arith.constant 1.000000e+00 : f32
    %190 = vector.broadcast %cst_58 : f32 to vector<8x128xf32>
    %191 = arith.addf %190, %189 : vector<8x128xf32>
    %192 = arith.divf %190, %191 : vector<8x128xf32>
    %193 = vector.extract_strided_slice %186 {offsets = [0, 128], sizes = [8, 128], strides = [1, 1]} : vector<8x512xf32> to vector<8x128xf32>
    %194 = arith.negf %193 : vector<8x128xf32>
    %195 = math.exp %194 : vector<8x128xf32>
    %cst_59 = arith.constant 1.000000e+00 : f32
    %196 = vector.broadcast %cst_59 : f32 to vector<8x128xf32>
    %197 = arith.addf %196, %195 : vector<8x128xf32>
    %198 = arith.divf %196, %197 : vector<8x128xf32>
    %199 = vector.extract_strided_slice %186 {offsets = [0, 256], sizes = [8, 128], strides = [1, 1]} : vector<8x512xf32> to vector<8x128xf32>
    %200 = math.tanh %199 : vector<8x128xf32>
    %201 = vector.extract_strided_slice %186 {offsets = [0, 384], sizes = [8, 128], strides = [1, 1]} : vector<8x512xf32> to vector<8x128xf32>
    %202 = arith.negf %201 : vector<8x128xf32>
    %203 = math.exp %202 : vector<8x128xf32>
    %cst_60 = arith.constant 1.000000e+00 : f32
    %204 = vector.broadcast %cst_60 : f32 to vector<8x128xf32>
    %205 = arith.addf %204, %203 : vector<8x128xf32>
    %206 = arith.divf %204, %205 : vector<8x128xf32>
    %207 = arith.mulf %198, %175 : vector<8x128xf32>
    %208 = arith.mulf %192, %200 : vector<8x128xf32>
    %209 = arith.addf %207, %208 : vector<8x128xf32>
    %210 = math.tanh %209 : vector<8x128xf32>
    %211 = arith.mulf %206, %210 : vector<8x128xf32>
    %212 = arith.index_cast %c5_i32 : i32 to index
    %c0_61 = arith.constant 0 : index
    %c0_62 = arith.constant 0 : index
    %213 = vector.load %arg4[%212, %c0_61, %c0_62] : memref<8x8x128xf32, #tpu.memory_space<vmem>>, vector<1x8x128xf32>
    %214 = vector.shape_cast %213 : vector<1x8x128xf32> to vector<8x128xf32>
    %215 = vector.shape_cast %211 : vector<8x128xf32> to vector<1x8x128xf32>
    tpu.vector_store %arg4[%212, %c0_61, %c0_62], %215 {strides = array<i32>} : memref<8x8x128xf32, #tpu.memory_space<vmem>>, vector<1x8x128xf32>,
    %c6_i32 = arith.constant 6 : i32
    %216 = arith.index_cast %c6_i32 : i32 to index
    %c0_63 = arith.constant 0 : index
    %c0_64 = arith.constant 0 : index
    %217 = vector.load %arg7[%216, %c0_63, %c0_64] : memref<8x8x512xf32, #tpu.memory_space<vmem>>, vector<1x8x512xf32>
    %218 = vector.shape_cast %217 : vector<1x8x512xf32> to vector<8x512xf32>
    %cst_65 = arith.constant dense<0.000000e+00> : vector<8x512xf32>
    %219 = tpu.matmul %211, %9, %cst_65 {dimension_numbers = #tpu.dot_dimension_numbers<[1], [0], [0], [1], [0, 0, 1, 1], [], []>} : vector<8x128xf32>, vector<128x512xf32>, vector<8x512xf32> -> vector<8x512xf32>
    %220 = arith.addf %218, %219 : vector<8x512xf32>
    %221 = vector.extract_strided_slice %220 {offsets = [0, 0], sizes = [8, 128], strides = [1, 1]} : vector<8x512xf32> to vector<8x128xf32>
    %222 = arith.negf %221 : vector<8x128xf32>
    %223 = math.exp %222 : vector<8x128xf32>
    %cst_66 = arith.constant 1.000000e+00 : f32
    %224 = vector.broadcast %cst_66 : f32 to vector<8x128xf32>
    %225 = arith.addf %224, %223 : vector<8x128xf32>
    %226 = arith.divf %224, %225 : vector<8x128xf32>
    %227 = vector.extract_strided_slice %220 {offsets = [0, 128], sizes = [8, 128], strides = [1, 1]} : vector<8x512xf32> to vector<8x128xf32>
    %228 = arith.negf %227 : vector<8x128xf32>
    %229 = math.exp %228 : vector<8x128xf32>
    %cst_67 = arith.constant 1.000000e+00 : f32
    %230 = vector.broadcast %cst_67 : f32 to vector<8x128xf32>
    %231 = arith.addf %230, %229 : vector<8x128xf32>
    %232 = arith.divf %230, %231 : vector<8x128xf32>
    %233 = vector.extract_strided_slice %220 {offsets = [0, 256], sizes = [8, 128], strides = [1, 1]} : vector<8x512xf32> to vector<8x128xf32>
    %234 = math.tanh %233 : vector<8x128xf32>
    %235 = vector.extract_strided_slice %220 {offsets = [0, 384], sizes = [8, 128], strides = [1, 1]} : vector<8x512xf32> to vector<8x128xf32>
    %236 = arith.negf %235 : vector<8x128xf32>
    %237 = math.exp %236 : vector<8x128xf32>
    %cst_68 = arith.constant 1.000000e+00 : f32
    %238 = vector.broadcast %cst_68 : f32 to vector<8x128xf32>
    %239 = arith.addf %238, %237 : vector<8x128xf32>
    %240 = arith.divf %238, %239 : vector<8x128xf32>
    %241 = arith.mulf %232, %209 : vector<8x128xf32>
    %242 = arith.mulf %226, %234 : vector<8x128xf32>
    %243 = arith.addf %241, %242 : vector<8x128xf32>
    %244 = math.tanh %243 : vector<8x128xf32>
    %245 = arith.mulf %240, %244 : vector<8x128xf32>
    %246 = arith.index_cast %c6_i32 : i32 to index
    %c0_69 = arith.constant 0 : index
    %c0_70 = arith.constant 0 : index
    %247 = vector.load %arg4[%246, %c0_69, %c0_70] : memref<8x8x128xf32, #tpu.memory_space<vmem>>, vector<1x8x128xf32>
    %248 = vector.shape_cast %247 : vector<1x8x128xf32> to vector<8x128xf32>
    %249 = vector.shape_cast %245 : vector<8x128xf32> to vector<1x8x128xf32>
    tpu.vector_store %arg4[%246, %c0_69, %c0_70], %249 {strides = array<i32>} : memref<8x8x128xf32, #tpu.memory_space<vmem>>, vector<1x8x128xf32>,
    %c7_i32 = arith.constant 7 : i32
    %250 = arith.index_cast %c7_i32 : i32 to index
    %c0_71 = arith.constant 0 : index
    %c0_72 = arith.constant 0 : index
    %251 = vector.load %arg7[%250, %c0_71, %c0_72] : memref<8x8x512xf32, #tpu.memory_space<vmem>>, vector<1x8x512xf32>
    %252 = vector.shape_cast %251 : vector<1x8x512xf32> to vector<8x512xf32>
    %cst_73 = arith.constant dense<0.000000e+00> : vector<8x512xf32>
    %253 = tpu.matmul %245, %9, %cst_73 {dimension_numbers = #tpu.dot_dimension_numbers<[1], [0], [0], [1], [0, 0, 1, 1], [], []>} : vector<8x128xf32>, vector<128x512xf32>, vector<8x512xf32> -> vector<8x512xf32>
    %254 = arith.addf %252, %253 : vector<8x512xf32>
    %255 = vector.extract_strided_slice %254 {offsets = [0, 0], sizes = [8, 128], strides = [1, 1]} : vector<8x512xf32> to vector<8x128xf32>
    %256 = arith.negf %255 : vector<8x128xf32>
    %257 = math.exp %256 : vector<8x128xf32>
    %cst_74 = arith.constant 1.000000e+00 : f32
    %258 = vector.broadcast %cst_74 : f32 to vector<8x128xf32>
    %259 = arith.addf %258, %257 : vector<8x128xf32>
    %260 = arith.divf %258, %259 : vector<8x128xf32>
    %261 = vector.extract_strided_slice %254 {offsets = [0, 128], sizes = [8, 128], strides = [1, 1]} : vector<8x512xf32> to vector<8x128xf32>
    %262 = arith.negf %261 : vector<8x128xf32>
    %263 = math.exp %262 : vector<8x128xf32>
    %cst_75 = arith.constant 1.000000e+00 : f32
    %264 = vector.broadcast %cst_75 : f32 to vector<8x128xf32>
    %265 = arith.addf %264, %263 : vector<8x128xf32>
    %266 = arith.divf %264, %265 : vector<8x128xf32>
    %267 = vector.extract_strided_slice %254 {offsets = [0, 256], sizes = [8, 128], strides = [1, 1]} : vector<8x512xf32> to vector<8x128xf32>
    %268 = math.tanh %267 : vector<8x128xf32>
    %269 = vector.extract_strided_slice %254 {offsets = [0, 384], sizes = [8, 128], strides = [1, 1]} : vector<8x512xf32> to vector<8x128xf32>
    %270 = arith.negf %269 : vector<8x128xf32>
    %271 = math.exp %270 : vector<8x128xf32>
    %cst_76 = arith.constant 1.000000e+00 : f32
    %272 = vector.broadcast %cst_76 : f32 to vector<8x128xf32>
    %273 = arith.addf %272, %271 : vector<8x128xf32>
    %274 = arith.divf %272, %273 : vector<8x128xf32>
    %275 = arith.mulf %266, %243 : vector<8x128xf32>
    %276 = arith.mulf %260, %268 : vector<8x128xf32>
    %277 = arith.addf %275, %276 : vector<8x128xf32>
    %278 = math.tanh %277 : vector<8x128xf32>
    %279 = arith.mulf %274, %278 : vector<8x128xf32>
    %280 = arith.index_cast %c7_i32 : i32 to index
    %c0_77 = arith.constant 0 : index
    %c0_78 = arith.constant 0 : index
    %281 = vector.load %arg4[%280, %c0_77, %c0_78] : memref<8x8x128xf32, #tpu.memory_space<vmem>>, vector<1x8x128xf32>
    %282 = vector.shape_cast %281 : vector<1x8x128xf32> to vector<8x128xf32>
    %283 = vector.shape_cast %279 : vector<8x128xf32> to vector<1x8x128xf32>
    tpu.vector_store %arg4[%280, %c0_77, %c0_78], %283 {strides = array<i32>} : memref<8x8x128xf32, #tpu.memory_space<vmem>>, vector<1x8x128xf32>,
    %c8_i32 = arith.constant 8 : i32
    %c0_79 = arith.constant 0 : index
    %c0_80 = arith.constant 0 : index
    %284 = vector.load %arg5[%c0_79, %c0_80] : memref<8x128xf32, #tpu.memory_space<vmem>>, vector<8x128xf32>
    tpu.vector_store %arg5[%c0_79, %c0_80], %279 {strides = array<i32>} : memref<8x128xf32, #tpu.memory_space<vmem>>, vector<8x128xf32>,
    %c0_81 = arith.constant 0 : index
    %c0_82 = arith.constant 0 : index
    %285 = vector.load %arg6[%c0_81, %c0_82] : memref<8x128xf32, #tpu.memory_space<vmem>>, vector<8x128xf32>
    tpu.vector_store %arg6[%c0_81, %c0_82], %277 {strides = array<i32>} : memref<8x128xf32, #tpu.memory_space<vmem>>, vector<8x128xf32>,
    return
  }
  func.func @transform_0(%arg0: i32) -> (i32, i32, i32) {
    %c0_i32 = arith.constant 0 : i32
    %c0_i32_0 = arith.constant 0 : i32
    %c0_i32_1 = arith.constant 0 : i32
    return %arg0, %c0_i32, %c0_i32_0 : i32, i32, i32
  }
  func.func @transform_1(%arg0: i32) -> (i32, i32) {
    %c0_i32 = arith.constant 0 : i32
    %c0_i32_0 = arith.constant 0 : i32
    %c0_i32_1 = arith.constant 0 : i32
    return %c0_i32, %c0_i32_0 : i32, i32
  }
  func.func @transform_2(%arg0: i32) -> (i32, i32) {
    %c0_i32 = arith.constant 0 : i32
    %c0_i32_0 = arith.constant 0 : i32
    %c0_i32_1 = arith.constant 0 : i32
    return %c0_i32, %c0_i32_0 : i32, i32
  }
  func.func @transform_3(%arg0: i32) -> (i32, i32, i32) {
    %c0_i32 = arith.constant 0 : i32
    %c0_i32_0 = arith.constant 0 : i32
    %c0_i32_1 = arith.constant 0 : i32
    return %arg0, %c0_i32, %c0_i32_0 : i32, i32, i32
  }
}

</mosaic_0001>

<bundles_post_ra>
// kernel: brnn_forward.1
= control target key start
LH: loop header
LB: loop body
LE: loop exit
PB: predicated region body
PF: predicated region fallthrough
CT: control target
= control target key end

     0   :  { %8 = vsyncpa [#allocation6], 0  ;;  %s3715_s0 = inlined_call_operand.vmem [shape: f32[16,8,64], index: 0, kind: input, shape index: {}]   ;;  %s3716_s1 = inlined_call_operand.vmem [shape: f32[64,512], index: 1, kind: input, shape index: {}]   ;;  %s3717_s2 = inlined_call_operand.vmem [shape: f32[128,512], index: 2, kind: input, shape index: {}]   ;;  %s3718_s3 = inlined_call_operand.hbm [shape: f32[16,8,128], index: 3, kind: output, shape index: {}]  }
   0x1   :  { %10 = vsyncpa [#allocation6 + $0x1], 0  ;;  %s2213_s12 = smov 0   ;;  %s2215_s13 = smov 0  }
   0x2   :  { %s2217_s14 = smov 0   ;;  %s2219_s15 = smov 0  }
   0x3 LB: > { %s2234_s16 = sadd.s32 4294967295, %s2188_s15   ;;  %s1815_s17 = sadd.s32 4294967294, %s2188_s15   ;;  %s2188_s15 = sphi %s2219_s15, %s4022_s15   ;;  %s2184_s14 = sphi %s2217_s14, %s4021_s14   ;;  %s2180_s13 = sphi %s2215_s13, %s4020_s13   ;;  %s2176_s12 = sphi %s2213_s12, %s4019_s12  }
   0x4   : > { %s2238_s18 = sadd.s32 1, %s2188_s15   ;;  %s91_s19 = sadd.s32 1, %s2184_s14 }
   0x5   : > { %s88_s20 = ssub.s32 %s2188_s15, %s2238_s18  ;;  %p101_p0 = scmp.ne.s32.totalorder %s2184_s14, %s2180_s13 }
   0x6   : > { %p89_p1 = scmp.eq.s32.totalorder %s88_s20, 0  ;;  %p102_p2 = scmp.eq.s32.totalorder %s2234_s16, 1 }
   0x7   : > { %p107_p3 = scmp.ne.s32.totalorder %s2180_s13, %s2176_s12  ;;  %p108_p4 = scmp.eq.s32.totalorder %s1815_s17, 1 }
   0x8   : > { %s2249_s21 = scalar_select %p89_p1, %s2184_s14, %s91_s19  }
   0x9   : > { %p2251_p5 = por %p102_p2, %p101_p0  ;;  %p2255_p6 = por %p108_p4, %p107_p3 }
   0xa   : > { %p1818_p7 = scmp.ge.s32.totalorder %s2188_s15, 1  ;;  %p141_p8 = scmp.lt.s32.totalorder %s2188_s15, 3 }
   0xc   : > { %p142_p9 = pnand %p1818_p7, %p141_p8 }
   0xe   : > { %145 = sbr.rel (%p142_p9) target bundleno = 1477 (0x5c5), region = 32 }
  0x13   : > { %s162_s24 = sand.u32 1, %s2180_s13   ;;  %s1820_s25 = sshll.u32 %s2234_s16, 3 }
  0x14   : > { %s1819_s26 = sshll.u32 %s162_s24, 6  ;;  %p166_p10 = scmp.lt.s32.totalorder %s1820_s25, 15 }
  0x15   : > { %s2270_s4 = scalar_lea.vmem [#allocation5], %s1819_s26  ;;  %p1822_p11 = scmp.ne.s32.totalorder %s2234_s16, 0 }
  0x16   : > { %s4024_s25 = smov (!%p166_p10, %s1820_s25), 15 }
  0x17   : > { %s1821_s27 = sshll.u32 %s4024_s25, 3  ;;  %175 = sbr.rel (%p1822_p11) target bundleno = 31 (0x1f), region = 36 }
  0x18   : > { %s2268_s30 = scalar_lea.vmem %s3715_s0, %s1821_s27 }
  0x1c   : > { %v2190_v0 = vmov 0.0  }
  0x1d   : > { %176 = vst [vmem:[#allocation2] sm:$0xff] %v2190_v0 }
  0x1e   : > { %177 = vst [vmem:[#allocation3] sm:$0xff] %v2190_v0 }
  0x1f PF: > { %v214_v1 = vld [vmem:[%s3716_s1 + $0xe0] sm:$0xff]  ;;  %v215_v2 = vld [vmem:[%s3716_s1 + $0xe8] sm:$0xff]  ;;  %v216_v3 = vld [vmem:[%s3716_s1 + $0xf0] sm:$0xff]  ;;  %vm218_vm0 = vcmask 523264   ;;  %s1750_s5 = sshll.u32 %s2270_s4, 4  ;;  %s2146_s11 = scalar_lea.hbm %s3718_s3, 128  ;;  %s1751_s5 = int_to_ptr.vmem [resolvable:$true] %s1750_s5 }
  0x20   : > { %251 = vmatpush.msra.mxu0 %v214_v1  ;;  %292 = vmatpush.msra.mxu1 %v215_v2  ;;  %v217_v4 = vld [vmem:[%s3716_s1 + $0xf8] sm:$0xff]  ;;  %v210_v5 = vld [vmem:[%s3716_s1 + $0xc0] sm:$0xff]  ;;  %v211_v6 = vld [vmem:[%s3716_s1 + $0xc8] sm:$0xff] }
  0x21   : > { %333 = vmatpush.msra.mxu2 %v216_v3  ;;  %374 = vmatpush.msra.mxu3 %v217_v4  ;;  %v212_v7 = vld [vmem:[%s3716_s1 + $0xd0] sm:$0xff]  ;;  %v213_v8 = vld [vmem:[%s3716_s1 + $0xd8] sm:$0xff]  ;;  %v206_v9 = vld [vmem:[%s3716_s1 + $0xa0] sm:$0xff] }
  0x22   : > { %252 = vmatpush.msra.mxu0 %v210_v5  ;;  %293 = vmatpush.msra.mxu1 %v211_v6  ;;  %v207_v10 = vld [vmem:[%s3716_s1 + $0xa8] sm:$0xff]  ;;  %v208_v11 = vld [vmem:[%s3716_s1 + $0xb0] sm:$0xff]  ;;  %v209_v12 = vld [vmem:[%s3716_s1 + $0xb8] sm:$0xff] }
  0x23   : > { %334 = vmatpush.msra.mxu2 %v212_v7  ;;  %375 = vmatpush.msra.mxu3 %v213_v8  ;;  %v202_v13 = vld [vmem:[%s3716_s1 + $0x80] sm:$0xff]  ;;  %v203_v14 = vld [vmem:[%s3716_s1 + $0x88] sm:$0xff]  ;;  %v204_v15 = vld [vmem:[%s3716_s1 + $0x90] sm:$0xff] }
  0x24   : > { %253 = vmatpush.msra.mxu0 %v206_v9  ;;  %294 = vmatpush.msra.mxu1 %v207_v10  ;;  %v205_v16 = vld [vmem:[%s3716_s1 + $0x98] sm:$0xff]  ;;  %v198_v17 = vld [vmem:[%s3716_s1 + $0x60] sm:$0xff]  ;;  %v199_v18 = vld [vmem:[%s3716_s1 + $0x68] sm:$0xff] }
  0x25   : > { %335 = vmatpush.msra.mxu2 %v208_v11  ;;  %376 = vmatpush.msra.mxu3 %v209_v12  ;;  %v200_v19 = vld [vmem:[%s3716_s1 + $0x70] sm:$0xff]  ;;  %v201_v20 = vld [vmem:[%s3716_s1 + $0x78] sm:$0xff]  ;;  %v194_v21 = vld [vmem:[%s3716_s1 + $0x40] sm:$0xff] }
  0x26   : > { %254 = vmatpush.msra.mxu0 %v202_v13  ;;  %295 = vmatpush.msra.mxu1 %v203_v14  ;;  %v195_v22 = vld [vmem:[%s3716_s1 + $0x48] sm:$0xff]  ;;  %v196_v23 = vld [vmem:[%s3716_s1 + $0x50] sm:$0xff]  ;;  %v197_v24 = vld [vmem:[%s3716_s1 + $0x58] sm:$0xff] }
  0x27   : > { %336 = vmatpush.msra.mxu2 %v204_v15  ;;  %377 = vmatpush.msra.mxu3 %v205_v16  ;;  %v190_v25 = vld [vmem:[%s3716_s1 + $0x20] sm:$0xff]  ;;  %v191_v26 = vld [vmem:[%s3716_s1 + $0x28] sm:$0xff]  ;;  %v192_v27 = vld [vmem:[%s3716_s1 + $0x30] sm:$0xff] }
  0x28   : > { %255 = vmatpush.msra.mxu0 %v198_v17  ;;  %296 = vmatpush.msra.mxu1 %v199_v18  ;;  %v193_v28 = vld [vmem:[%s3716_s1 + $0x38] sm:$0xff]  ;;  %v186_v29 = vld [vmem:[%s3716_s1] sm:$0xff]  ;;  %v187_v30 = vld [vmem:[%s3716_s1 + $0x8] sm:$0xff] }
  0x29   : > { %337 = vmatpush.msra.mxu2 %v200_v19  ;;  %378 = vmatpush.msra.mxu3 %v201_v20  ;;  %v188_v31 = vld [vmem:[%s3716_s1 + $0x10] sm:$0xff]  ;;  %v189_v32 = vld [vmem:[%s3716_s1 + $0x18] sm:$0xff]  ;;  %v178_v33 = vld [vmem:[%s2268_s30] sm:$0xff] }
  0x2a   : > { %256 = vmatpush.msra.mxu0 %v194_v21  ;;  %297 = vmatpush.msra.mxu1 %v195_v22  ;;  %v2373_v34 = vld [vmem:[%s3717_s2 + $0x1e0] sm:$0xff]  ;;  %v2378_v35 = vld [vmem:[%s3717_s2 + $0x1e8] sm:$0xff]  ;;  %v2385_v36 = vld [vmem:[%s3717_s2 + $0x1f8] sm:$0xff] }
  0x2b   : > { %338 = vmatpush.msra.mxu2 %v196_v23  ;;  %379 = vmatpush.msra.mxu3 %v197_v24  ;;  %v2390_v37 = vld [vmem:[%s3717_s2 + $0x1f0] sm:$0xff]  ;;  %v2397_v38 = vld [vmem:[%s3717_s2 + $0x1c0] sm:$0xff]  ;;  %v2402_v39 = vld [vmem:[%s3717_s2 + $0x1c8] sm:$0xff] }
  0x2c   : > { %257 = vmatpush.msra.mxu0 %v190_v25  ;;  %298 = vmatpush.msra.mxu1 %v191_v26  ;;  %v2409_v40 = vld [vmem:[%s3717_s2 + $0x1d8] sm:$0xff]  ;;  %v2414_v41 = vld [vmem:[%s3717_s2 + $0x1d0] sm:$0xff]  ;;  %v2420_v42 = vld [vmem:[%s3717_s2 + $0x1a0] sm:$0xff] }
  0x2d   : > { %339 = vmatpush.msra.mxu2 %v192_v27  ;;  %380 = vmatpush.msra.mxu3 %v193_v28  ;;  %v2425_v43 = vld [vmem:[%s3717_s2 + $0x1a8] sm:$0xff]  ;;  %v2433_v44 = vld [vmem:[%s3717_s2 + $0x1b8] sm:$0xff]  ;;  %v2438_v45 = vld [vmem:[%s3717_s2 + $0x1b0] sm:$0xff] }
  0x2e   : > { %258 = vmatpush.msra.mxu0 %v186_v29  ;;  %299 = vmatpush.msra.mxu1 %v187_v30  ;;  %v179_v46 = vld [vmem:[%s2268_s30 + $0x8] sm:$0xff]  ;;  %v2448_v47 = vld [vmem:[%s3717_s2 + $0x180] sm:$0xff]  ;;  %v2462_v49 = vld [vmem:[%s3717_s2 + $0x198] sm:$0xff] }
  0x2f   : > { %340 = vmatpush.msra.mxu2 %v188_v31  ;;  %381 = vmatpush.msra.mxu3 %v189_v32  ;;  %v2453_v48 = vld [vmem:[%s3717_s2 + $0x188] sm:$0xff]  ;;  %v2467_v50 = vld [vmem:[%s3717_s2 + $0x190] sm:$0xff]  ;;  %v2474_v51 = vld [vmem:[%s3717_s2 + $0x160] sm:$0xff] }
  0x30   : > { %1823 = vmatmul.msk.f32.vlgmr.msra.gmra.mxu0 %vm218_vm0, %v178_v33  ;;  %1831 = vmatmul.msk.f32.vlgmr.msra.gmra.mxu1 %vm218_vm0, %v178_v33  ;;  %v2479_v52 = vld [vmem:[%s3717_s2 + $0x168] sm:$0xff]  ;;  %v2486_v53 = vld [vmem:[%s3717_s2 + $0x178] sm:$0xff]  ;;  %v2491_v54 = vld [vmem:[%s3717_s2 + $0x170] sm:$0xff] }
  0x31   : > { %1839 = vmatmul.msk.f32.vlgmr.msra.gmra.mxu2 %vm218_vm0, %v178_v33  ;;  %1847 = vmatmul.msk.f32.vlgmr.msra.gmra.mxu3 %vm218_vm0, %v178_v33  ;;  %v2497_v55 = vld [vmem:[%s3717_s2 + $0x140] sm:$0xff]  ;;  %v2502_v56 = vld [vmem:[%s3717_s2 + $0x148] sm:$0xff]  ;;  %v2510_v57 = vld [vmem:[%s3717_s2 + $0x158] sm:$0xff] }
  0x32   : > { %509 = vmatpush.msrb.mxu0 %v2373_v34  ;;  %529 = vmatpush.msrb.mxu1 %v2378_v35  ;;  %v2515_v58 = vld [vmem:[%s3717_s2 + $0x150] sm:$0xff]  ;;  %v2525_v60 = vld [vmem:[%s3717_s2 + $0x120] sm:$0xff]  ;;  %v2530_v61 = vld [vmem:[%s3717_s2 + $0x128] sm:$0xff] }
  0x33   : > { %569 = vmatpush.msrb.mxu3 %v2385_v36  ;;  %549 = vmatpush.msrb.mxu2 %v2390_v37  ;;  %v180_v59 = vld [vmem:[%s2268_s30 + $0x10] sm:$0xff]  ;;  %v2539_v62 = vld [vmem:[%s3717_s2 + $0x138] sm:$0xff]  ;;  %v2551_v0 = vld [vmem:[%s3717_s2 + $0x100] sm:$0xff] }
  0x34   : > { %510 = vmatpush.msrb.mxu0 %v2397_v38  ;;  %530 = vmatpush.msrb.mxu1 %v2402_v39  ;;  %v2544_v63 = vld [vmem:[%s3717_s2 + $0x130] sm:$0xff]  ;;  %v2556_v1 = vld [vmem:[%s3717_s2 + $0x108] sm:$0xff]  ;;  %v2563_v2 = vld [vmem:[%s3717_s2 + $0x118] sm:$0xff] }
  0x35   : > { %570 = vmatpush.msrb.mxu3 %v2409_v40  ;;  %550 = vmatpush.msrb.mxu2 %v2414_v41  ;;  %v2568_v3 = vld [vmem:[%s3717_s2 + $0x110] sm:$0xff]  ;;  %v2574_v4 = vld [vmem:[%s3717_s2 + $0xe0] sm:$0xff]  ;;  %v2579_v5 = vld [vmem:[%s3717_s2 + $0xe8] sm:$0xff] }
  0x36   : > { %511 = vmatpush.msrb.mxu0 %v2420_v42  ;;  %531 = vmatpush.msrb.mxu1 %v2425_v43  ;;  %v2587_v6 = vld [vmem:[%s3717_s2 + $0xf8] sm:$0xff]  ;;  %v2592_v7 = vld [vmem:[%s3717_s2 + $0xf0] sm:$0xff]  ;;  %v2602_v9 = vld [vmem:[%s3717_s2 + $0xc0] sm:$0xff] }
  0x37   : > { %571 = vmatpush.msrb.mxu3 %v2433_v44  ;;  %551 = vmatpush.msrb.mxu2 %v2438_v45  ;;  %v181_v8 = vld [vmem:[%s2268_s30 + $0x18] sm:$0xff]  ;;  %v2607_v10 = vld [vmem:[%s3717_s2 + $0xc8] sm:$0xff]  ;;  %v2621_v12 = vld [vmem:[%s3717_s2 + $0xd0] sm:$0xff] }
  0x38   : > { %1824 = vmatmul.msk.f32.gmra.mxu0 %vm218_vm0, %v179_v46  ;;  %1832 = vmatmul.msk.f32.gmra.mxu1 %vm218_vm0, %v179_v46  ;;  %v2616_v11 = vld [vmem:[%s3717_s2 + $0xd8] sm:$0xff]  ;;  %3830 = vst [vmem:[#allocation9_spill] sm:$0xff] %v2621_v12  ;;  %v2628_v13 = vld [vmem:[%s3717_s2 + $0xa0] sm:$0xff]  ;;  %v2633_v14 = vld [vmem:[%s3717_s2 + $0xa8] sm:$0xff] }
  0x39   : > { %1840 = vmatmul.msk.f32.gmra.mxu2 %vm218_vm0, %v179_v46  ;;  %1848 = vmatmul.msk.f32.gmra.mxu3 %vm218_vm0, %v179_v46  ;;  %3829 = vst [vmem:[#allocation8_spill] sm:$0xff] %v2616_v11  ;;  %v2640_v15 = vld [vmem:[%s3717_s2 + $0xb8] sm:$0xff]  ;;  %v2645_v16 = vld [vmem:[%s3717_s2 + $0xb0] sm:$0xff]  ;;  %v2651_v17 = vld [vmem:[%s3717_s2 + $0x80] sm:$0xff] }
  0x3a   : > { %512 = vmatpush.msrb.mxu0 %v2448_v47  ;;  %532 = vmatpush.msrb.mxu1 %v2453_v48  ;;  %3831 = vst [vmem:[#allocation10_spill] sm:$0xff] %v2628_v13  ;;  %v2656_v18 = vld [vmem:[%s3717_s2 + $0x88] sm:$0xff]  ;;  %v2664_v19 = vld [vmem:[%s3717_s2 + $0x98] sm:$0xff]  ;;  %v2669_v20 = vld [vmem:[%s3717_s2 + $0x90] sm:$0xff] }
  0x3b   : > { %572 = vmatpush.msrb.mxu3 %v2462_v49  ;;  %552 = vmatpush.msrb.mxu2 %v2467_v50  ;;  %3832 = vst [vmem:[#allocation11_spill] sm:$0xff] %v2633_v14  ;;  %v182_v21 = vld [vmem:[%s2268_s30 + $0x20] sm:$0xff]  ;;  %v2684_v23 = vld [vmem:[%s3717_s2 + $0x68] sm:$0xff]  ;;  %v2693_v24 = vld [vmem:[%s3717_s2 + $0x78] sm:$0xff] }
  0x3c   : > { %513 = vmatpush.msrb.mxu0 %v2474_v51  ;;  %533 = vmatpush.msrb.mxu1 %v2479_v52  ;;  %3833 = vst [vmem:[#allocation12_spill] sm:$0xff] %v2640_v15  ;;  %v2679_v22 = vld [vmem:[%s3717_s2 + $0x60] sm:$0xff]  ;;  %v2698_v25 = vld [vmem:[%s3717_s2 + $0x70] sm:$0xff]  ;;  %v2710_v27 = vld [vmem:[%s3717_s2 + $0x48] sm:$0xff] }
  0x3d   : > { %573 = vmatpush.msrb.mxu3 %v2486_v53  ;;  %553 = vmatpush.msrb.mxu2 %v2491_v54  ;;  %3834 = vst [vmem:[#allocation13_spill] sm:$0xff] %v2645_v16  ;;  %v2705_v26 = vld [vmem:[%s3717_s2 + $0x40] sm:$0xff]  ;;  %v2717_v28 = vld [vmem:[%s3717_s2 + $0x58] sm:$0xff]  ;;  %v2722_v29 = vld [vmem:[%s3717_s2 + $0x50] sm:$0xff] }
  0x3e   : > { %514 = vmatpush.msrb.mxu0 %v2497_v55  ;;  %534 = vmatpush.msrb.mxu1 %v2502_v56  ;;  %3835 = vst [vmem:[#allocation14_spill] sm:$0xff] %v2651_v17  ;;  %v2728_v30 = vld [vmem:[%s3717_s2 + $0x20] sm:$0xff]  ;;  %v2733_v31 = vld [vmem:[%s3717_s2 + $0x28] sm:$0xff]  ;;  %v2741_v32 = vld [vmem:[%s3717_s2 + $0x30] sm:$0xff] }
  0x3f   : > { %574 = vmatpush.msrb.mxu3 %v2510_v57  ;;  %554 = vmatpush.msrb.mxu2 %v2515_v58  ;;  %3836 = vst [vmem:[#allocation15_spill] sm:$0xff] %v2656_v18  ;;  %v2746_v33 = vld [vmem:[%s3717_s2 + $0x38] sm:$0xff]  ;;  %v183_v46 = vld [vmem:[%s2268_s30 + $0x28] sm:$0xff] }
  0x40   : > { %1825 = vmatmul.msk.f32.gmra.mxu0 %vm218_vm0, %v180_v59  ;;  %1833 = vmatmul.msk.f32.gmra.mxu1 %vm218_vm0, %v180_v59  ;;  %3837 = vst [vmem:[#allocation16_spill] sm:$0xff] %v2664_v19 }
  0x41   : > { %1841 = vmatmul.msk.f32.gmra.mxu2 %vm218_vm0, %v180_v59  ;;  %1849 = vmatmul.msk.f32.gmra.mxu3 %vm218_vm0, %v180_v59  ;;  %3838 = vst [vmem:[#allocation17_spill] sm:$0xff] %v2669_v20  ;;  %v2756_v59 = vld [vmem:[%s3717_s2] sm:$0xff] }
  0x42   : > { %515 = vmatpush.msrb.mxu0 %v2525_v60  ;;  %535 = vmatpush.msrb.mxu1 %v2530_v61  ;;  %3839 = vst [vmem:[#allocation18_spill] sm:$0xff] %v2679_v22 }
  0x43   : > { %575 = vmatpush.msrb.mxu3 %v2539_v62  ;;  %555 = vmatpush.msrb.mxu2 %v2544_v63  ;;  %3840 = vst [vmem:[#allocation19_spill] sm:$0xff] %v2684_v23 }
  0x44   : > { %516 = vmatpush.msrb.mxu0 %v2551_v0  ;;  %536 = vmatpush.msrb.mxu1 %v2556_v1  ;;  %3841 = vst [vmem:[#allocation20_spill] sm:$0xff] %v2693_v24 }
  0x45   : > { %576 = vmatpush.msrb.mxu3 %v2563_v2  ;;  %556 = vmatpush.msrb.mxu2 %v2568_v3  ;;  %3842 = vst [vmem:[#allocation21_spill] sm:$0xff] %v2698_v25 }
  0x46   : > { %517 = vmatpush.msrb.mxu0 %v2574_v4  ;;  %537 = vmatpush.msrb.mxu1 %v2579_v5  ;;  %3843 = vst [vmem:[#allocation22_spill] sm:$0xff] %v2705_v26 }
  0x47   : > { %577 = vmatpush.msrb.mxu3 %v2587_v6  ;;  %557 = vmatpush.msrb.mxu2 %v2592_v7  ;;  %3844 = vst [vmem:[#allocation23_spill] sm:$0xff] %v2710_v27 }
  0x48   : > { %1826 = vmatmul.msk.f32.gmra.mxu0 %vm218_vm0, %v181_v8  ;;  %1834 = vmatmul.msk.f32.gmra.mxu1 %vm218_vm0, %v181_v8  ;;  %3845 = vst [vmem:[#allocation24_spill] sm:$0xff] %v2717_v28 }
  0x49   : > { %1842 = vmatmul.msk.f32.gmra.mxu2 %vm218_vm0, %v181_v8  ;;  %1850 = vmatmul.msk.f32.gmra.mxu3 %vm218_vm0, %v181_v8  ;;  %3846 = vst [vmem:[#allocation25_spill] sm:$0xff] %v2722_v29  ;;  %v2761_v8 = vld [vmem:[%s3717_s2 + $0x8] sm:$0xff] }
  0x4a   : > { %518 = vmatpush.msrb.mxu0 %v2602_v9  ;;  %538 = vmatpush.msrb.mxu1 %v2607_v10  ;;  %3847 = vst [vmem:[#allocation26_spill] sm:$0xff] %v2728_v30 }
  0x4b   : > { %578 = vmatpush.msrb.mxu3 %v2616_v11  ;;  %558 = vmatpush.msrb.mxu2 %v2621_v12  ;;  %3848 = vst [vmem:[#allocation27_spill] sm:$0xff] %v2733_v31 }
  0x4c   : > { %519 = vmatpush.msrb.mxu0 %v2628_v13  ;;  %539 = vmatpush.msrb.mxu1 %v2633_v14  ;;  %3849 = vst [vmem:[#allocation28_spill] sm:$0xff] %v2741_v32 }
  0x4d   : > { %579 = vmatpush.msrb.mxu3 %v2640_v15  ;;  %559 = vmatpush.msrb.mxu2 %v2645_v16  ;;  %3850 = vst [vmem:[#allocation29_spill] sm:$0xff] %v2746_v33 }
  0x4e   : > { %520 = vmatpush.msrb.mxu0 %v2651_v17  ;;  %540 = vmatpush.msrb.mxu1 %v2656_v18  ;;  %3851 = vst [vmem:[#allocation30_spill] sm:$0xff] %v2756_v59 }
  0x4f   : > { %580 = vmatpush.msrb.mxu3 %v2664_v19  ;;  %560 = vmatpush.msrb.mxu2 %v2669_v20  ;;  %3852 = vst [vmem:[#allocation31_spill] sm:$0xff] %v2761_v8 }
  0x50   : > { %1827 = vmatmul.msk.f32.gmra.mxu0 %vm218_vm0, %v182_v21  ;;  %1835 = vmatmul.msk.f32.gmra.mxu1 %vm218_vm0, %v182_v21 }
  0x51   : > { %1843 = vmatmul.msk.f32.gmra.mxu2 %vm218_vm0, %v182_v21  ;;  %1851 = vmatmul.msk.f32.gmra.mxu3 %vm218_vm0, %v182_v21  ;;  %v2770_v21 = vld [vmem:[%s3717_s2 + $0x10] sm:$0xff] }
  0x52   : > { %521 = vmatpush.msrb.mxu0 %v2679_v22  ;;  %541 = vmatpush.msrb.mxu1 %v2684_v23  ;;  %3853 = vst [vmem:[#allocation32_spill] sm:$0xff] %v2770_v21 }
  0x53   : > { %581 = vmatpush.msrb.mxu3 %v2693_v24  ;;  %561 = vmatpush.msrb.mxu2 %v2698_v25 }
  0x54   : > { %522 = vmatpush.msrb.mxu0 %v2705_v26  ;;  %542 = vmatpush.msrb.mxu1 %v2710_v27 }
  0x55   : > { %582 = vmatpush.msrb.mxu3 %v2717_v28  ;;  %562 = vmatpush.msrb.mxu2 %v2722_v29 }
  0x56   : > { %523 = vmatpush.msrb.mxu0 %v2728_v30  ;;  %543 = vmatpush.msrb.mxu1 %v2733_v31  ;;  %v2775_v31 = vld [vmem:[%s3717_s2 + $0x18] sm:$0xff] }
  0x57   : > { %563 = vmatpush.msrb.mxu2 %v2741_v32  ;;  %583 = vmatpush.msrb.mxu3 %v2746_v33  ;;  %3854 = vst [vmem:[#allocation33_spill] sm:$0xff] %v2775_v31  ;;  %v184_v33 = vld [vmem:[%s2268_s30 + $0x30] sm:$0xff] }
  0x58   : > { %1828 = vmatmul.msk.f32.gmra.mxu0 %vm218_vm0, %v183_v46  ;;  %1836 = vmatmul.msk.f32.gmra.mxu1 %vm218_vm0, %v183_v46 }
  0x59   : > { %1844 = vmatmul.msk.f32.gmra.mxu2 %vm218_vm0, %v183_v46  ;;  %1852 = vmatmul.msk.f32.gmra.mxu3 %vm218_vm0, %v183_v46  ;;  %v185_v46 = vld [vmem:[%s2268_s30 + $0x38] sm:$0xff]  ;;  %s1891_s30 = sshll.u32 %s2234_s16, 6  ;;  %s1738_s16 = scalar_lea.sflag [#allocation6], %s162_s24 }
  0x5a   : > { %524 = vmatpush.msrb.mxu0 %v2756_v59  ;;  %544 = vmatpush.msrb.mxu1 %v2761_v8  ;;  %s1749_s29 = scalar_lea.hbm %s3718_s3, %s1891_s30 }
  0x5b   : > { %564 = vmatpush.msrb.mxu2 %v2770_v21  ;;  %584 = vmatpush.msrb.mxu3 %v2775_v31  ;;  %s1752_s6 = sshll.u32 %s1749_s29, 4  ;;  %s1753_s6 = int_to_ptr.hbm [resolvable:$true] %s1752_s6 }
  0x5c   : > { %662 = vmatpush.msra.mxu0 %v2373_v34  ;;  %682 = vmatpush.msra.mxu1 %v2378_v35  ;;  %s2140_s7 = sshra.s32 %s1753_s6, 4  ;;  %s2141_s7 = int_to_ptr.hbm [resolvable:$true] %s2140_s7 }
  0x5d   : > { %702 = vmatpush.msra.mxu2 %v2390_v37  ;;  %722 = vmatpush.msra.mxu3 %v2385_v36  ;;  %s2142_s8 = scalar_lea.hbm %s2141_s7, 64  ;;  %p2147_p1 = scmp.lt.s32.totalorder %s2141_s7, %s3718_s3 }
  0x5e   : > { %663 = vmatpush.msra.mxu0 %v2397_v38  ;;  %683 = vmatpush.msra.mxu1 %v2402_v39  ;;  %p2143_p12 = scmp.ne.s32.totalorder %s2141_s7, %s2142_s8  ;;  %p2148_p2 = scmp.lt.s32.totalorder %s2146_s11, %s2142_s8 }
  0x5f   : > { %703 = vmatpush.msra.mxu2 %v2414_v41  ;;  %723 = vmatpush.msra.mxu3 %v2409_v40 }
  0x60   : > { %1829 = vmatmul.msk.f32.gmra.mxu0 %vm218_vm0, %v184_v33  ;;  %1837 = vmatmul.msk.f32.gmra.mxu1 %vm218_vm0, %v184_v33  ;;  %p2144_p13 = pnand %p2143_p12, %p2251_p5  ;;  %p2149_p3 = por %p2148_p2, %p2147_p1 }
  0x61   : > { %1845 = vmatmul.msk.f32.gmra.mxu2 %vm218_vm0, %v184_v33  ;;  %1853 = vmatmul.msk.f32.gmra.mxu3 %vm218_vm0, %v184_v33  ;;  %v503_v33 = vld [vmem:[#allocation2] sm:$0xff] }
  0x62   : > { %664 = vmatpush.msra.mxu0 %v2420_v42  ;;  %684 = vmatpush.msra.mxu1 %v2425_v43  ;;  %p2145_p0 = pneg %p2144_p13 }
  0x63   : > { %704 = vmatpush.msra.mxu2 %v2438_v45  ;;  %724 = vmatpush.msra.mxu3 %v2433_v44 }
  0x64   : > { %665 = vmatpush.msra.mxu0 %v2448_v47  ;;  %685 = vmatpush.msra.mxu1 %v2453_v48  ;;  %p2150_p4 = pnand %p2149_p3, %p2145_p0 }
  0x65   : > { %705 = vmatpush.msra.mxu2 %v2467_v50  ;;  %725 = vmatpush.msra.mxu3 %v2462_v49 }
  0x66   : > { %666 = vmatpush.msra.mxu0 %v2474_v51  ;;  %686 = vmatpush.msra.mxu1 %v2479_v52 }
  0x67   : > { %706 = vmatpush.msra.mxu2 %v2491_v54  ;;  %726 = vmatpush.msra.mxu3 %v2486_v53 }
  0x68   : > { %1830 = vmatmul.msk.f32.gmra.mxu0 %vm218_vm0, %v185_v46  ;;  %1838 = vmatmul.msk.f32.gmra.mxu1 %vm218_vm0, %v185_v46 }
  0x69   : > { %1846 = vmatmul.msk.f32.gmra.mxu2 %vm218_vm0, %v185_v46  ;;  %1854 = vmatmul.msk.f32.gmra.mxu3 %vm218_vm0, %v185_v46  ;;  %v3855_v46 = vld [vmem:[#allocation27_spill] sm:$0xff] }
  0x6a   : > { %667 = vmatpush.msra.mxu0 %v2497_v55  ;;  %687 = vmatpush.msra.mxu1 %v2502_v56 }
  0x6b   : > { %707 = vmatpush.msra.mxu2 %v2515_v58  ;;  %727 = vmatpush.msra.mxu3 %v2510_v57 }
  0x6c   : > { %668 = vmatpush.msra.mxu0 %v2525_v60  ;;  %688 = vmatpush.msra.mxu1 %v2530_v61 }
  0x6d   : > { %708 = vmatpush.msra.mxu2 %v2544_v63  ;;  %728 = vmatpush.msra.mxu3 %v2539_v62 }
  0x6e   : > { %669 = vmatpush.msra.mxu0 %v2551_v0  ;;  %689 = vmatpush.msra.mxu1 %v2556_v1 }
  0x6f   : > { %709 = vmatpush.msra.mxu2 %v2568_v3  ;;  %729 = vmatpush.msra.mxu3 %v2563_v2 }
  0x70   : > { %525 = vmatmul.f32.vlgmr.msrb.gmra.mxu0 %v503_v33  ;;  %545 = vmatmul.f32.vlgmr.msrb.gmra.mxu1 %v503_v33 }
  0x71   : > { %565 = vmatmul.f32.vlgmr.msrb.gmra.mxu2 %v503_v33  ;;  %585 = vmatmul.f32.vlgmr.msrb.gmra.mxu3 %v503_v33  ;;  %v3856_v33 = vld [vmem:[#allocation29_spill] sm:$0xff] }
  0x72   : > { %670 = vmatpush.msra.mxu0 %v2574_v4  ;;  %690 = vmatpush.msra.mxu1 %v2579_v5 }
  0x73   : > { %710 = vmatpush.msra.mxu2 %v2592_v7  ;;  %730 = vmatpush.msra.mxu3 %v2587_v6 }
  0x74   : > { %671 = vmatpush.msra.mxu0 %v2602_v9  ;;  %691 = vmatpush.msra.mxu1 %v2607_v10 }
  0x75   : > { %711 = vmatpush.msra.mxu2 %v2621_v12  ;;  %731 = vmatpush.msra.mxu3 %v2616_v11 }
  0x76   : > { %672 = vmatpush.msra.mxu0 %v2628_v13  ;;  %692 = vmatpush.msra.mxu1 %v2633_v14 }
  0x77   : > { %712 = vmatpush.msra.mxu2 %v2645_v16  ;;  %732 = vmatpush.msra.mxu3 %v2640_v15 }
  0x78   : > { %673 = vmatpush.msra.mxu0 %v2651_v17  ;;  %693 = vmatpush.msra.mxu1 %v2656_v18 }
  0x79   : > { %713 = vmatpush.msra.mxu2 %v2669_v20  ;;  %733 = vmatpush.msra.mxu3 %v2664_v19 }
  0x7a   : > { %674 = vmatpush.msra.mxu0 %v2679_v22  ;;  %694 = vmatpush.msra.mxu1 %v2684_v23 }
  0x7b   : > { %714 = vmatpush.msra.mxu2 %v2698_v25  ;;  %734 = vmatpush.msra.mxu3 %v2693_v24 }
  0x7c   : > { %675 = vmatpush.msra.mxu0 %v2705_v26  ;;  %695 = vmatpush.msra.mxu1 %v2710_v27 }
  0x7d   : > { %715 = vmatpush.msra.mxu2 %v2722_v29  ;;  %735 = vmatpush.msra.mxu3 %v2717_v28 }
  0x7e   : > { %676 = vmatpush.msra.mxu0 %v2728_v30  ;;  %696 = vmatpush.msra.mxu1 %v3855_v46 }
  0x7f   : > { %716 = vmatpush.msra.mxu2 %v2741_v32  ;;  %736 = vmatpush.msra.mxu3 %v3856_v33 }
  0x80   : > { %677 = vmatpush.msra.mxu0 %v2756_v59  ;;  %697 = vmatpush.msra.mxu1 %v2761_v8 }
  0x81   : > { %717 = vmatpush.msra.mxu2 %v2770_v21  ;;  %737 = vmatpush.msra.mxu3 %v2775_v31 }
  0x82   : > { %816 = vmatpush.msrb.mxu0 %v2373_v34  ;;  %836 = vmatpush.msrb.mxu1 %v2378_v35 }
  0x83   : > { %856 = vmatpush.msrb.mxu2 %v2390_v37  ;;  %876 = vmatpush.msrb.mxu3 %v2385_v36 }
  0x84   : > { %817 = vmatpush.msrb.mxu0 %v2397_v38  ;;  %837 = vmatpush.msrb.mxu1 %v2402_v39 }
  0x85   : > { %857 = vmatpush.msrb.mxu2 %v2414_v41  ;;  %877 = vmatpush.msrb.mxu3 %v2409_v40 }
  0x86   : > { %818 = vmatpush.msrb.mxu0 %v2420_v42  ;;  %838 = vmatpush.msrb.mxu1 %v2425_v43 }
  0x87   : > { %858 = vmatpush.msrb.mxu2 %v2438_v45  ;;  %878 = vmatpush.msrb.mxu3 %v2433_v44 }
  0x88   : > { %819 = vmatpush.msrb.mxu0 %v2448_v47  ;;  %839 = vmatpush.msrb.mxu1 %v2453_v48 }
  0x89   : > { %859 = vmatpush.msrb.mxu2 %v2467_v50  ;;  %879 = vmatpush.msrb.mxu3 %v2462_v49 }
  0x8a   : > { %820 = vmatpush.msrb.mxu0 %v2474_v51  ;;  %840 = vmatpush.msrb.mxu1 %v2479_v52 }
  0x8b   : > { %860 = vmatpush.msrb.mxu2 %v2491_v54  ;;  %880 = vmatpush.msrb.mxu3 %v2486_v53 }
  0x8c   : > { %821 = vmatpush.msrb.mxu0 %v2497_v55  ;;  %841 = vmatpush.msrb.mxu1 %v2502_v56 }
  0x8d   : > { %861 = vmatpush.msrb.mxu2 %v2515_v58  ;;  %881 = vmatpush.msrb.mxu3 %v2510_v57 }
  0x8e   : > { %822 = vmatpush.msrb.mxu0 %v2525_v60  ;;  %842 = vmatpush.msrb.mxu1 %v2530_v61 }
  0x8f   : > { %862 = vmatpush.msrb.mxu2 %v2544_v63  ;;  %882 = vmatpush.msrb.mxu3 %v2539_v62 }
  0x90   : > { %823 = vmatpush.msrb.mxu0 %v2551_v0  ;;  %843 = vmatpush.msrb.mxu1 %v2556_v1 }
  0x91   : > { %863 = vmatpush.msrb.mxu2 %v2568_v3  ;;  %883 = vmatpush.msrb.mxu3 %v2563_v2 }
  0x92   : > { %824 = vmatpush.msrb.mxu0 %v2574_v4  ;;  %844 = vmatpush.msrb.mxu1 %v2579_v5 }
  0x93   : > { %864 = vmatpush.msrb.mxu2 %v2592_v7  ;;  %884 = vmatpush.msrb.mxu3 %v2587_v6 }
  0x94   : > { %825 = vmatpush.msrb.mxu0 %v2602_v9  ;;  %845 = vmatpush.msrb.mxu1 %v2607_v10 }
  0x95   : > { %865 = vmatpush.msrb.mxu2 %v2621_v12  ;;  %885 = vmatpush.msrb.mxu3 %v2616_v11 }
  0x96   : > { %826 = vmatpush.msrb.mxu0 %v2628_v13  ;;  %846 = vmatpush.msrb.mxu1 %v2633_v14 }
  0x97   : > { %866 = vmatpush.msrb.mxu2 %v2645_v16  ;;  %886 = vmatpush.msrb.mxu3 %v2640_v15 }
  0x98   : > { %827 = vmatpush.msrb.mxu0 %v2651_v17  ;;  %847 = vmatpush.msrb.mxu1 %v2656_v18 }
  0x99   : > { %867 = vmatpush.msrb.mxu2 %v2669_v20  ;;  %887 = vmatpush.msrb.mxu3 %v2664_v19 }
  0x9a   : > { %828 = vmatpush.msrb.mxu0 %v2679_v22  ;;  %848 = vmatpush.msrb.mxu1 %v2684_v23 }
  0x9b   : > { %868 = vmatpush.msrb.mxu2 %v2698_v25  ;;  %888 = vmatpush.msrb.mxu3 %v2693_v24 }
  0x9c   : > { %829 = vmatpush.msrb.mxu0 %v2705_v26  ;;  %849 = vmatpush.msrb.mxu1 %v2710_v27 }
  0x9d   : > { %869 = vmatpush.msrb.mxu2 %v2722_v29  ;;  %889 = vmatpush.msrb.mxu3 %v2717_v28 }
  0x9e   : > { %830 = vmatpush.msrb.mxu0 %v2728_v30  ;;  %850 = vmatpush.msrb.mxu1 %v3855_v46 }
  0x9f   : > { %870 = vmatpush.msrb.mxu2 %v2741_v32  ;;  %890 = vmatpush.msrb.mxu3 %v3856_v33 }
  0xa0   : > { %831 = vmatpush.msrb.mxu0 %v2756_v59  ;;  %851 = vmatpush.msrb.mxu1 %v2761_v8 }
  0xa1   : > { %871 = vmatpush.msrb.mxu2 %v2770_v21  ;;  %891 = vmatpush.msrb.mxu3 %v2775_v31 }
  0xad   : > { %v260_v27 = vpop.f32.mrf.mxu0  ;;  %v301_v29 = vpop.f32.mrf.mxu1 }
  0xb4   : > { %v342_v26 = vpop.f32.mrf.mxu2  ;;  %v383_v28 = vpop.f32.mrf.mxu3 }
  0xb5   : > { %v2921_v24 = vpop.f32.mrf.mxu0  ;;  %v2923_v30 = vpop.f32.mrf.mxu1 }
  0xb6   : > { %3857 = vst [vmem:[#allocation34_spill] sm:$0xff] %v2921_v24 }
  0xb7   : > { %3858 = vst [vmem:[#allocation35_spill] sm:$0xff] %v2923_v30 }
  0xbc   : > { %v2925_v46 = vpop.f32.mrf.mxu2  ;;  %v2927_v32 = vpop.f32.mrf.mxu3 }
  0xbd   : > { %3859 = vst [vmem:[#allocation36_spill] sm:$0xff] %v2925_v46  ;;  %v2929_v33 = vpop.f32.mrf.mxu0  ;;  %v2931_v59 = vpop.f32.mrf.mxu1 }
  0xbe   : > { %3860 = vst [vmem:[#allocation37_spill] sm:$0xff] %v2927_v32 }
  0xbf   : > { %3861 = vst [vmem:[#allocation38_spill] sm:$0xff] %v2929_v33 }
  0xc0   : > { %3862 = vst [vmem:[#allocation39_spill] sm:$0xff] %v2931_v59 }
  0xc4   : > { %v2933_v8 = vpop.f32.mrf.mxu2  ;;  %v2935_v21 = vpop.f32.mrf.mxu3 }
  0xc5   : > { %3863 = vst [vmem:[#allocation40_spill] sm:$0xff] %v2933_v8  ;;  %v2937_v31 = vpop.f32.mrf.mxu0  ;;  %v2939_v25 = vpop.f32.mrf.mxu1 }
  0xc6   : > { %3864 = vst [vmem:[#allocation41_spill] sm:$0xff] %v2935_v21 }
  0xc7   : > { %3865 = vst [vmem:[#allocation42_spill] sm:$0xff] %v2937_v31 }
  0xc8   : > { %3866 = vst [vmem:[#allocation43_spill] sm:$0xff] %v2939_v25 }
  0xcc   : > { %v2941_v23 = vpop.f32.mrf.mxu2  ;;  %v2943_v24 = vpop.f32.mrf.mxu3 }
  0xcd   : > { %3867 = vst [vmem:[#allocation44_spill] sm:$0xff] %v2941_v23  ;;  %v2945_v30 = vpop.f32.mrf.mxu0  ;;  %v2947_v46 = vpop.f32.mrf.mxu1 }
  0xce   : > { %3868 = vst [vmem:[#allocation45_spill] sm:$0xff] %v2943_v24 }
  0xcf   : > { %3869 = vst [vmem:[#allocation46_spill] sm:$0xff] %v2945_v30 }
  0xd0   : > { %3870 = vst [vmem:[#allocation47_spill] sm:$0xff] %v2947_v46 }
  0xd4   : > { %v2949_v32 = vpop.f32.mrf.mxu3  ;;  %v2955_v8 = vpop.f32.mrf.mxu2 }
  0xd5   : > { %3871 = vst [vmem:[#allocation48_spill] sm:$0xff] %v2949_v32  ;;  %v2951_v33 = vpop.f32.mrf.mxu0  ;;  %v2953_v59 = vpop.f32.mrf.mxu1 }
  0xd6   : > { %3872 = vst [vmem:[#allocation49_spill] sm:$0xff] %v2951_v33 }
  0xd7   : > { %3873 = vst [vmem:[#allocation50_spill] sm:$0xff] %v2953_v59 }
  0xd8   : > { %3874 = vst [vmem:[#allocation51_spill] sm:$0xff] %v2955_v8 }
  0xdc   : > { %v2957_v21 = vpop.f32.mrf.mxu3  ;;  %v2963_v23 = vpop.f32.mrf.mxu2 }
  0xdd   : > { %3875 = vst [vmem:[#allocation52_spill] sm:$0xff] %v2957_v21  ;;  %v2959_v31 = vpop.f32.mrf.mxu0  ;;  %v2961_v25 = vpop.f32.mrf.mxu1 }
  0xde   : > { %3876 = vst [vmem:[#allocation53_spill] sm:$0xff] %v2959_v31 }
  0xdf   : > { %3877 = vst [vmem:[#allocation54_spill] sm:$0xff] %v2961_v25 }
  0xe0   : > { %3878 = vst [vmem:[#allocation55_spill] sm:$0xff] %v2963_v23 }
  0xe4   : > { %v2965_v24 = vpop.f32.mrf.mxu3  ;;  %v2971_v32 = vpop.f32.mrf.mxu2 }
  0xe5   : > { %3879 = vst [vmem:[#allocation56_spill] sm:$0xff] %v2965_v24  ;;  %v2967_v30 = vpop.f32.mrf.mxu0  ;;  %v2969_v46 = vpop.f32.mrf.mxu1 }
  0xe6   : > { %3880 = vst [vmem:[#allocation57_spill] sm:$0xff] %v2967_v30 }
  0xe7   : > { %3881 = vst [vmem:[#allocation58_spill] sm:$0xff] %v2969_v46 }
  0xe8   : > { %3882 = vst [vmem:[#allocation59_spill] sm:$0xff] %v2971_v32 }
  0xec   : > { %v2973_v33 = vpop.f32.mrf.mxu3  ;;  %v2975_v25 = vpop.f32.mrf.mxu2 }
  0xed   : > { %3883 = vst [vmem:[#allocation60_spill] sm:$0xff] %v2973_v33  ;;  %v526_v59 = vpop.f32.mrf.mxu0  ;;  %v546_v8 = vpop.f32.mrf.mxu1 }
  0xee   : > { %v589_v22 = vadd.f32 %v526_v59, %v260_v27  ;;  %v590_v21 = vadd.f32 %v546_v8, %v301_v29  ;;  %3884 = vst [vmem:[#allocation61_spill] sm:$0xff] %v2975_v25 }
  0xf0   : > { %v1855_v19 = vmul.f32 -1.442695, %v589_v22  ;;  %v1856_v31 = vmul.f32 -1.442695, %v590_v21 }
  0xf2   : > { %1934 = vpow2.f32 %v1855_v19 }
  0xf3   : > { %1936 = vpow2.f32 %v1856_v31 }
  0xf4   : > { %v586_v23 = vpop.f32.mrf.mxu3  ;;  %v566_v33 = vpop.f32.mrf.mxu2 }
  0xf5   : > { %v592_v24 = vadd.f32 %v586_v23, %v383_v28  ;;  %v591_v22 = vadd.f32 %v566_v33, %v342_v26 }
  0xf7   : > { %v1857_v20 = vmul.f32 -1.442695, %v592_v24 }
  0xf8   : > { %v1935_v30 = vpop.eup %1934 }
  0xf9   : > { %v1937_v18 = vpop.eup %1936  ;;  %v596_v46 = vadd.f32 1.0, %v1935_v30  ;;  %1938 = vpow2.f32 %v1857_v20 }
  0xfa   : > { %v615_v32 = vadd.f32 1.0, %v1937_v18 }
  0xfb   : > { %1940 = vrcp.f32 %v596_v46  ;;  %v608_v23 = vand.u32 2147483648, %v596_v46  ;;  %v606_v20 = vand.u32 2147483647, %v596_v46  ;;  %vm602_vm3 = vweird.f32 %v596_v46 }
  0xfc   : > { %1942 = vrcp.f32 %v615_v32  ;;  %v627_v24 = vand.u32 2147483648, %v615_v32  ;;  %v625_v30 = vand.u32 2147483647, %v615_v32  ;;  %vm621_vm4 = vweird.f32 %v615_v32 }
  0xfd   : > { %vm607_vm7 = vcmp.eq.f32.partialorder %v606_v20, 8.507059e+37 }
  0xfe   : > { %vm626_vm8 = vcmp.eq.f32.partialorder %v625_v30, 8.507059e+37 }
  0xff   : > { %v1939_v17 = vpop.eup %1938 }
 0x100   : > { %v635_v27 = vadd.f32 1.0, %v1939_v17  ;;  %v609_v17 = vor.u32 1.1754944e-38, %v608_v23 }
 0x101   : > { %v1941_v29 = vpop.eup %1940 }
 0x102   : > { %v1943_v59 = vpop.eup %1942  ;;  %v598_v19 = vmul.f32 %v1941_v29, %v596_v46  ;;  %1944 = vrcp.f32 %v635_v27  ;;  %vm603_vm1 = vweird.f32 %v1941_v29  ;;  %vm641_vm10 = vweird.f32 %v635_v27 }
 0x103   : > { %v617_v31 = vmul.f32 %v1943_v59, %v615_v32  ;;  %1946 = vtanh.f32 %v591_v22  ;;  %vm622_vm2 = vweird.f32 %v1943_v59  ;;  %vm604_vm5 = vmor %vm602_vm3, %vm603_vm1 }
 0x104   : > { %v599_v8 = vsub.f32 1.0, %v598_v19  ;;  %vm623_vm6 = vmor %vm621_vm4, %vm622_vm2  ;;  %v628_v19 = vor.u32 1.1754944e-38, %v627_v24  ;;  %v647_v24 = vand.u32 2147483648, %v635_v27 }
 0x105   : > { %v618_v21 = vsub.f32 1.0, %v617_v31  ;;  %v504_v31 = vld [vmem:[#allocation3] sm:$0xff] }
 0x106   : > { %v600_v28 = vmul.f32 %v1941_v29, %v599_v8 }
 0x107   : > { %v619_v18 = vmul.f32 %v1943_v59, %v618_v21 }
 0x108   : > { %v1945_v25 = vpop.eup %1944  ;;  %v601_v15 = vadd.f32 %v1941_v29, %v600_v28 }
 0x109   : > { %v620_v26 = vadd.f32 %v1943_v59, %v619_v18  ;;  %v637_v33 = vmul.f32 %v1945_v25, %v635_v27  ;;  %v1947_v22 = vpop.eup %1946  ;;  %vm642_vm9 = vweird.f32 %v1945_v25 }
 0x10a   : > { %v605_v16 = vsel %vm604_vm5, %v1941_v29, %v601_v15  ;;  %v645_v15 = vand.u32 2147483647, %v635_v27  ;;  %vm643_vm11 = vmor %vm641_vm10, %vm642_vm9 }
 0x10b   : > { %v610_v8 = vsel %vm607_vm7, %v609_v17, %v605_v16  ;;  %v624_v14 = vsel %vm623_vm6, %v1943_v59, %v620_v26  ;;  %v638_v21 = vsub.f32 1.0, %v637_v33  ;;  %v648_v16 = vor.u32 1.1754944e-38, %v647_v24 }
 0x10c   : > { %v629_v13 = vsel %vm626_vm8, %v628_v19, %v624_v14  ;;  %v652_v11 = vmul.f32 %v1947_v22, %v610_v8  ;;  %vm646_vm12 = vcmp.eq.f32.partialorder %v645_v15, 8.507059e+37 }
 0x10d   : > { %v651_v12 = vmul.f32 %v629_v13, %v504_v31  ;;  %v639_v46 = vmul.f32 %v1945_v25, %v638_v21  ;;  %v3914_v31 = vld [vmem:[#allocation36_spill] sm:$0xff] }
 0x10f   : > { %v2977_v32 = vadd.f32 %v652_v11, %v651_v12  ;;  %v640_v23 = vadd.f32 %v1945_v25, %v639_v46  ;;  %v3913_v12 = vld [vmem:[#allocation37_spill] sm:$0xff] }
 0x111   : > { %1948 = vtanh.f32 %v2977_v32  ;;  %v644_v29 = vsel %vm643_vm11, %v1945_v25, %v640_v23 }
 0x112   : > { %v649_v28 = vsel %vm646_vm12, %v648_v16, %v644_v29 }
 0x117   : > { %v1949_v59 = vpop.eup %1948 }
 0x118   : > { %v655_v14 = vmul.f32 %v1949_v59, %v649_v28 }
 0x11a   : > { %656 = vst [vmem:[%s2270_s4] sm:$0xff] %v655_v14  ;;  %678 = vmatmul.f32.vlgmr.msra.gmra.mxu0 %v655_v14  ;;  %698 = vmatmul.f32.vlgmr.msra.gmra.mxu1 %v655_v14 }
 0x11b   : > { %718 = vmatmul.f32.vlgmr.msra.gmra.mxu2 %v655_v14  ;;  %738 = vmatmul.f32.vlgmr.msra.gmra.mxu3 %v655_v14 }
 0x11c   : > { %970 = vmatpush.msra.mxu0 %v2373_v34  ;;  %990 = vmatpush.msra.mxu1 %v2378_v35  ;;  %v3885_v34 = vld [vmem:[#allocation9_spill] sm:$0xff]  ;;  %v3886_v35 = vld [vmem:[#allocation8_spill] sm:$0xff] }
 0x11d   : > { %1010 = vmatpush.msra.mxu2 %v2390_v37  ;;  %1030 = vmatpush.msra.mxu3 %v2385_v36  ;;  %v3887_v36 = vld [vmem:[#allocation10_spill] sm:$0xff]  ;;  %v3888_v37 = vld [vmem:[#allocation11_spill] sm:$0xff] }
 0x11e   : > { %971 = vmatpush.msra.mxu0 %v2397_v38  ;;  %991 = vmatpush.msra.mxu1 %v2402_v39  ;;  %v3889_v38 = vld [vmem:[#allocation13_spill] sm:$0xff]  ;;  %v3890_v39 = vld [vmem:[#allocation12_spill] sm:$0xff] }
 0x11f   : > { %1011 = vmatpush.msra.mxu2 %v2414_v41  ;;  %1031 = vmatpush.msra.mxu3 %v2409_v40  ;;  %v3891_v40 = vld [vmem:[#allocation14_spill] sm:$0xff]  ;;  %v3892_v41 = vld [vmem:[#allocation15_spill] sm:$0xff] }
 0x120   : > { %972 = vmatpush.msra.mxu0 %v2420_v42  ;;  %992 = vmatpush.msra.mxu1 %v2425_v43  ;;  %v3893_v42 = vld [vmem:[#allocation17_spill] sm:$0xff]  ;;  %v3894_v43 = vld [vmem:[#allocation16_spill] sm:$0xff] }
 0x121   : > { %1012 = vmatpush.msra.mxu2 %v2438_v45  ;;  %1032 = vmatpush.msra.mxu3 %v2433_v44  ;;  %v3895_v44 = vld [vmem:[#allocation18_spill] sm:$0xff]  ;;  %v3896_v45 = vld [vmem:[#allocation19_spill] sm:$0xff] }
 0x122   : > { %973 = vmatpush.msra.mxu0 %v2448_v47  ;;  %993 = vmatpush.msra.mxu1 %v2453_v48  ;;  %v3897_v47 = vld [vmem:[#allocation21_spill] sm:$0xff]  ;;  %v3898_v48 = vld [vmem:[#allocation20_spill] sm:$0xff] }
 0x123   : > { %1013 = vmatpush.msra.mxu2 %v2467_v50  ;;  %1033 = vmatpush.msra.mxu3 %v2462_v49  ;;  %v3899_v49 = vld [vmem:[#allocation22_spill] sm:$0xff]  ;;  %v3900_v50 = vld [vmem:[#allocation23_spill] sm:$0xff] }
 0x124   : > { %974 = vmatpush.msra.mxu0 %v2474_v51  ;;  %994 = vmatpush.msra.mxu1 %v2479_v52  ;;  %v3901_v51 = vld [vmem:[#allocation25_spill] sm:$0xff]  ;;  %v3902_v52 = vld [vmem:[#allocation24_spill] sm:$0xff] }
 0x125   : > { %1014 = vmatpush.msra.mxu2 %v2491_v54  ;;  %1034 = vmatpush.msra.mxu3 %v2486_v53  ;;  %v3903_v53 = vld [vmem:[#allocation26_spill] sm:$0xff]  ;;  %v3904_v54 = vld [vmem:[#allocation27_spill] sm:$0xff] }
 0x126   : > { %975 = vmatpush.msra.mxu0 %v2497_v55  ;;  %995 = vmatpush.msra.mxu1 %v2502_v56  ;;  %v3905_v55 = vld [vmem:[#allocation28_spill] sm:$0xff]  ;;  %v3906_v56 = vld [vmem:[#allocation29_spill] sm:$0xff] }
 0x127   : > { %1015 = vmatpush.msra.mxu2 %v2515_v58  ;;  %1035 = vmatpush.msra.mxu3 %v2510_v57  ;;  %v3907_v57 = vld [vmem:[#allocation30_spill] sm:$0xff]  ;;  %v3908_v58 = vld [vmem:[#allocation31_spill] sm:$0xff] }
 0x128   : > { %976 = vmatpush.msra.mxu0 %v2525_v60  ;;  %996 = vmatpush.msra.mxu1 %v2530_v61  ;;  %v3909_v60 = vld [vmem:[#allocation32_spill] sm:$0xff]  ;;  %v3910_v61 = vld [vmem:[#allocation33_spill] sm:$0xff] }
 0x129   : > { %1016 = vmatpush.msra.mxu2 %v2544_v63  ;;  %1036 = vmatpush.msra.mxu3 %v2539_v62 }
 0x12a   : > { %977 = vmatpush.msra.mxu0 %v2551_v0  ;;  %997 = vmatpush.msra.mxu1 %v2556_v1  ;;  %v3911_v0 = vld [vmem:[#allocation34_spill] sm:$0xff] }
 0x12b   : > { %1017 = vmatpush.msra.mxu2 %v2568_v3  ;;  %1037 = vmatpush.msra.mxu3 %v2563_v2  ;;  %v3912_v2 = vld [vmem:[#allocation35_spill] sm:$0xff] }
 0x12c   : > { %978 = vmatpush.msra.mxu0 %v2574_v4  ;;  %998 = vmatpush.msra.mxu1 %v2579_v5 }
 0x12d   : > { %1018 = vmatpush.msra.mxu2 %v2592_v7  ;;  %1038 = vmatpush.msra.mxu3 %v2587_v6 }
 0x12e   : > { %979 = vmatpush.msra.mxu0 %v2602_v9  ;;  %999 = vmatpush.msra.mxu1 %v2607_v10 }
 0x12f   : > { %1019 = vmatpush.msra.mxu2 %v3885_v34  ;;  %1039 = vmatpush.msra.mxu3 %v3886_v35 }
 0x130   : > { %980 = vmatpush.msra.mxu0 %v3887_v36  ;;  %1000 = vmatpush.msra.mxu1 %v3888_v37 }
 0x131   : > { %1020 = vmatpush.msra.mxu2 %v3889_v38  ;;  %1040 = vmatpush.msra.mxu3 %v3890_v39 }
 0x132   : > { %981 = vmatpush.msra.mxu0 %v3891_v40  ;;  %1001 = vmatpush.msra.mxu1 %v3892_v41 }
 0x133   : > { %1021 = vmatpush.msra.mxu2 %v3893_v42  ;;  %1041 = vmatpush.msra.mxu3 %v3894_v43 }
 0x134   : > { %982 = vmatpush.msra.mxu0 %v3895_v44  ;;  %1002 = vmatpush.msra.mxu1 %v3896_v45 }
 0x135   : > { %1022 = vmatpush.msra.mxu2 %v3897_v47  ;;  %1042 = vmatpush.msra.mxu3 %v3898_v48 }
 0x136   : > { %983 = vmatpush.msra.mxu0 %v3899_v49  ;;  %1003 = vmatpush.msra.mxu1 %v3900_v50 }
 0x137   : > { %1023 = vmatpush.msra.mxu2 %v3901_v51  ;;  %1043 = vmatpush.msra.mxu3 %v3902_v52 }
 0x138   : > { %984 = vmatpush.msra.mxu0 %v3903_v53  ;;  %1004 = vmatpush.msra.mxu1 %v3904_v54 }
 0x139   : > { %1024 = vmatpush.msra.mxu2 %v3905_v55  ;;  %1044 = vmatpush.msra.mxu3 %v3906_v56 }
 0x13a   : > { %985 = vmatpush.msra.mxu0 %v3907_v57  ;;  %1005 = vmatpush.msra.mxu1 %v3908_v58 }
 0x13b   : > { %1025 = vmatpush.msra.mxu2 %v3909_v60  ;;  %1045 = vmatpush.msra.mxu3 %v3910_v61 }
 0x197   : > { %v679_v62 = vpop.f32.mrf.mxu0  ;;  %v699_v63 = vpop.f32.mrf.mxu1 }
 0x198   : > { %v742_v1 = vadd.f32 %v679_v62, %v3911_v0  ;;  %v743_v3 = vadd.f32 %v699_v63, %v3912_v2 }
 0x19a   : > { %v1858_v4 = vmul.f32 -1.442695, %v742_v1  ;;  %v1859_v5 = vmul.f32 -1.442695, %v743_v3 }
 0x19c   : > { %1950 = vpow2.f32 %v1858_v4 }
 0x19d   : > { %1952 = vpow2.f32 %v1859_v5 }
 0x19e   : > { %v739_v11 = vpop.f32.mrf.mxu3  ;;  %v719_v17 = vpop.f32.mrf.mxu2 }
 0x19f   : > { %v745_v13 = vadd.f32 %v739_v11, %v3913_v12  ;;  %v744_v22 = vadd.f32 %v719_v17, %v3914_v31 }
 0x1a1   : > { %v1860_v25 = vmul.f32 -1.442695, %v745_v13 }
 0x1a2   : > { %v1951_v27 = vpop.eup %1950 }
 0x1a3   : > { %v1953_v20 = vpop.eup %1952  ;;  %v749_v18 = vadd.f32 1.0, %v1951_v27  ;;  %1954 = vpow2.f32 %v1860_v25 }
 0x1a4   : > { %v768_v30 = vadd.f32 1.0, %v1953_v20 }
 0x1a5   : > { %1956 = vrcp.f32 %v749_v18  ;;  %v761_v15 = vand.u32 2147483648, %v749_v18  ;;  %v759_v59 = vand.u32 2147483647, %v749_v18  ;;  %vm755_vm15 = vweird.f32 %v749_v18 }
 0x1a6   : > { %1958 = vrcp.f32 %v768_v30  ;;  %v780_v29 = vand.u32 2147483648, %v768_v30  ;;  %v778_v14 = vand.u32 2147483647, %v768_v30  ;;  %vm774_vm0 = vweird.f32 %v768_v30 }
 0x1a7   : > { %v762_v0 = vor.u32 1.1754944e-38, %v761_v15  ;;  %vm760_vm3 = vcmp.eq.f32.partialorder %v759_v59, 8.507059e+37  ;;  %v3081_v15 = vld [vmem:[%s3717_s2 + $0x1c0] sm:$0xff]  ;;  %v3099_v59 = vld [vmem:[%s3717_s2 + $0x1d8] sm:$0xff] }
 0x1a8   : > { %v781_v3 = vor.u32 1.1754944e-38, %v780_v29  ;;  %vm779_vm4 = vcmp.eq.f32.partialorder %v778_v14, 8.507059e+37  ;;  %v3087_v29 = vld [vmem:[%s3717_s2 + $0x1c8] sm:$0xff] }
 0x1a9   : > { %v1955_v26 = vpop.eup %1954  ;;  %v3111_v14 = vld [vmem:[%s3717_s2 + $0x1a8] sm:$0xff] }
 0x1aa   : > { %v788_v33 = vadd.f32 1.0, %v1955_v26 }
 0x1ab   : > { %v1957_v19 = vpop.eup %1956 }
 0x1ac   : > { %v1959_v8 = vpop.eup %1958  ;;  %v751_v21 = vmul.f32 %v1957_v19, %v749_v18  ;;  %1960 = vrcp.f32 %v788_v33  ;;  %vm756_vm13 = vweird.f32 %v1957_v19  ;;  %v800_v26 = vand.u32 2147483648, %v788_v33 }
 0x1ad   : > { %v770_v46 = vmul.f32 %v1959_v8, %v768_v30  ;;  %1962 = vtanh.f32 %v744_v22  ;;  %vm775_vm14 = vweird.f32 %v1959_v8  ;;  %vm757_vm1 = vmor %vm755_vm15, %vm756_vm13  ;;  %vm794_vm6 = vweird.f32 %v788_v33 }
 0x1ae   : > { %v752_v23 = vsub.f32 1.0, %v751_v21  ;;  %vm776_vm2 = vmor %vm774_vm0, %vm775_vm14  ;;  %v801_v22 = vor.u32 1.1754944e-38, %v800_v26  ;;  %v3213_v26 = vld [vmem:[%s3717_s2 + $0x130] sm:$0xff] }
 0x1af   : > { %v771_v24 = vsub.f32 1.0, %v770_v46 }
 0x1b0   : > { %v753_v16 = vmul.f32 %v1957_v19, %v752_v23  ;;  %v3069_v23 = vld [vmem:[%s3717_s2 + $0x1f0] sm:$0xff] }
 0x1b1   : > { %v772_v28 = vmul.f32 %v1959_v8, %v771_v24  ;;  %v3075_v24 = vld [vmem:[%s3717_s2 + $0x1f8] sm:$0xff] }
 0x1b2   : > { %v1961_v62 = vpop.eup %1960  ;;  %v754_v63 = vadd.f32 %v1957_v19, %v753_v16  ;;  %v3093_v16 = vld [vmem:[%s3717_s2 + $0x1d0] sm:$0xff] }
 0x1b3   : > { %v773_v1 = vadd.f32 %v1959_v8, %v772_v28  ;;  %v790_v2 = vmul.f32 %v1961_v62, %v788_v33  ;;  %v1963_v5 = vpop.eup %1962  ;;  %vm795_vm5 = vweird.f32 %v1961_v62  ;;  %v3105_v28 = vld [vmem:[%s3717_s2 + $0x1a0] sm:$0xff] }
 0x1b4   : > { %v758_v4 = vsel %vm757_vm1, %v1957_v19, %v754_v63  ;;  %v798_v19 = vand.u32 2147483647, %v788_v33  ;;  %vm796_vm7 = vmor %vm794_vm6, %vm795_vm5  ;;  %v3063_v33 = vld [vmem:[%s3717_s2 + $0x1e8] sm:$0xff]  ;;  %v3123_v63 = vld [vmem:[%s3717_s2 + $0x1b8] sm:$0xff] }
 0x1b5   : > { %v763_v11 = vsel %vm760_vm3, %v762_v0, %v758_v4  ;;  %v777_v12 = vsel %vm776_vm2, %v1959_v8, %v773_v1  ;;  %v791_v13 = vsub.f32 1.0, %v790_v2  ;;  %v3129_v0 = vld [vmem:[%s3717_s2 + $0x180] sm:$0xff]  ;;  %v3135_v1 = vld [vmem:[%s3717_s2 + $0x188] sm:$0xff]  ;;  %v3141_v2 = vld [vmem:[%s3717_s2 + $0x190] sm:$0xff] }
 0x1b6   : > { %v782_v25 = vsel %vm779_vm4, %v781_v3, %v777_v12  ;;  %v805_v27 = vmul.f32 %v1963_v5, %v763_v11  ;;  %vm799_vm8 = vcmp.eq.f32.partialorder %v798_v19, 8.507059e+37  ;;  %v3147_v3 = vld [vmem:[%s3717_s2 + $0x198] sm:$0xff]  ;;  %v3153_v4 = vld [vmem:[%s3717_s2 + $0x160] sm:$0xff]  ;;  %v3159_v5 = vld [vmem:[%s3717_s2 + $0x168] sm:$0xff] }
 0x1b7   : > { %v804_v20 = vmul.f32 %v782_v25, %v2977_v32  ;;  %v792_v18 = vmul.f32 %v1961_v62, %v791_v13  ;;  %v3057_v32 = vld [vmem:[%s3717_s2 + $0x1e0] sm:$0xff]  ;;  %v3165_v11 = vld [vmem:[%s3717_s2 + $0x170] sm:$0xff]  ;;  %v3171_v12 = vld [vmem:[%s3717_s2 + $0x178] sm:$0xff] }
 0x1b8   : > { %v3177_v13 = vld [vmem:[%s3717_s2 + $0x140] sm:$0xff]  ;;  %v3183_v25 = vld [vmem:[%s3717_s2 + $0x148] sm:$0xff]  ;;  %v3219_v19 = vld [vmem:[%s3717_s2 + $0x138] sm:$0xff] }
 0x1b9   : > { %v3050_v30 = vadd.f32 %v805_v27, %v804_v20  ;;  %v793_v17 = vadd.f32 %v1961_v62, %v792_v18  ;;  %v3189_v27 = vld [vmem:[%s3717_s2 + $0x150] sm:$0xff]  ;;  %v3195_v20 = vld [vmem:[%s3717_s2 + $0x158] sm:$0xff]  ;;  %v3201_v18 = vld [vmem:[%s3717_s2 + $0x120] sm:$0xff] }
 0x1bb   : > { %1964 = vtanh.f32 %v3050_v30  ;;  %v797_v31 = vsel %vm796_vm7, %v1961_v62, %v793_v17  ;;  %v3117_v62 = vld [vmem:[%s3717_s2 + $0x1b0] sm:$0xff]  ;;  %v3207_v17 = vld [vmem:[%s3717_s2 + $0x128] sm:$0xff] }
 0x1bc   : > { %v802_v21 = vsel %vm799_vm8, %v801_v22, %v797_v31  ;;  %v3225_v31 = vld [vmem:[%s3717_s2 + $0x100] sm:$0xff]  ;;  %v3231_v22 = vld [vmem:[%s3717_s2 + $0x108] sm:$0xff] }
 0x1bd   : > { %3915 = vst [vmem:[#allocation9_spill] sm:$0xff] %v3231_v22 }
 0x1c1   : > { %v1965_v8 = vpop.eup %1964 }
 0x1c2   : > { %v808_v46 = vmul.f32 %v1965_v8, %v802_v21  ;;  %v3237_v8 = vld [vmem:[%s3717_s2 + $0x110] sm:$0xff]  ;;  %v3243_v21 = vld [vmem:[%s3717_s2 + $0x118] sm:$0xff] }
 0x1c4   : > { %1861 = vst [vmem:[%s2270_s4 + $0x8] sm:$0xff] %v808_v46  ;;  %832 = vmatmul.f32.vlgmr.msrb.gmra.mxu0 %v808_v46  ;;  %852 = vmatmul.f32.vlgmr.msrb.gmra.mxu1 %v808_v46 }
 0x1c5   : > { %872 = vmatmul.f32.vlgmr.msrb.gmra.mxu2 %v808_v46  ;;  %892 = vmatmul.f32.vlgmr.msrb.gmra.mxu3 %v808_v46  ;;  %v3249_v46 = vld [vmem:[%s3717_s2 + $0xe0] sm:$0xff] }
 0x1c6   : > { %1124 = vmatpush.msrb.mxu0 %v3057_v32  ;;  %1144 = vmatpush.msrb.mxu1 %v3063_v33 }
 0x1c7   : > { %1164 = vmatpush.msrb.mxu2 %v3069_v23  ;;  %1184 = vmatpush.msrb.mxu3 %v3075_v24 }
 0x1c8   : > { %1125 = vmatpush.msrb.mxu0 %v3081_v15  ;;  %1145 = vmatpush.msrb.mxu1 %v3087_v29 }
 0x1c9   : > { %1165 = vmatpush.msrb.mxu2 %v3093_v16  ;;  %1185 = vmatpush.msrb.mxu3 %v3099_v59 }
 0x1ca   : > { %1126 = vmatpush.msrb.mxu0 %v3105_v28  ;;  %1146 = vmatpush.msrb.mxu1 %v3111_v14 }
 0x1cb   : > { %1166 = vmatpush.msrb.mxu2 %v3117_v62  ;;  %1186 = vmatpush.msrb.mxu3 %v3123_v63 }
 0x1cc   : > { %1127 = vmatpush.msrb.mxu0 %v3129_v0  ;;  %1147 = vmatpush.msrb.mxu1 %v3135_v1 }
 0x1cd   : > { %1167 = vmatpush.msrb.mxu2 %v3141_v2  ;;  %1187 = vmatpush.msrb.mxu3 %v3147_v3 }
 0x1ce   : > { %1128 = vmatpush.msrb.mxu0 %v3153_v4  ;;  %1148 = vmatpush.msrb.mxu1 %v3159_v5 }
 0x1cf   : > { %1168 = vmatpush.msrb.mxu2 %v3165_v11  ;;  %1188 = vmatpush.msrb.mxu3 %v3171_v12 }
 0x1d0   : > { %1129 = vmatpush.msrb.mxu0 %v3177_v13  ;;  %1149 = vmatpush.msrb.mxu1 %v3183_v25 }
 0x1d1   : > { %1169 = vmatpush.msrb.mxu2 %v3189_v27  ;;  %1189 = vmatpush.msrb.mxu3 %v3195_v20 }
 0x1d2   : > { %1130 = vmatpush.msrb.mxu0 %v3201_v18  ;;  %1150 = vmatpush.msrb.mxu1 %v3207_v17 }
 0x1d3   : > { %1170 = vmatpush.msrb.mxu2 %v3213_v26  ;;  %1190 = vmatpush.msrb.mxu3 %v3219_v19 }
 0x1d4   : > { %1131 = vmatpush.msrb.mxu0 %v3225_v31  ;;  %1151 = vmatpush.msrb.mxu1 %v3231_v22  ;;  %v3255_v22 = vld [vmem:[%s3717_s2 + $0xe8] sm:$0xff] }
 0x1d5   : > { %1171 = vmatpush.msrb.mxu2 %v3237_v8  ;;  %1191 = vmatpush.msrb.mxu3 %v3243_v21 }
 0x1d6   : > { %1132 = vmatpush.msrb.mxu0 %v3249_v46  ;;  %1152 = vmatpush.msrb.mxu1 %v3255_v22 }
 0x1d7   : > { %1172 = vmatpush.msrb.mxu2 %v2592_v7  ;;  %1192 = vmatpush.msrb.mxu3 %v2587_v6 }
 0x1d8   : > { %1133 = vmatpush.msrb.mxu0 %v2602_v9  ;;  %1153 = vmatpush.msrb.mxu1 %v2607_v10  ;;  %v3916_v9 = vld [vmem:[#allocation38_spill] sm:$0xff] }
 0x1d9   : > { %1173 = vmatpush.msrb.mxu2 %v3885_v34  ;;  %1193 = vmatpush.msrb.mxu3 %v3886_v35  ;;  %v3917_v34 = vld [vmem:[#allocation39_spill] sm:$0xff] }
 0x1da   : > { %1134 = vmatpush.msrb.mxu0 %v3887_v36  ;;  %1154 = vmatpush.msrb.mxu1 %v3888_v37 }
 0x1db   : > { %1174 = vmatpush.msrb.mxu2 %v3889_v38  ;;  %1194 = vmatpush.msrb.mxu3 %v3890_v39  ;;  %v3918_v39 = vld [vmem:[#allocation41_spill] sm:$0xff] }
 0x1dc   : > { %1135 = vmatpush.msrb.mxu0 %v3891_v40  ;;  %1155 = vmatpush.msrb.mxu1 %v3892_v41 }
 0x1dd   : > { %1175 = vmatpush.msrb.mxu2 %v3893_v42  ;;  %1195 = vmatpush.msrb.mxu3 %v3894_v43 }
 0x1de   : > { %1136 = vmatpush.msrb.mxu0 %v3895_v44  ;;  %1156 = vmatpush.msrb.mxu1 %v3896_v45 }
 0x1df   : > { %1176 = vmatpush.msrb.mxu2 %v3897_v47  ;;  %1196 = vmatpush.msrb.mxu3 %v3898_v48 }
 0x1e0   : > { %1137 = vmatpush.msrb.mxu0 %v3899_v49  ;;  %1157 = vmatpush.msrb.mxu1 %v3900_v50 }
 0x1e1   : > { %1177 = vmatpush.msrb.mxu2 %v3901_v51  ;;  %1197 = vmatpush.msrb.mxu3 %v3902_v52  ;;  %v3919_v51 = vld [vmem:[#allocation40_spill] sm:$0xff] }
 0x1e2   : > { %1138 = vmatpush.msrb.mxu0 %v3903_v53  ;;  %1158 = vmatpush.msrb.mxu1 %v3904_v54 }
 0x1e3   : > { %1178 = vmatpush.msrb.mxu2 %v3905_v55  ;;  %1198 = vmatpush.msrb.mxu3 %v3906_v56 }
 0x1e4   : > { %1139 = vmatpush.msrb.mxu0 %v3907_v57  ;;  %1159 = vmatpush.msrb.mxu1 %v3908_v58 }
 0x1e5   : > { %1179 = vmatpush.msrb.mxu2 %v3909_v60  ;;  %1199 = vmatpush.msrb.mxu3 %v3910_v61 }
 0x241   : > { %v833_v6 = vpop.f32.mrf.mxu0  ;;  %v853_v7 = vpop.f32.mrf.mxu1 }
 0x242   : > { %v896_v10 = vadd.f32 %v833_v6, %v3916_v9  ;;  %v897_v35 = vadd.f32 %v853_v7, %v3917_v34 }
 0x244   : > { %v1862_v36 = vmul.f32 -1.442695, %v896_v10  ;;  %v1863_v37 = vmul.f32 -1.442695, %v897_v35 }
 0x246   : > { %1966 = vpow2.f32 %v1862_v36 }
 0x247   : > { %1968 = vpow2.f32 %v1863_v37 }
 0x248   : > { %v893_v38 = vpop.f32.mrf.mxu3  ;;  %v873_v47 = vpop.f32.mrf.mxu2 }
 0x249   : > { %v899_v40 = vadd.f32 %v893_v38, %v3918_v39  ;;  %v898_v52 = vadd.f32 %v873_v47, %v3919_v51 }
 0x24b   : > { %v1864_v41 = vmul.f32 -1.442695, %v899_v40 }
 0x24c   : > { %v1967_v42 = vpop.eup %1966 }
 0x24d   : > { %v1969_v43 = vpop.eup %1968  ;;  %v903_v44 = vadd.f32 1.0, %v1967_v42  ;;  %1970 = vpow2.f32 %v1864_v41 }
 0x24e   : > { %v922_v45 = vadd.f32 1.0, %v1969_v43 }
 0x24f   : > { %1972 = vrcp.f32 %v903_v44  ;;  %v915_v58 = vand.u32 2147483648, %v903_v44  ;;  %v913_v6 = vand.u32 2147483647, %v903_v44  ;;  %vm909_vm11 = vweird.f32 %v903_v44 }
 0x250   : > { %1974 = vrcp.f32 %v922_v45  ;;  %v934_v60 = vand.u32 2147483648, %v922_v45  ;;  %v932_v9 = vand.u32 2147483647, %v922_v45  ;;  %vm928_vm12 = vweird.f32 %v922_v45 }
 0x251   : > { %v916_v35 = vor.u32 1.1754944e-38, %v915_v58  ;;  %vm914_vm15 = vcmp.eq.f32.partialorder %v913_v6, 8.507059e+37  ;;  %v3352_v6 = vld [vmem:[%s3717_s2 + $0xc8] sm:$0xff] }
 0x252   : > { %v935_v38 = vor.u32 1.1754944e-38, %v934_v60  ;;  %vm933_vm0 = vcmp.eq.f32.partialorder %v932_v9, 8.507059e+37  ;;  %v3340_v60 = vld [vmem:[%s3717_s2 + $0xf8] sm:$0xff] }
 0x253   : > { %v1971_v48 = vpop.eup %1970  ;;  %v3364_v9 = vld [vmem:[%s3717_s2 + $0xd8] sm:$0xff] }
 0x254   : > { %v942_v49 = vadd.f32 1.0, %v1971_v48  ;;  %3922 = vst [vmem:[#allocation10_spill] sm:$0xff] %v3364_v9 }
 0x255   : > { %v1973_v50 = vpop.eup %1972 }
 0x256   : > { %v1975_v53 = vpop.eup %1974  ;;  %v905_v54 = vmul.f32 %v1973_v50, %v903_v44  ;;  %1976 = vrcp.f32 %v942_v49  ;;  %vm910_vm9 = vweird.f32 %v1973_v50  ;;  %vm948_vm2 = vweird.f32 %v942_v49 }
 0x257   : > { %v924_v55 = vmul.f32 %v1975_v53, %v922_v45  ;;  %1978 = vtanh.f32 %v898_v52  ;;  %vm929_vm10 = vweird.f32 %v1975_v53  ;;  %vm911_vm13 = vmor %vm909_vm11, %vm910_vm9 }
 0x258   : > { %v906_v56 = vsub.f32 1.0, %v905_v54  ;;  %vm930_vm14 = vmor %vm928_vm12, %vm929_vm10  ;;  %v954_v54 = vand.u32 2147483648, %v942_v49 }
 0x259   : > { %v925_v57 = vsub.f32 1.0, %v924_v55 }
 0x25a   : > { %v907_v61 = vmul.f32 %v1973_v50, %v906_v56 }
 0x25b   : > { %v926_v7 = vmul.f32 %v1975_v53, %v925_v57 }
 0x25c   : > { %v1977_v10 = vpop.eup %1976  ;;  %v908_v34 = vadd.f32 %v1973_v50, %v907_v61  ;;  %v3346_v61 = vld [vmem:[%s3717_s2 + $0xc0] sm:$0xff] }
 0x25d   : > { %v927_v36 = vadd.f32 %v1975_v53, %v926_v7  ;;  %v944_v37 = vmul.f32 %v1977_v10, %v942_v49  ;;  %v1979_v40 = vpop.eup %1978  ;;  %vm949_vm1 = vweird.f32 %v1977_v10  ;;  %v3358_v7 = vld [vmem:[%s3717_s2 + $0xd0] sm:$0xff] }
 0x25e   : > { %v912_v39 = vsel %vm911_vm13, %v1973_v50, %v908_v34  ;;  %v952_v50 = vand.u32 2147483647, %v942_v49  ;;  %vm950_vm3 = vmor %vm948_vm2, %vm949_vm1  ;;  %v3334_v49 = vld [vmem:[%s3717_s2 + $0xf0] sm:$0xff]  ;;  %3921 = vst [vmem:[#allocation8_spill] sm:$0xff] %v3358_v7  ;;  %v3376_v34 = vld [vmem:[%s3717_s2 + $0xa8] sm:$0xff] }
 0x25f   : > { %v917_v41 = vsel %vm914_vm15, %v916_v35, %v912_v39  ;;  %v931_v42 = vsel %vm930_vm14, %v1975_v53, %v927_v36  ;;  %v945_v43 = vsub.f32 1.0, %v944_v37  ;;  %v955_v53 = vor.u32 1.1754944e-38, %v954_v54  ;;  %3924 = vst [vmem:[#allocation13_spill] sm:$0xff] %v3376_v34  ;;  %v3382_v35 = vld [vmem:[%s3717_s2 + $0xb0] sm:$0xff]  ;;  %v3388_v36 = vld [vmem:[%s3717_s2 + $0xb8] sm:$0xff]  ;;  %v3394_v37 = vld [vmem:[%s3717_s2 + $0x80] sm:$0xff] }
 0x260   : > { %v936_v47 = vsel %vm933_vm0, %v935_v38, %v931_v42  ;;  %v959_v48 = vmul.f32 %v1979_v40, %v917_v41  ;;  %vm953_vm4 = vcmp.eq.f32.partialorder %v952_v50, 8.507059e+37  ;;  %3925 = vst [vmem:[#allocation12_spill] sm:$0xff] %v3382_v35  ;;  %v3400_v38 = vld [vmem:[%s3717_s2 + $0x88] sm:$0xff]  ;;  %v3406_v39 = vld [vmem:[%s3717_s2 + $0x90] sm:$0xff]  ;;  %v3412_v40 = vld [vmem:[%s3717_s2 + $0x98] sm:$0xff] }
 0x261   : > { %v958_v51 = vmul.f32 %v936_v47, %v3050_v30  ;;  %v946_v44 = vmul.f32 %v1977_v10, %v945_v43  ;;  %v3920_v30 = vld [vmem:[#allocation9_spill] sm:$0xff]  ;;  %3926 = vst [vmem:[#allocation14_spill] sm:$0xff] %v3388_v36  ;;  %v3418_v41 = vld [vmem:[%s3717_s2 + $0x60] sm:$0xff]  ;;  %v3424_v42 = vld [vmem:[%s3717_s2 + $0x68] sm:$0xff] }
 0x262   : > { %3927 = vst [vmem:[#allocation15_spill] sm:$0xff] %v3394_v37  ;;  %v3430_v43 = vld [vmem:[%s3717_s2 + $0x70] sm:$0xff]  ;;  %v3436_v47 = vld [vmem:[%s3717_s2 + $0x78] sm:$0xff]  ;;  %v3466_v54 = vld [vmem:[%s3717_s2 + $0x20] sm:$0xff] }
 0x263   : > { %v3293_v45 = vadd.f32 %v959_v48, %v958_v51  ;;  %v947_v52 = vadd.f32 %v1977_v10, %v946_v44  ;;  %3928 = vst [vmem:[#allocation17_spill] sm:$0xff] %v3400_v38  ;;  %v3442_v48 = vld [vmem:[%s3717_s2 + $0x40] sm:$0xff]  ;;  %v3448_v51 = vld [vmem:[%s3717_s2 + $0x48] sm:$0xff]  ;;  %v3454_v44 = vld [vmem:[%s3717_s2 + $0x50] sm:$0xff] }
 0x264   : > { %3929 = vst [vmem:[#allocation16_spill] sm:$0xff] %v3406_v39  ;;  %v3472_v50 = vld [vmem:[%s3717_s2 + $0x28] sm:$0xff] }
 0x265   : > { %1980 = vtanh.f32 %v3293_v45  ;;  %v951_v55 = vsel %vm950_vm3, %v1977_v10, %v947_v52  ;;  %v3370_v10 = vld [vmem:[%s3717_s2 + $0xa0] sm:$0xff]  ;;  %3930 = vst [vmem:[#allocation18_spill] sm:$0xff] %v3412_v40  ;;  %v3460_v52 = vld [vmem:[%s3717_s2 + $0x58] sm:$0xff] }
 0x266   : > { %v956_v57 = vsel %vm953_vm4, %v955_v53, %v951_v55  ;;  %3923 = vst [vmem:[#allocation11_spill] sm:$0xff] %v3370_v10  ;;  %v3478_v55 = vld [vmem:[%s3717_s2 + $0x30] sm:$0xff]  ;;  %v3484_v53 = vld [vmem:[%s3717_s2 + $0x38] sm:$0xff] }
 0x267   : > { %3931 = vst [vmem:[#allocation19_spill] sm:$0xff] %v3418_v41 }
 0x268   : > { %3932 = vst [vmem:[#allocation21_spill] sm:$0xff] %v3424_v42 }
 0x269   : > { %3933 = vst [vmem:[#allocation20_spill] sm:$0xff] %v3430_v43 }
 0x26a   : > { %3934 = vst [vmem:[#allocation22_spill] sm:$0xff] %v3436_v47 }
 0x26b   : > { %v1981_v56 = vpop.eup %1980  ;;  %3935 = vst [vmem:[#allocation23_spill] sm:$0xff] %v3442_v48 }
 0x26c   : > { %v962_v58 = vmul.f32 %v1981_v56, %v956_v57  ;;  %3936 = vst [vmem:[#allocation25_spill] sm:$0xff] %v3448_v51  ;;  %v3490_v56 = vld [vmem:[%s3717_s2] sm:$0xff]  ;;  %v3496_v57 = vld [vmem:[%s3717_s2 + $0x8] sm:$0xff] }
 0x26d   : > { %3937 = vst [vmem:[#allocation24_spill] sm:$0xff] %v3454_v44 }
 0x26e   : > { %1865 = vst [vmem:[%s2270_s4 + $0x10] sm:$0xff] %v962_v58  ;;  %986 = vmatmul.f32.vlgmr.msra.gmra.mxu0 %v962_v58  ;;  %1006 = vmatmul.f32.vlgmr.msra.gmra.mxu1 %v962_v58 }
 0x26f   : > { %1026 = vmatmul.f32.vlgmr.msra.gmra.mxu2 %v962_v58  ;;  %1046 = vmatmul.f32.vlgmr.msra.gmra.mxu3 %v962_v58  ;;  %3938 = vst [vmem:[#allocation26_spill] sm:$0xff] %v3460_v52  ;;  %v3502_v58 = vld [vmem:[%s3717_s2 + $0x10] sm:$0xff] }
 0x270   : > { %1278 = vmatpush.msra.mxu0 %v3057_v32  ;;  %1298 = vmatpush.msra.mxu1 %v3063_v33  ;;  %3939 = vst [vmem:[#allocation27_spill] sm:$0xff] %v3466_v54 }
 0x271   : > { %1318 = vmatpush.msra.mxu2 %v3069_v23  ;;  %1338 = vmatpush.msra.mxu3 %v3075_v24  ;;  %3940 = vst [vmem:[#allocation28_spill] sm:$0xff] %v3472_v50 }
 0x272   : > { %1279 = vmatpush.msra.mxu0 %v3081_v15  ;;  %1299 = vmatpush.msra.mxu1 %v3087_v29  ;;  %3941 = vst [vmem:[#allocation29_spill] sm:$0xff] %v3478_v55 }
 0x273   : > { %1319 = vmatpush.msra.mxu2 %v3093_v16  ;;  %1339 = vmatpush.msra.mxu3 %v3099_v59  ;;  %3942 = vst [vmem:[#allocation30_spill] sm:$0xff] %v3484_v53 }
 0x274   : > { %1280 = vmatpush.msra.mxu0 %v3105_v28  ;;  %1300 = vmatpush.msra.mxu1 %v3111_v14  ;;  %3943 = vst [vmem:[#allocation31_spill] sm:$0xff] %v3490_v56 }
 0x275   : > { %1320 = vmatpush.msra.mxu2 %v3117_v62  ;;  %1340 = vmatpush.msra.mxu3 %v3123_v63  ;;  %3944 = vst [vmem:[#allocation32_spill] sm:$0xff] %v3496_v57 }
 0x276   : > { %1281 = vmatpush.msra.mxu0 %v3129_v0  ;;  %1301 = vmatpush.msra.mxu1 %v3135_v1  ;;  %3945 = vst [vmem:[#allocation33_spill] sm:$0xff] %v3502_v58 }
 0x277   : > { %1321 = vmatpush.msra.mxu2 %v3141_v2  ;;  %1341 = vmatpush.msra.mxu3 %v3147_v3 }
 0x278   : > { %1282 = vmatpush.msra.mxu0 %v3153_v4  ;;  %1302 = vmatpush.msra.mxu1 %v3159_v5 }
 0x279   : > { %1322 = vmatpush.msra.mxu2 %v3165_v11  ;;  %1342 = vmatpush.msra.mxu3 %v3171_v12 }
 0x27a   : > { %1283 = vmatpush.msra.mxu0 %v3177_v13  ;;  %1303 = vmatpush.msra.mxu1 %v3183_v25 }
 0x27b   : > { %1323 = vmatpush.msra.mxu2 %v3189_v27  ;;  %1343 = vmatpush.msra.mxu3 %v3195_v20 }
 0x27c   : > { %1284 = vmatpush.msra.mxu0 %v3201_v18  ;;  %1304 = vmatpush.msra.mxu1 %v3207_v17 }
 0x27d   : > { %1324 = vmatpush.msra.mxu2 %v3213_v26  ;;  %1344 = vmatpush.msra.mxu3 %v3219_v19 }
 0x27e   : > { %1285 = vmatpush.msra.mxu0 %v3225_v31  ;;  %1305 = vmatpush.msra.mxu1 %v3920_v30 }
 0x27f   : > { %1325 = vmatpush.msra.mxu2 %v3237_v8  ;;  %1345 = vmatpush.msra.mxu3 %v3243_v21 }
 0x280   : > { %1286 = vmatpush.msra.mxu0 %v3249_v46  ;;  %1306 = vmatpush.msra.mxu1 %v3255_v22 }
 0x281   : > { %1326 = vmatpush.msra.mxu2 %v3334_v49  ;;  %1346 = vmatpush.msra.mxu3 %v3340_v60 }
 0x282   : > { %1287 = vmatpush.msra.mxu0 %v3346_v61  ;;  %1307 = vmatpush.msra.mxu1 %v3352_v6 }
 0x283   : > { %1327 = vmatpush.msra.mxu2 %v3358_v7  ;;  %1347 = vmatpush.msra.mxu3 %v3364_v9 }
 0x284   : > { %1288 = vmatpush.msra.mxu0 %v3370_v10  ;;  %1308 = vmatpush.msra.mxu1 %v3376_v34 }
 0x285   : > { %1328 = vmatpush.msra.mxu2 %v3382_v35  ;;  %1348 = vmatpush.msra.mxu3 %v3388_v36 }
 0x286   : > { %1289 = vmatpush.msra.mxu0 %v3394_v37  ;;  %1309 = vmatpush.msra.mxu1 %v3400_v38 }
 0x287   : > { %1329 = vmatpush.msra.mxu2 %v3406_v39  ;;  %1349 = vmatpush.msra.mxu3 %v3412_v40 }
 0x288   : > { %1290 = vmatpush.msra.mxu0 %v3418_v41  ;;  %1310 = vmatpush.msra.mxu1 %v3424_v42 }
 0x289   : > { %1330 = vmatpush.msra.mxu2 %v3430_v43  ;;  %1350 = vmatpush.msra.mxu3 %v3436_v47  ;;  %v3949_v47 = vld [vmem:[#allocation45_spill] sm:$0xff] }
 0x28a   : > { %1291 = vmatpush.msra.mxu0 %v3442_v48  ;;  %1311 = vmatpush.msra.mxu1 %v3448_v51 }
 0x28b   : > { %1331 = vmatpush.msra.mxu2 %v3454_v44  ;;  %1351 = vmatpush.msra.mxu3 %v3460_v52  ;;  %v3948_v52 = vld [vmem:[#allocation43_spill] sm:$0xff] }
 0x28c   : > { %1292 = vmatpush.msra.mxu0 %v3466_v54  ;;  %1312 = vmatpush.msra.mxu1 %v3472_v50  ;;  %v3947_v50 = vld [vmem:[#allocation42_spill] sm:$0xff] }
 0x28d   : > { %1332 = vmatpush.msra.mxu2 %v3478_v55  ;;  %1352 = vmatpush.msra.mxu3 %v3484_v53  ;;  %v3508_v53 = vld [vmem:[%s3717_s2 + $0x18] sm:$0xff] }
 0x28e   : > { %1293 = vmatpush.msra.mxu0 %v3490_v56  ;;  %1313 = vmatpush.msra.mxu1 %v3496_v57  ;;  %3946 = vst [vmem:[#allocation34_spill] sm:$0xff] %v3508_v53 }
 0x28f   : > { %1333 = vmatpush.msra.mxu2 %v3502_v58  ;;  %1353 = vmatpush.msra.mxu3 %v3508_v53 }
 0x2eb   : > { %v987_v56 = vpop.f32.mrf.mxu0  ;;  %v1007_v55 = vpop.f32.mrf.mxu1 }
 0x2ec   : > { %v1050_v54 = vadd.f32 %v987_v56, %v3947_v50  ;;  %v1051_v57 = vadd.f32 %v1007_v55, %v3948_v52  ;;  %v3950_v52 = vld [vmem:[#allocation44_spill] sm:$0xff] }
 0x2ee   : > { %v1866_v44 = vmul.f32 -1.442695, %v1050_v54  ;;  %v1867_v51 = vmul.f32 -1.442695, %v1051_v57 }
 0x2f0   : > { %1982 = vpow2.f32 %v1866_v44 }
 0x2f1   : > { %1984 = vpow2.f32 %v1867_v51 }
 0x2f2   : > { %v1047_v48 = vpop.f32.mrf.mxu3  ;;  %v1027_v53 = vpop.f32.mrf.mxu2 }
 0x2f3   : > { %v1053_v58 = vadd.f32 %v1047_v48, %v3949_v47  ;;  %v1052_v54 = vadd.f32 %v1027_v53, %v3950_v52 }
 0x2f5   : > { %v1868_v43 = vmul.f32 -1.442695, %v1053_v58 }
 0x2f6   : > { %v1983_v42 = vpop.eup %1982 }
 0x2f7   : > { %v1985_v41 = vpop.eup %1984  ;;  %v1057_v40 = vadd.f32 1.0, %v1983_v42  ;;  %1986 = vpow2.f32 %v1868_v43 }
 0x2f8   : > { %v1076_v39 = vadd.f32 1.0, %v1985_v41 }
 0x2f9   : > { %1988 = vrcp.f32 %v1057_v40  ;;  %v1069_v48 = vand.u32 2147483648, %v1057_v40  ;;  %v1067_v41 = vand.u32 2147483647, %v1057_v40  ;;  %vm1063_vm7 = vweird.f32 %v1057_v40 }
 0x2fa   : > { %1990 = vrcp.f32 %v1076_v39  ;;  %v1088_v58 = vand.u32 2147483648, %v1076_v39  ;;  %v1086_v37 = vand.u32 2147483647, %v1076_v39  ;;  %vm1082_vm8 = vweird.f32 %v1076_v39 }
 0x2fb   : > { %v1070_v53 = vor.u32 1.1754944e-38, %v1069_v48  ;;  %vm1068_vm11 = vcmp.eq.f32.partialorder %v1067_v41, 8.507059e+37  ;;  %v3957_v41 = vld [vmem:[#allocation15_spill] sm:$0xff] }
 0x2fc   : > { %vm1087_vm12 = vcmp.eq.f32.partialorder %v1086_v37, 8.507059e+37 }
 0x2fd   : > { %v1987_v38 = vpop.eup %1986 }
 0x2fe   : > { %v1096_v50 = vadd.f32 1.0, %v1987_v38 }
 0x2ff   : > { %v1989_v56 = vpop.eup %1988 }
 0x300   : > { %v1991_v55 = vpop.eup %1990  ;;  %v1059_v44 = vmul.f32 %v1989_v56, %v1057_v40  ;;  %1992 = vrcp.f32 %v1096_v50  ;;  %vm1064_vm5 = vweird.f32 %v1989_v56  ;;  %vm1102_vm14 = vweird.f32 %v1096_v50 }
 0x301   : > { %v1078_v51 = vmul.f32 %v1991_v55, %v1076_v39  ;;  %1994 = vtanh.f32 %v1052_v54  ;;  %vm1083_vm6 = vweird.f32 %v1991_v55  ;;  %vm1065_vm9 = vmor %vm1063_vm7, %vm1064_vm5 }
 0x302   : > { %v1060_v57 = vsub.f32 1.0, %v1059_v44  ;;  %vm1084_vm10 = vmor %vm1082_vm8, %vm1083_vm6  ;;  %v1089_v44 = vor.u32 1.1754944e-38, %v1088_v58  ;;  %v1108_v58 = vand.u32 2147483648, %v1096_v50 }
 0x303   : > { %v1079_v47 = vsub.f32 1.0, %v1078_v51 }
 0x304   : > { %v1061_v42 = vmul.f32 %v1989_v56, %v1060_v57 }
 0x305   : > { %v1080_v43 = vmul.f32 %v1991_v55, %v1079_v47 }
 0x306   : > { %v1993_v36 = vpop.eup %1992  ;;  %v1062_v38 = vadd.f32 %v1989_v56, %v1061_v42 }
 0x307   : > { %v1081_v52 = vadd.f32 %v1991_v55, %v1080_v43  ;;  %v1098_v35 = vmul.f32 %v1993_v36, %v1096_v50  ;;  %v1995_v54 = vpop.eup %1994  ;;  %vm1103_vm13 = vweird.f32 %v1993_v36  ;;  %v3958_v43 = vld [vmem:[#allocation17_spill] sm:$0xff] }
 0x308   : > { %v1066_v51 = vsel %vm1065_vm9, %v1989_v56, %v1062_v38  ;;  %v1106_v56 = vand.u32 2147483647, %v1096_v50  ;;  %vm1104_vm15 = vmor %vm1102_vm14, %vm1103_vm13  ;;  %v3956_v50 = vld [vmem:[#allocation14_spill] sm:$0xff]  ;;  %v3959_v38 = vld [vmem:[#allocation16_spill] sm:$0xff] }
 0x309   : > { %v1071_v34 = vsel %vm1068_vm11, %v1070_v53, %v1066_v51  ;;  %v1085_v57 = vsel %vm1084_vm10, %v1991_v55, %v1081_v52  ;;  %v1099_v10 = vsub.f32 1.0, %v1098_v35  ;;  %v1109_v55 = vor.u32 1.1754944e-38, %v1108_v58  ;;  %v3960_v53 = vld [vmem:[#allocation18_spill] sm:$0xff]  ;;  %v3961_v52 = vld [vmem:[#allocation19_spill] sm:$0xff]  ;;  %v3963_v51 = vld [vmem:[#allocation20_spill] sm:$0xff] }
 0x30a   : > { %v1090_v47 = vsel %vm1087_vm12, %v1089_v44, %v1085_v57  ;;  %v1113_v9 = vmul.f32 %v1995_v54, %v1071_v34  ;;  %vm1107_vm0 = vcmp.eq.f32.partialorder %v1106_v56, 8.507059e+37  ;;  %v3962_v44 = vld [vmem:[#allocation21_spill] sm:$0xff]  ;;  %v3964_v54 = vld [vmem:[#allocation22_spill] sm:$0xff]  ;;  %v3965_v57 = vld [vmem:[#allocation23_spill] sm:$0xff] }
 0x30b   : > { %v1112_v7 = vmul.f32 %v1090_v47, %v3293_v45  ;;  %v1100_v40 = vmul.f32 %v1993_v36, %v1099_v10  ;;  %v3951_v45 = vld [vmem:[#allocation8_spill] sm:$0xff]  ;;  %v3954_v10 = vld [vmem:[#allocation13_spill] sm:$0xff]  ;;  %v3969_v58 = vld [vmem:[#allocation27_spill] sm:$0xff] }
 0x30c   : > { %v3966_v47 = vld [vmem:[#allocation25_spill] sm:$0xff]  ;;  %v3970_v56 = vld [vmem:[#allocation28_spill] sm:$0xff] }
 0x30d   : > { %v3516_v39 = vadd.f32 %v1113_v9, %v1112_v7  ;;  %v1101_v48 = vadd.f32 %v1993_v36, %v1100_v40  ;;  %v3952_v7 = vld [vmem:[#allocation10_spill] sm:$0xff]  ;;  %v3953_v9 = vld [vmem:[#allocation11_spill] sm:$0xff]  ;;  %v3967_v40 = vld [vmem:[#allocation24_spill] sm:$0xff] }
 0x30f   : > { %1996 = vtanh.f32 %v3516_v39  ;;  %v1105_v42 = vsel %vm1104_vm15, %v1993_v36, %v1101_v48  ;;  %v3955_v36 = vld [vmem:[#allocation12_spill] sm:$0xff]  ;;  %v3968_v48 = vld [vmem:[#allocation26_spill] sm:$0xff] }
 0x310   : > { %v1110_v37 = vsel %vm1107_vm0, %v1109_v55, %v1105_v42  ;;  %v3971_v42 = vld [vmem:[#allocation29_spill] sm:$0xff]  ;;  %v3972_v55 = vld [vmem:[#allocation30_spill] sm:$0xff] }
 0x315   : > { %v1997_v35 = vpop.eup %1996 }
 0x316   : > { %v1116_v34 = vmul.f32 %v1997_v35, %v1110_v37  ;;  %v3973_v35 = vld [vmem:[#allocation31_spill] sm:$0xff]  ;;  %v3974_v37 = vld [vmem:[#allocation32_spill] sm:$0xff] }
 0x318   : > { %1869 = vst [vmem:[%s2270_s4 + $0x18] sm:$0xff] %v1116_v34  ;;  %1140 = vmatmul.f32.vlgmr.msrb.gmra.mxu0 %v1116_v34  ;;  %1160 = vmatmul.f32.vlgmr.msrb.gmra.mxu1 %v1116_v34 }
 0x319   : > { %1180 = vmatmul.f32.vlgmr.msrb.gmra.mxu2 %v1116_v34  ;;  %1200 = vmatmul.f32.vlgmr.msrb.gmra.mxu3 %v1116_v34  ;;  %v3975_v34 = vld [vmem:[#allocation33_spill] sm:$0xff] }
 0x31a   : > { %1432 = vmatpush.msrb.mxu0 %v3057_v32  ;;  %1452 = vmatpush.msrb.mxu1 %v3063_v33 }
 0x31b   : > { %1472 = vmatpush.msrb.mxu2 %v3069_v23  ;;  %1492 = vmatpush.msrb.mxu3 %v3075_v24 }
 0x31c   : > { %1433 = vmatpush.msrb.mxu0 %v3081_v15  ;;  %1453 = vmatpush.msrb.mxu1 %v3087_v29 }
 0x31d   : > { %1473 = vmatpush.msrb.mxu2 %v3093_v16  ;;  %1493 = vmatpush.msrb.mxu3 %v3099_v59 }
 0x31e   : > { %1434 = vmatpush.msrb.mxu0 %v3105_v28  ;;  %1454 = vmatpush.msrb.mxu1 %v3111_v14 }
 0x31f   : > { %1474 = vmatpush.msrb.mxu2 %v3117_v62  ;;  %1494 = vmatpush.msrb.mxu3 %v3123_v63 }
 0x320   : > { %1435 = vmatpush.msrb.mxu0 %v3129_v0  ;;  %1455 = vmatpush.msrb.mxu1 %v3135_v1 }
 0x321   : > { %1475 = vmatpush.msrb.mxu2 %v3141_v2  ;;  %1495 = vmatpush.msrb.mxu3 %v3147_v3 }
 0x322   : > { %1436 = vmatpush.msrb.mxu0 %v3153_v4  ;;  %1456 = vmatpush.msrb.mxu1 %v3159_v5 }
 0x323   : > { %1476 = vmatpush.msrb.mxu2 %v3165_v11  ;;  %1496 = vmatpush.msrb.mxu3 %v3171_v12 }
 0x324   : > { %1437 = vmatpush.msrb.mxu0 %v3177_v13  ;;  %1457 = vmatpush.msrb.mxu1 %v3183_v25 }
 0x325   : > { %1477 = vmatpush.msrb.mxu2 %v3189_v27  ;;  %1497 = vmatpush.msrb.mxu3 %v3195_v20 }
 0x326   : > { %1438 = vmatpush.msrb.mxu0 %v3201_v18  ;;  %1458 = vmatpush.msrb.mxu1 %v3207_v17 }
 0x327   : > { %1478 = vmatpush.msrb.mxu2 %v3213_v26  ;;  %1498 = vmatpush.msrb.mxu3 %v3219_v19 }
 0x328   : > { %1439 = vmatpush.msrb.mxu0 %v3225_v31  ;;  %1459 = vmatpush.msrb.mxu1 %v3920_v30 }
 0x329   : > { %1479 = vmatpush.msrb.mxu2 %v3237_v8  ;;  %1499 = vmatpush.msrb.mxu3 %v3243_v21 }
 0x32a   : > { %1440 = vmatpush.msrb.mxu0 %v3249_v46  ;;  %1460 = vmatpush.msrb.mxu1 %v3255_v22 }
 0x32b   : > { %1480 = vmatpush.msrb.mxu2 %v3334_v49  ;;  %1500 = vmatpush.msrb.mxu3 %v3340_v60 }
 0x32c   : > { %1441 = vmatpush.msrb.mxu0 %v3346_v61  ;;  %1461 = vmatpush.msrb.mxu1 %v3352_v6 }
 0x32d   : > { %1481 = vmatpush.msrb.mxu2 %v3951_v45  ;;  %1501 = vmatpush.msrb.mxu3 %v3952_v7 }
 0x32e   : > { %1442 = vmatpush.msrb.mxu0 %v3953_v9  ;;  %1462 = vmatpush.msrb.mxu1 %v3954_v10 }
 0x32f   : > { %1482 = vmatpush.msrb.mxu2 %v3955_v36  ;;  %1502 = vmatpush.msrb.mxu3 %v3956_v50 }
 0x330   : > { %1443 = vmatpush.msrb.mxu0 %v3957_v41  ;;  %1463 = vmatpush.msrb.mxu1 %v3958_v43 }
 0x331   : > { %1483 = vmatpush.msrb.mxu2 %v3959_v38  ;;  %1503 = vmatpush.msrb.mxu3 %v3960_v53 }
 0x332   : > { %1444 = vmatpush.msrb.mxu0 %v3961_v52  ;;  %1464 = vmatpush.msrb.mxu1 %v3962_v44 }
 0x333   : > { %1484 = vmatpush.msrb.mxu2 %v3963_v51  ;;  %1504 = vmatpush.msrb.mxu3 %v3964_v54  ;;  %v3977_v54 = vld [vmem:[#allocation46_spill] sm:$0xff]  ;;  %v3978_v51 = vld [vmem:[#allocation47_spill] sm:$0xff] }
 0x334   : > { %1445 = vmatpush.msrb.mxu0 %v3965_v57  ;;  %1465 = vmatpush.msrb.mxu1 %v3966_v47  ;;  %v3976_v57 = vld [vmem:[#allocation34_spill] sm:$0xff] }
 0x335   : > { %1485 = vmatpush.msrb.mxu2 %v3967_v40  ;;  %1505 = vmatpush.msrb.mxu3 %v3968_v48 }
 0x336   : > { %1446 = vmatpush.msrb.mxu0 %v3969_v58  ;;  %1466 = vmatpush.msrb.mxu1 %v3970_v56 }
 0x337   : > { %1486 = vmatpush.msrb.mxu2 %v3971_v42  ;;  %1506 = vmatpush.msrb.mxu3 %v3972_v55  ;;  %v3979_v55 = vld [vmem:[#allocation48_spill] sm:$0xff] }
 0x338   : > { %1447 = vmatpush.msrb.mxu0 %v3973_v35  ;;  %1467 = vmatpush.msrb.mxu1 %v3974_v37 }
 0x339   : > { %1487 = vmatpush.msrb.mxu2 %v3975_v34  ;;  %1507 = vmatpush.msrb.mxu3 %v3976_v57 }
 0x395   : > { %v1141_v47 = vpop.f32.mrf.mxu0  ;;  %v1161_v40 = vpop.f32.mrf.mxu1 }
 0x396   : > { %v1204_v48 = vadd.f32 %v1141_v47, %v3977_v54  ;;  %v1205_v58 = vadd.f32 %v1161_v40, %v3978_v51  ;;  %v3980_v51 = vld [vmem:[#allocation51_spill] sm:$0xff] }
 0x398   : > { %v1870_v44 = vmul.f32 -1.442695, %v1204_v48  ;;  %v1871_v56 = vmul.f32 -1.442695, %v1205_v58 }
 0x39a   : > { %1998 = vpow2.f32 %v1870_v44 }
 0x39b   : > { %2000 = vpow2.f32 %v1871_v56 }
 0x39c   : > { %v1201_v42 = vpop.f32.mrf.mxu3  ;;  %v1181_v57 = vpop.f32.mrf.mxu2 }
 0x39d   : > { %v1207_v52 = vadd.f32 %v1201_v42, %v3979_v55  ;;  %v1206_v40 = vadd.f32 %v1181_v57, %v3980_v51 }
 0x39f   : > { %v1872_v35 = vmul.f32 -1.442695, %v1207_v52 }
 0x3a0   : > { %v1999_v53 = vpop.eup %1998 }
 0x3a1   : > { %v2001_v37 = vpop.eup %2000  ;;  %v1211_v38 = vadd.f32 1.0, %v1999_v53  ;;  %2002 = vpow2.f32 %v1872_v35 }
 0x3a2   : > { %v1230_v34 = vadd.f32 1.0, %v2001_v37 }
 0x3a3   : > { %2004 = vrcp.f32 %v1211_v38  ;;  %v1223_v52 = vand.u32 2147483648, %v1211_v38  ;;  %v1221_v35 = vand.u32 2147483647, %v1211_v38  ;;  %vm1217_vm3 = vweird.f32 %v1211_v38 }
 0x3a4   : > { %2006 = vrcp.f32 %v1230_v34  ;;  %v1242_v55 = vand.u32 2147483648, %v1230_v34  ;;  %v1240_v41 = vand.u32 2147483647, %v1230_v34  ;;  %vm1236_vm4 = vweird.f32 %v1230_v34 }
 0x3a5   : > { %v1224_v57 = vor.u32 1.1754944e-38, %v1223_v52  ;;  %vm1222_vm7 = vcmp.eq.f32.partialorder %v1221_v35, 8.507059e+37 }
 0x3a6   : > { %vm1241_vm8 = vcmp.eq.f32.partialorder %v1240_v41, 8.507059e+37 }
 0x3a7   : > { %v2003_v43 = vpop.eup %2002 }
 0x3a8   : > { %v1250_v54 = vadd.f32 1.0, %v2003_v43 }
 0x3a9   : > { %v2005_v47 = vpop.eup %2004 }
 0x3aa   : > { %v2007_v48 = vpop.eup %2006  ;;  %v1213_v44 = vmul.f32 %v2005_v47, %v1211_v38  ;;  %2008 = vrcp.f32 %v1250_v54  ;;  %vm1218_vm1 = vweird.f32 %v2005_v47  ;;  %vm1256_vm10 = vweird.f32 %v1250_v54 }
 0x3ab   : > { %v1232_v58 = vmul.f32 %v2007_v48, %v1230_v34  ;;  %2010 = vtanh.f32 %v1206_v40  ;;  %vm1237_vm2 = vweird.f32 %v2007_v48  ;;  %vm1219_vm5 = vmor %vm1217_vm3, %vm1218_vm1 }
 0x3ac   : > { %v1214_v56 = vsub.f32 1.0, %v1213_v44  ;;  %vm1238_vm6 = vmor %vm1236_vm4, %vm1237_vm2  ;;  %v1243_v44 = vor.u32 1.1754944e-38, %v1242_v55  ;;  %v1262_v55 = vand.u32 2147483648, %v1250_v54 }
 0x3ad   : > { %v1233_v42 = vsub.f32 1.0, %v1232_v58 }
 0x3ae   : > { %v1215_v53 = vmul.f32 %v2005_v47, %v1214_v56 }
 0x3af   : > { %v1234_v37 = vmul.f32 %v2007_v48, %v1233_v42 }
 0x3b0   : > { %v2009_v50 = vpop.eup %2008  ;;  %v1216_v43 = vadd.f32 %v2005_v47, %v1215_v53 }
 0x3b1   : > { %v1235_v51 = vadd.f32 %v2007_v48, %v1234_v37  ;;  %v1252_v36 = vmul.f32 %v2009_v50, %v1250_v54  ;;  %v2011_v40 = vpop.eup %2010  ;;  %vm1257_vm9 = vweird.f32 %v2009_v50 }
 0x3b2   : > { %v1220_v58 = vsel %vm1219_vm5, %v2005_v47, %v1216_v43  ;;  %v1260_v47 = vand.u32 2147483647, %v1250_v54  ;;  %vm1258_vm11 = vmor %vm1256_vm10, %vm1257_vm9  ;;  %v4010_v43 = vld [vmem:[#allocation55_spill] sm:$0xff] }
 0x3b3   : > { %v1225_v10 = vsel %vm1222_vm7, %v1224_v57, %v1220_v58  ;;  %v1239_v56 = vsel %vm1238_vm6, %v2007_v48, %v1235_v51  ;;  %v1253_v9 = vsub.f32 1.0, %v1252_v36  ;;  %v1263_v48 = vor.u32 1.1754944e-38, %v1262_v55 }
 0x3b4   : > { %v1244_v42 = vsel %vm1241_vm8, %v1243_v44, %v1239_v56  ;;  %v1267_v7 = vmul.f32 %v2011_v40, %v1225_v10  ;;  %vm1261_vm12 = vcmp.eq.f32.partialorder %v1260_v47, 8.507059e+37 }
 0x3b5   : > { %v1266_v45 = vmul.f32 %v1244_v42, %v3516_v39  ;;  %v1254_v38 = vmul.f32 %v2009_v50, %v1253_v9 }
 0x3b7   : > { %v3589_v34 = vadd.f32 %v1267_v7, %v1266_v45  ;;  %v1255_v52 = vadd.f32 %v2009_v50, %v1254_v38 }
 0x3b9   : > { %2012 = vtanh.f32 %v3589_v34  ;;  %v1259_v53 = vsel %vm1258_vm11, %v2009_v50, %v1255_v52 }
 0x3ba   : > { %v1264_v41 = vsel %vm1261_vm12, %v1263_v48, %v1259_v53 }
 0x3bf   : > { %v2013_v36 = vpop.eup %2012 }
 0x3c0   : > { %v1270_v10 = vmul.f32 %v2013_v36, %v1264_v41 }
 0x3c2   : > { %1873 = vst [vmem:[%s2270_s4 + $0x20] sm:$0xff] %v1270_v10  ;;  %1294 = vmatmul.f32.vlgmr.msra.gmra.mxu0 %v1270_v10  ;;  %1314 = vmatmul.f32.vlgmr.msra.gmra.mxu1 %v1270_v10 }
 0x3c3   : > { %1334 = vmatmul.f32.vlgmr.msra.gmra.mxu2 %v1270_v10  ;;  %1354 = vmatmul.f32.vlgmr.msra.gmra.mxu3 %v1270_v10 }
 0x3c4   : > { %1586 = vmatpush.msra.mxu0 %v3057_v32  ;;  %1606 = vmatpush.msra.mxu1 %v3063_v33  ;;  %v3981_v32 = vld [vmem:[#allocation8_spill] sm:$0xff]  ;;  %v3982_v33 = vld [vmem:[#allocation10_spill] sm:$0xff] }
 0x3c5   : > { %1626 = vmatpush.msra.mxu2 %v3069_v23  ;;  %1646 = vmatpush.msra.mxu3 %v3075_v24  ;;  %v3983_v23 = vld [vmem:[#allocation11_spill] sm:$0xff]  ;;  %v3984_v24 = vld [vmem:[#allocation13_spill] sm:$0xff] }
 0x3c6   : > { %1587 = vmatpush.msra.mxu0 %v3081_v15  ;;  %1607 = vmatpush.msra.mxu1 %v3087_v29  ;;  %v3985_v15 = vld [vmem:[#allocation12_spill] sm:$0xff]  ;;  %v3986_v29 = vld [vmem:[#allocation14_spill] sm:$0xff] }
 0x3c7   : > { %1627 = vmatpush.msra.mxu2 %v3093_v16  ;;  %1647 = vmatpush.msra.mxu3 %v3099_v59  ;;  %v3987_v16 = vld [vmem:[#allocation15_spill] sm:$0xff]  ;;  %v3988_v59 = vld [vmem:[#allocation17_spill] sm:$0xff] }
 0x3c8   : > { %1588 = vmatpush.msra.mxu0 %v3105_v28  ;;  %1608 = vmatpush.msra.mxu1 %v3111_v14  ;;  %v3989_v28 = vld [vmem:[#allocation16_spill] sm:$0xff]  ;;  %v3990_v14 = vld [vmem:[#allocation18_spill] sm:$0xff] }
 0x3c9   : > { %1628 = vmatpush.msra.mxu2 %v3117_v62  ;;  %1648 = vmatpush.msra.mxu3 %v3123_v63  ;;  %v3991_v62 = vld [vmem:[#allocation19_spill] sm:$0xff]  ;;  %v3992_v63 = vld [vmem:[#allocation21_spill] sm:$0xff] }
 0x3ca   : > { %1589 = vmatpush.msra.mxu0 %v3129_v0  ;;  %1609 = vmatpush.msra.mxu1 %v3135_v1  ;;  %v3993_v0 = vld [vmem:[#allocation20_spill] sm:$0xff]  ;;  %v3994_v1 = vld [vmem:[#allocation22_spill] sm:$0xff] }
 0x3cb   : > { %1629 = vmatpush.msra.mxu2 %v3141_v2  ;;  %1649 = vmatpush.msra.mxu3 %v3147_v3  ;;  %v3995_v2 = vld [vmem:[#allocation23_spill] sm:$0xff]  ;;  %v3996_v3 = vld [vmem:[#allocation25_spill] sm:$0xff] }
 0x3cc   : > { %1590 = vmatpush.msra.mxu0 %v3153_v4  ;;  %1610 = vmatpush.msra.mxu1 %v3159_v5  ;;  %v3997_v4 = vld [vmem:[#allocation24_spill] sm:$0xff]  ;;  %v3998_v5 = vld [vmem:[#allocation26_spill] sm:$0xff] }
 0x3cd   : > { %1630 = vmatpush.msra.mxu2 %v3165_v11  ;;  %1650 = vmatpush.msra.mxu3 %v3171_v12  ;;  %v3999_v11 = vld [vmem:[#allocation27_spill] sm:$0xff]  ;;  %v4000_v12 = vld [vmem:[#allocation28_spill] sm:$0xff] }
 0x3ce   : > { %1591 = vmatpush.msra.mxu0 %v3177_v13  ;;  %1611 = vmatpush.msra.mxu1 %v3183_v25  ;;  %v4001_v13 = vld [vmem:[#allocation29_spill] sm:$0xff]  ;;  %v4002_v25 = vld [vmem:[#allocation30_spill] sm:$0xff] }
 0x3cf   : > { %1631 = vmatpush.msra.mxu2 %v3189_v27  ;;  %1651 = vmatpush.msra.mxu3 %v3195_v20  ;;  %v4003_v27 = vld [vmem:[#allocation31_spill] sm:$0xff]  ;;  %v4004_v20 = vld [vmem:[#allocation32_spill] sm:$0xff] }
 0x3d0   : > { %1592 = vmatpush.msra.mxu0 %v3201_v18  ;;  %1612 = vmatpush.msra.mxu1 %v3207_v17  ;;  %v4005_v18 = vld [vmem:[#allocation33_spill] sm:$0xff]  ;;  %v4006_v17 = vld [vmem:[#allocation34_spill] sm:$0xff] }
 0x3d1   : > { %1632 = vmatpush.msra.mxu2 %v3213_v26  ;;  %1652 = vmatpush.msra.mxu3 %v3219_v19 }
 0x3d2   : > { %1593 = vmatpush.msra.mxu0 %v3225_v31  ;;  %1613 = vmatpush.msra.mxu1 %v3920_v30  ;;  %v4007_v31 = vld [vmem:[#allocation49_spill] sm:$0xff] }
 0x3d3   : > { %1633 = vmatpush.msra.mxu2 %v3237_v8  ;;  %1653 = vmatpush.msra.mxu3 %v3243_v21  ;;  %v4008_v8 = vld [vmem:[#allocation50_spill] sm:$0xff] }
 0x3d4   : > { %1594 = vmatpush.msra.mxu0 %v3249_v46  ;;  %1614 = vmatpush.msra.mxu1 %v3255_v22 }
 0x3d5   : > { %1634 = vmatpush.msra.mxu2 %v3334_v49  ;;  %1654 = vmatpush.msra.mxu3 %v3340_v60  ;;  %v4009_v60 = vld [vmem:[#allocation52_spill] sm:$0xff] }
 0x3d6   : > { %1595 = vmatpush.msra.mxu0 %v3346_v61  ;;  %1615 = vmatpush.msra.mxu1 %v3352_v6 }
 0x3d7   : > { %1635 = vmatpush.msra.mxu2 %v3981_v32  ;;  %1655 = vmatpush.msra.mxu3 %v3982_v33 }
 0x3d8   : > { %1596 = vmatpush.msra.mxu0 %v3983_v23  ;;  %1616 = vmatpush.msra.mxu1 %v3984_v24 }
 0x3d9   : > { %1636 = vmatpush.msra.mxu2 %v3985_v15  ;;  %1656 = vmatpush.msra.mxu3 %v3986_v29 }
 0x3da   : > { %1597 = vmatpush.msra.mxu0 %v3987_v16  ;;  %1617 = vmatpush.msra.mxu1 %v3988_v59 }
 0x3db   : > { %1637 = vmatpush.msra.mxu2 %v3989_v28  ;;  %1657 = vmatpush.msra.mxu3 %v3990_v14 }
 0x3dc   : > { %1598 = vmatpush.msra.mxu0 %v3991_v62  ;;  %1618 = vmatpush.msra.mxu1 %v3992_v63 }
 0x3dd   : > { %1638 = vmatpush.msra.mxu2 %v3993_v0  ;;  %1658 = vmatpush.msra.mxu3 %v3994_v1 }
 0x3de   : > { %1599 = vmatpush.msra.mxu0 %v3995_v2  ;;  %1619 = vmatpush.msra.mxu1 %v3996_v3 }
 0x3df   : > { %1639 = vmatpush.msra.mxu2 %v3997_v4  ;;  %1659 = vmatpush.msra.mxu3 %v3998_v5 }
 0x3e0   : > { %1600 = vmatpush.msra.mxu0 %v3999_v11  ;;  %1620 = vmatpush.msra.mxu1 %v4000_v12 }
 0x3e1   : > { %1640 = vmatpush.msra.mxu2 %v4001_v13  ;;  %1660 = vmatpush.msra.mxu3 %v4002_v25  ;;  %v4011_v25 = vld [vmem:[#allocation53_spill] sm:$0xff] }
 0x3e2   : > { %1601 = vmatpush.msra.mxu0 %v4003_v27  ;;  %1621 = vmatpush.msra.mxu1 %v4004_v20  ;;  %v4012_v20 = vld [vmem:[#allocation54_spill] sm:$0xff] }
 0x3e3   : > { %1641 = vmatpush.msra.mxu2 %v4005_v18  ;;  %1661 = vmatpush.msra.mxu3 %v4006_v17 }
 0x43f   : > { %v1295_v26 = vpop.f32.mrf.mxu0  ;;  %v1315_v19 = vpop.f32.mrf.mxu1 }
 0x440   : > { %v1358_v22 = vadd.f32 %v1295_v26, %v4007_v31  ;;  %v1359_v21 = vadd.f32 %v1315_v19, %v4008_v8  ;;  %v4013_v31 = vld [vmem:[#allocation56_spill] sm:$0xff] }
 0x442   : > { %v1874_v46 = vmul.f32 -1.442695, %v1358_v22  ;;  %v1875_v30 = vmul.f32 -1.442695, %v1359_v21 }
 0x444   : > { %2014 = vpow2.f32 %v1874_v46 }
 0x445   : > { %2016 = vpow2.f32 %v1875_v30 }
 0x446   : > { %v1355_v49 = vpop.f32.mrf.mxu3  ;;  %v1335_v50 = vpop.f32.mrf.mxu2 }
 0x447   : > { %v1361_v61 = vadd.f32 %v1355_v49, %v4009_v60  ;;  %v1360_v57 = vadd.f32 %v1335_v50, %v4010_v43 }
 0x449   : > { %v1876_v6 = vmul.f32 -1.442695, %v1361_v61 }
 0x44a   : > { %v2015_v39 = vpop.eup %2014 }
 0x44b   : > { %v2017_v45 = vpop.eup %2016  ;;  %v1365_v7 = vadd.f32 1.0, %v2015_v39  ;;  %2018 = vpow2.f32 %v1876_v6 }
 0x44c   : > { %v1384_v9 = vadd.f32 1.0, %v2017_v45  ;;  %v4014_v45 = vld [vmem:[#allocation59_spill] sm:$0xff] }
 0x44d   : > { %2020 = vrcp.f32 %v1365_v7  ;;  %v1377_v42 = vand.u32 2147483648, %v1365_v7  ;;  %v1375_v55 = vand.u32 2147483647, %v1365_v7  ;;  %vm1371_vm15 = vweird.f32 %v1365_v7 }
 0x44e   : > { %2022 = vrcp.f32 %v1384_v9  ;;  %v1396_v38 = vand.u32 2147483648, %v1384_v9  ;;  %v1394_v53 = vand.u32 2147483647, %v1384_v9  ;;  %vm1390_vm0 = vweird.f32 %v1384_v9 }
 0x44f   : > { %v1378_v41 = vor.u32 1.1754944e-38, %v1377_v42  ;;  %vm1376_vm3 = vcmp.eq.f32.partialorder %v1375_v55, 8.507059e+37 }
 0x450   : > { %v1397_v33 = vor.u32 1.1754944e-38, %v1396_v38  ;;  %vm1395_vm4 = vcmp.eq.f32.partialorder %v1394_v53, 8.507059e+37 }
 0x451   : > { %v2019_v54 = vpop.eup %2018 }
 0x452   : > { %v1404_v35 = vadd.f32 1.0, %v2019_v54 }
 0x453   : > { %v2021_v37 = vpop.eup %2020 }
 0x454   : > { %v2023_v51 = vpop.eup %2022  ;;  %v1367_v44 = vmul.f32 %v2021_v37, %v1365_v7  ;;  %2024 = vrcp.f32 %v1404_v35  ;;  %vm1372_vm13 = vweird.f32 %v2021_v37  ;;  %v1416_v1 = vand.u32 2147483648, %v1404_v35 }
 0x455   : > { %v1386_v58 = vmul.f32 %v2023_v51, %v1384_v9  ;;  %2026 = vtanh.f32 %v1360_v57  ;;  %vm1391_vm14 = vweird.f32 %v2023_v51  ;;  %vm1373_vm1 = vmor %vm1371_vm15, %vm1372_vm13  ;;  %vm1410_vm6 = vweird.f32 %v1404_v35 }
 0x456   : > { %v1368_v40 = vsub.f32 1.0, %v1367_v44  ;;  %vm1392_vm2 = vmor %vm1390_vm0, %vm1391_vm14  ;;  %v1414_v2 = vand.u32 2147483647, %v1404_v35  ;;  %v1417_v4 = vor.u32 1.1754944e-38, %v1416_v1 }
 0x457   : > { %v1387_v56 = vsub.f32 1.0, %v1386_v58 }
 0x458   : > { %v1369_v52 = vmul.f32 %v2021_v37, %v1368_v40  ;;  %vm1415_vm8 = vcmp.eq.f32.partialorder %v1414_v2, 8.507059e+37 }
 0x459   : > { %v1388_v47 = vmul.f32 %v2023_v51, %v1387_v56 }
 0x45a   : > { %v2025_v48 = vpop.eup %2024  ;;  %v1370_v36 = vadd.f32 %v2021_v37, %v1369_v52 }
 0x45b   : > { %v1389_v10 = vadd.f32 %v2023_v51, %v1388_v47  ;;  %v1406_v32 = vmul.f32 %v2025_v48, %v1404_v35  ;;  %v2027_v24 = vpop.eup %2026  ;;  %vm1411_vm5 = vweird.f32 %v2025_v48 }
 0x45c   : > { %v1374_v23 = vsel %vm1373_vm1, %v2021_v37, %v1370_v36  ;;  %vm1412_vm7 = vmor %vm1410_vm6, %vm1411_vm5 }
 0x45d   : > { %v1379_v15 = vsel %vm1376_vm3, %v1378_v41, %v1374_v23  ;;  %v1393_v29 = vsel %vm1392_vm2, %v2023_v51, %v1389_v10  ;;  %v1407_v16 = vsub.f32 1.0, %v1406_v32 }
 0x45e   : > { %v1398_v59 = vsel %vm1395_vm4, %v1397_v33, %v1393_v29  ;;  %v1421_v28 = vmul.f32 %v2027_v24, %v1379_v15 }
 0x45f   : > { %v1420_v14 = vmul.f32 %v1398_v59, %v3589_v34  ;;  %v1408_v62 = vmul.f32 %v2025_v48, %v1407_v16 }
 0x461   : > { %v3662_v63 = vadd.f32 %v1421_v28, %v1420_v14  ;;  %v1409_v0 = vadd.f32 %v2025_v48, %v1408_v62 }
 0x463   : > { %2028 = vtanh.f32 %v3662_v63  ;;  %v1413_v3 = vsel %vm1412_vm7, %v2025_v48, %v1409_v0 }
 0x464   : > { %v1418_v11 = vsel %vm1415_vm8, %v1417_v4, %v1413_v3  ;;  %v4015_v3 = vld [vmem:[#allocation57_spill] sm:$0xff] }
 0x469   : > { %v2029_v5 = vpop.eup %2028 }
 0x46a   : > { %v1424_v12 = vmul.f32 %v2029_v5, %v1418_v11  ;;  %v4016_v5 = vld [vmem:[#allocation58_spill] sm:$0xff] }
 0x46c   : > { %1877 = vst [vmem:[%s2270_s4 + $0x28] sm:$0xff] %v1424_v12  ;;  %1448 = vmatmul.f32.vlgmr.msrb.gmra.mxu0 %v1424_v12  ;;  %1468 = vmatmul.f32.vlgmr.msrb.gmra.mxu1 %v1424_v12 }
 0x46d   : > { %1488 = vmatmul.f32.vlgmr.msrb.gmra.mxu2 %v1424_v12  ;;  %1508 = vmatmul.f32.vlgmr.msrb.gmra.mxu3 %v1424_v12 }
 0x4e9   : > { %v1449_v34 = vpop.f32.mrf.mxu0  ;;  %v1469_v13 = vpop.f32.mrf.mxu1 }
 0x4ea   : > { %v1512_v27 = vadd.f32 %v1449_v34, %v4011_v25  ;;  %v1513_v18 = vadd.f32 %v1469_v13, %v4012_v20  ;;  %v4017_v25 = vld [vmem:[#allocation60_spill] sm:$0xff] }
 0x4ec   : > { %v1878_v17 = vmul.f32 -1.442695, %v1512_v27  ;;  %v1879_v26 = vmul.f32 -1.442695, %v1513_v18 }
 0x4ee   : > { %2030 = vpow2.f32 %v1878_v17 }
 0x4ef   : > { %2032 = vpow2.f32 %v1879_v26 }
 0x4f0   : > { %v1509_v19 = vpop.f32.mrf.mxu3  ;;  %v1489_v60 = vpop.f32.mrf.mxu2 }
 0x4f1   : > { %v1515_v22 = vadd.f32 %v1509_v19, %v4013_v31  ;;  %v1514_v7 = vadd.f32 %v1489_v60, %v4014_v45 }
 0x4f3   : > { %v1880_v8 = vmul.f32 -1.442695, %v1515_v22 }
 0x4f4   : > { %v2031_v21 = vpop.eup %2030 }
 0x4f5   : > { %v2033_v46 = vpop.eup %2032  ;;  %v1519_v30 = vadd.f32 1.0, %v2031_v21  ;;  %2034 = vpow2.f32 %v1880_v8 }
 0x4f6   : > { %v1538_v49 = vadd.f32 1.0, %v2033_v46  ;;  %v4018_v46 = vld [vmem:[#allocation61_spill] sm:$0xff] }
 0x4f7   : > { %2036 = vrcp.f32 %v1519_v30  ;;  %v1531_v43 = vand.u32 2147483648, %v1519_v30  ;;  %v1529_v44 = vand.u32 2147483647, %v1519_v30  ;;  %vm1525_vm11 = vweird.f32 %v1519_v30 }
 0x4f8   : > { %2038 = vrcp.f32 %v1538_v49  ;;  %v1550_v57 = vand.u32 2147483648, %v1538_v49  ;;  %v1548_v40 = vand.u32 2147483647, %v1538_v49  ;;  %vm1544_vm12 = vweird.f32 %v1538_v49 }
 0x4f9   : > { %v1532_v38 = vor.u32 1.1754944e-38, %v1531_v43  ;;  %vm1530_vm15 = vcmp.eq.f32.partialorder %v1529_v44, 8.507059e+37 }
 0x4fa   : > { %v1551_v47 = vor.u32 1.1754944e-38, %v1550_v57  ;;  %vm1549_vm0 = vcmp.eq.f32.partialorder %v1548_v40, 8.507059e+37 }
 0x4fb   : > { %v2035_v61 = vpop.eup %2034 }
 0x4fc   : > { %v1558_v6 = vadd.f32 1.0, %v2035_v61 }
 0x4fd   : > { %v2037_v39 = vpop.eup %2036 }
 0x4fe   : > { %v2039_v9 = vpop.eup %2038  ;;  %v1521_v50 = vmul.f32 %v2037_v39, %v1519_v30  ;;  %2040 = vrcp.f32 %v1558_v6  ;;  %vm1526_vm9 = vweird.f32 %v2037_v39  ;;  %v1570_v16 = vand.u32 2147483648, %v1558_v6 }
 0x4ff   : > { %v1540_v54 = vmul.f32 %v2039_v9, %v1538_v49  ;;  %2042 = vtanh.f32 %v1514_v7  ;;  %vm1545_vm10 = vweird.f32 %v2039_v9  ;;  %vm1527_vm13 = vmor %vm1525_vm11, %vm1526_vm9  ;;  %vm1564_vm2 = vweird.f32 %v1558_v6 }
 0x500   : > { %v1522_v35 = vsub.f32 1.0, %v1521_v50  ;;  %vm1546_vm14 = vmor %vm1544_vm12, %vm1545_vm10  ;;  %v1568_v59 = vand.u32 2147483647, %v1558_v6  ;;  %v1571_v14 = vor.u32 1.1754944e-38, %v1570_v16 }
 0x501   : > { %v1541_v37 = vsub.f32 1.0, %v1540_v54 }
 0x502   : > { %v1523_v51 = vmul.f32 %v2037_v39, %v1522_v35  ;;  %vm1569_vm4 = vcmp.eq.f32.partialorder %v1568_v59, 8.507059e+37 }
 0x503   : > { %v1542_v58 = vmul.f32 %v2039_v9, %v1541_v37 }
 0x504   : > { %v2041_v56 = vpop.eup %2040  ;;  %v1524_v42 = vadd.f32 %v2037_v39, %v1523_v51 }
 0x505   : > { %v1543_v52 = vadd.f32 %v2039_v9, %v1542_v58  ;;  %v1560_v55 = vmul.f32 %v2041_v56, %v1558_v6  ;;  %v2043_v48 = vpop.eup %2042  ;;  %vm1565_vm1 = vweird.f32 %v2041_v56 }
 0x506   : > { %v1528_v53 = vsel %vm1527_vm13, %v2037_v39, %v1524_v42  ;;  %vm1566_vm3 = vmor %vm1564_vm2, %vm1565_vm1 }
 0x507   : > { %v1533_v36 = vsel %vm1530_vm15, %v1532_v38, %v1528_v53  ;;  %v1547_v41 = vsel %vm1546_vm14, %v2039_v9, %v1543_v52  ;;  %v1561_v10 = vsub.f32 1.0, %v1560_v55 }
 0x508   : > { %v1552_v32 = vsel %vm1549_vm0, %v1551_v47, %v1547_v41  ;;  %v1575_v33 = vmul.f32 %v2043_v48, %v1533_v36 }
 0x509   : > { %v1574_v23 = vmul.f32 %v1552_v32, %v3662_v63  ;;  %v1562_v24 = vmul.f32 %v2041_v56, %v1561_v10 }
 0x50b   : > { %v3671_v15 = vadd.f32 %v1575_v33, %v1574_v23  ;;  %v1563_v29 = vadd.f32 %v2041_v56, %v1562_v24 }
 0x50d   : > { %2044 = vtanh.f32 %v3671_v15  ;;  %v1567_v28 = vsel %vm1566_vm3, %v2041_v56, %v1563_v29 }
 0x50e   : > { %v1572_v0 = vsel %vm1569_vm4, %v1571_v14, %v1567_v28 }
 0x513   : > { %v2045_v62 = vpop.eup %2044 }
 0x514   : > { %v1578_v1 = vmul.f32 %v2045_v62, %v1572_v0 }
 0x516   : > { %1881 = vst [vmem:[%s2270_s4 + $0x30] sm:$0xff] %v1578_v1  ;;  %1602 = vmatmul.f32.vlgmr.msra.gmra.mxu0 %v1578_v1  ;;  %1622 = vmatmul.f32.vlgmr.msra.gmra.mxu1 %v1578_v1 }
 0x517   : > { %1642 = vmatmul.f32.vlgmr.msra.gmra.mxu2 %v1578_v1  ;;  %1662 = vmatmul.f32.vlgmr.msra.gmra.mxu3 %v1578_v1 }
 0x593   : > { %v1603_v63 = vpop.f32.mrf.mxu0  ;;  %v1623_v2 = vpop.f32.mrf.mxu1 }
 0x594   : > { %v1666_v4 = vadd.f32 %v1603_v63, %v4015_v3  ;;  %v1667_v11 = vadd.f32 %v1623_v2, %v4016_v5 }
 0x596   : > { %v1882_v12 = vmul.f32 -1.442695, %v1666_v4  ;;  %v1883_v34 = vmul.f32 -1.442695, %v1667_v11 }
 0x598   : > { %2046 = vpow2.f32 %v1882_v12 }
 0x599   : > { %2048 = vpow2.f32 %v1883_v34 }
 0x59a   : > { %v1663_v13 = vpop.f32.mrf.mxu3  ;;  %v1643_v31 = vpop.f32.mrf.mxu2 }
 0x59b   : > { %v1669_v27 = vadd.f32 %v1663_v13, %v4017_v25  ;;  %v1668_v30 = vadd.f32 %v1643_v31, %v4018_v46 }
 0x59d   : > { %v1884_v20 = vmul.f32 -1.442695, %v1669_v27 }
 0x59e   : > { %v2047_v18 = vpop.eup %2046 }
 0x59f   : > { %v2049_v17 = vpop.eup %2048  ;;  %v1673_v26 = vadd.f32 1.0, %v2047_v18  ;;  %2050 = vpow2.f32 %v1884_v20 }
 0x5a0   : > { %v1692_v19 = vadd.f32 1.0, %v2049_v17 }
 0x5a1   : > { %2052 = vrcp.f32 %v1673_v26  ;;  %v1685_v45 = vand.u32 2147483648, %v1673_v26  ;;  %v1683_v50 = vand.u32 2147483647, %v1673_v26  ;;  %vm1679_vm7 = vweird.f32 %v1673_v26 }
 0x5a2   : > { %2054 = vrcp.f32 %v1692_v19  ;;  %v1704_v7 = vand.u32 2147483648, %v1692_v19  ;;  %v1702_v35 = vand.u32 2147483647, %v1692_v19  ;;  %vm1698_vm8 = vweird.f32 %v1692_v19 }
 0x5a3   : > { %v1686_v57 = vor.u32 1.1754944e-38, %v1685_v45  ;;  %vm1684_vm11 = vcmp.eq.f32.partialorder %v1683_v50, 8.507059e+37 }
 0x5a4   : > { %v1705_v58 = vor.u32 1.1754944e-38, %v1704_v7  ;;  %vm1703_vm12 = vcmp.eq.f32.partialorder %v1702_v35, 8.507059e+37 }
 0x5a5   : > { %v2051_v22 = vpop.eup %2050 }
 0x5a6   : > { %v1712_v8 = vadd.f32 1.0, %v2051_v22 }
 0x5a7   : > { %v2053_v21 = vpop.eup %2052 }
 0x5a8   : > { %v2055_v49 = vpop.eup %2054  ;;  %v1675_v60 = vmul.f32 %v2053_v21, %v1673_v26  ;;  %2056 = vrcp.f32 %v1712_v8  ;;  %vm1680_vm5 = vweird.f32 %v2053_v21  ;;  %v1724_v10 = vand.u32 2147483648, %v1712_v8 }
 0x5a9   : > { %v1694_v61 = vmul.f32 %v2055_v49, %v1692_v19  ;;  %2058 = vtanh.f32 %v1668_v30  ;;  %vm1699_vm6 = vweird.f32 %v2055_v49  ;;  %vm1681_vm9 = vmor %vm1679_vm7, %vm1680_vm5  ;;  %vm1718_vm14 = vweird.f32 %v1712_v8 }
 0x5aa   : > { %v1676_v6 = vsub.f32 1.0, %v1675_v60  ;;  %vm1700_vm10 = vmor %vm1698_vm8, %vm1699_vm6  ;;  %v1722_v32 = vand.u32 2147483647, %v1712_v8  ;;  %v1725_v23 = vor.u32 1.1754944e-38, %v1724_v10 }
 0x5ab   : > { %v1695_v39 = vsub.f32 1.0, %v1694_v61 }
 0x5ac   : > { %v1677_v9 = vmul.f32 %v2053_v21, %v1676_v6  ;;  %vm1723_vm0 = vcmp.eq.f32.partialorder %v1722_v32, 8.507059e+37 }
 0x5ad   : > { %v1696_v54 = vmul.f32 %v2055_v49, %v1695_v39 }
 0x5ae   : > { %v2057_v37 = vpop.eup %2056  ;;  %v1678_v43 = vadd.f32 %v2053_v21, %v1677_v9 }
 0x5af   : > { %v1697_v51 = vadd.f32 %v2055_v49, %v1696_v54  ;;  %v1714_v44 = vmul.f32 %v2057_v37, %v1712_v8  ;;  %v2059_v56 = vpop.eup %2058  ;;  %vm1719_vm13 = vweird.f32 %v2057_v37 }
 0x5b0   : > { %v1682_v40 = vsel %vm1681_vm9, %v2053_v21, %v1678_v43  ;;  %vm1720_vm15 = vmor %vm1718_vm14, %vm1719_vm13 }
 0x5b1   : > { %v1687_v42 = vsel %vm1684_vm11, %v1686_v57, %v1682_v40  ;;  %v1701_v38 = vsel %vm1700_vm10, %v2055_v49, %v1697_v51  ;;  %v1715_v52 = vsub.f32 1.0, %v1714_v44 }
 0x5b2   : > { %v1706_v55 = vsel %vm1703_vm12, %v1705_v58, %v1701_v38  ;;  %v1729_v47 = vmul.f32 %v2059_v56, %v1687_v42 }
 0x5b3   : > { %v1728_v53 = vmul.f32 %v1706_v55, %v3671_v15  ;;  %v1716_v48 = vmul.f32 %v2057_v37, %v1715_v52 }
 0x5b5   : > { %v1730_v36 = vadd.f32 %v1729_v47, %v1728_v53  ;;  %v1717_v41 = vadd.f32 %v2057_v37, %v1716_v48 }
 0x5b7   : > { %2060 = vtanh.f32 %v1730_v36  ;;  %1736 = vst [vmem:[#allocation3] sm:$0xff] %v1730_v36  ;;  %v1721_v33 = vsel %vm1720_vm15, %v2057_v37, %v1717_v41 }
 0x5b8   : > { %v1726_v15 = vsel %vm1723_vm0, %v1725_v23, %v1721_v33 }
 0x5bd   : > { %v2061_v24 = vpop.eup %2060 }
 0x5be   : > { %v1732_v29 = vmul.f32 %v2061_v24, %v1726_v15 }
 0x5c0   : > { %1885 = vst [vmem:[%s2270_s4 + $0x38] sm:$0xff] %v1732_v29 }
 0x5c1   : > { %1735 = vst [vmem:[#allocation2] sm:$0xff] %v1732_v29 }
 0x5c2   : > { %2153 = shalt.err (!%p2150_p4)
}
 0x5c3   : > { %s2191_s24 = smov 128   ;;  %s2192_s4 = smov 8  }
 0x5c4   : > { %1892 = dma.vmem_to_hbm [thread:$0]  (%p2251_p5), %s1751_s5, 1024, %s1753_s6, %s1738_s16, %s2191_s24, %s2191_s24, %s2192_s4  }
 0x5c5 PF: > { %p1898_p7 = scmp.ge.s32.totalorder %s2188_s15, 2  ;;  %s1767_s20 = sand.u32 1, %s2176_s12  }
 0x5c6   : > { %s1768_s25 = scalar_lea.sflag [#allocation6], %s1767_s20 }
 0x5c7   : > { %p1895_p8 = pnand %p1898_p7, %p2255_p6 }
 0x5c9   : > { %p1896_p9 = pneg %p1895_p8 }
 0x5cb   : > { %2171 = dma.done.wait (%p1896_p9), %s1768_s25, 1024  }
 0x5cc   : > { %2173 = vsyncadd (%p1896_p9), %s1768_s25, 4294966272  ;;  %p13_p10 = scmp.ge.s32.totalorder %s2238_s18, 4   ;;  %s4019_s12 = smov %s2180_s13 }
 0x5cd   : > { %s4020_s13 = smov %s2184_s14  ;;  %s4021_s14 = smov %s2249_s21 }
 0x5ce   : > { %s4022_s15 = smov %s2238_s18  ;;  %15 = sbr.rel (!%p13_p10) target bundleno = 3 (0x3), region = 85 }
 0x5d3   :  { %1774 = vsyncpa [#allocation6], 1 }
 0x5d4   :  { %1776 = vsyncpa [#allocation6 + $0x1], 1 }

</bundles_post_ra>
